<compile_context>
chip_gen: v5e
topology: v5e:2x2
jax: 0.10.0
libtpu: 0.0.40
codegen_flags: <defaults>
</compile_context>

<pallas_src>
import math
import functools

import jax
import jax.numpy as jnp
from jax import lax
from jax.experimental import pallas as pl
from jax.experimental.pallas import tpu as pltpu


ACT_DTYPE = jnp.bfloat16      # activation / weight stream dtype (f32 accumulate)
_NEG_BIG = -1e30              # finite "-inf" for masking (NaN-safe)

# ----------------------- generation-aware budgets ---------------------------

try:
    _VMEM_BYTES = int(getattr(pltpu.get_tpu_info(), "vmem_capacity_bytes",
                              64 * 1024 * 1024))
except Exception:  # pragma: no cover - conservative default (v7x-sized)
    _VMEM_BYTES = 64 * 1024 * 1024

if _VMEM_BYTES >= 96 * 1024 * 1024:          # v5e / v6e (128 MiB VMEM)
    PREF_TM, PREF_TN, PREF_TK = 512, 1024, 1024
    PREF_ROWS = 1024
    ATTN_TQ, ATTN_TK = 256, 512
    FFN_TM = 512
    FFN_FUSE_BUDGET = 48 * 1024 * 1024
    FFN_VMEM_LIMIT = 100 * 1024 * 1024
else:                                        # v7x (64 MiB VMEM per core)
    PREF_TM, PREF_TN, PREF_TK = 256, 512, 512
    PREF_ROWS = 512
    ATTN_TQ, ATTN_TK = 128, 256
    FFN_TM = 256
    FFN_FUSE_BUDGET = 18 * 1024 * 1024
    FFN_VMEM_LIMIT = None


def _pick_tile(dim, preferred, aligns=(8,)):
    """Largest tile <= preferred that divides `dim` and is a multiple of one of
    `aligns` (tried in order), falling back to the full dimension (always legal
    because a block equal to the full array dim satisfies the (8,128) rule)."""
    if dim <= preferred:
        return dim
    for align in aligns:
        t = (preferred // align) * align
        while t >= align:
            if dim % t == 0:
                return t
            t -= align
    return dim


# ----------------------- tiled linear (+bias, +relu, +residual, +LN) --------

def _linear_kernel(*refs, relu, has_res, fuse_ln, eps):
    x_ref, w_ref, b_ref = refs[0], refs[1], refs[2]
    idx = 3
    r_ref = g_ref = bb_ref = None
    if has_res:
        r_ref = refs[idx]
        idx += 1
    if fuse_ln:
        g_ref, bb_ref = refs[idx], refs[idx + 1]
        idx += 2
    o_ref, acc_ref = refs[idx], refs[idx + 1]

    @pl.when(pl.program_id(2) == 0)
    def _():
        acc_ref[...] = jnp.zeros_like(acc_ref)

    acc_ref[...] += jnp.dot(x_ref[...], w_ref[...],
                            preferred_element_type=jnp.float32)

    @pl.when(pl.program_id(2) == pl.num_programs(2) - 1)
    def _():
        y = acc_ref[...] + b_ref[...]
        if relu:
            y = jnp.maximum(y, 0.0)
        if has_res:
            y = y + r_ref[...].astype(jnp.float32)
        if fuse_ln:
            mu = jnp.mean(y, axis=-1, keepdims=True)
            var = jnp.mean((y - mu) ** 2, axis=-1, keepdims=True)
            y = (y - mu) * lax.rsqrt(var + eps) * g_ref[...] + bb_ref[...]
        o_ref[...] = y.astype(o_ref.dtype)


def linear_pallas(x, w, b=None, relu=False, residual=None, ln=None,
                  eps=1e-5, out_dtype=ACT_DTYPE):
    """y = LN?( [relu](x @ w + b) [+ residual] ).  x:(M,K) w:(K,N) b:(N,)."""
    M, K = x.shape
    N = w.shape[1]
    x = x.astype(ACT_DTYPE)
    w = w.astype(ACT_DTYPE)
    bias = jnp.zeros((N,), jnp.float32) if b is None else b.astype(jnp.float32)
    b2 = bias.reshape(1, N)
    res = residual

    # Pad awkward dims so tiles stay MXU/lane aligned (no-op at typical shapes).
    mpad = (-M) % 8
    kpad = ((-K) % 128) if K > 128 else 0
    npad = ((-N) % 128) if N > 128 else 0
    if mpad:
        x = jnp.pad(x, ((0, mpad), (0, 0)))
    if kpad:
        x = jnp.pad(x, ((0, 0), (0, kpad)))
        w = jnp.pad(w, ((0, kpad), (0, 0)))
    if npad:
        w = jnp.pad(w, ((0, 0), (0, npad)))
        b2 = jnp.pad(b2, ((0, 0), (0, npad)))
    if res is not None and (mpad or npad):
        res = jnp.pad(res, ((0, mpad), (0, npad)))

    Mp, Kp = x.shape
    Np = w.shape[1]
    tm = _pick_tile(Mp, PREF_TM, (256, 128, 8))
    tn = _pick_tile(Np, PREF_TN, (256, 128))
    tk = _pick_tile(Kp, PREF_TK, (256, 128))

    # LN can only be fused if the whole output row lives in one tile (unpadded).
    fuse_ln = (ln is not None) and (npad == 0) and (tn == Np)

    in_specs = [
        pl.BlockSpec((tm, tk), lambda i, j, k: (i, k)),
        pl.BlockSpec((tk, tn), lambda i, j, k: (k, j)),
        pl.BlockSpec((1, tn), lambda i, j, k: (0, j)),
    ]
    args = [x, w, b2]
    if res is not None:
        in_specs.append(pl.BlockSpec((tm, tn), lambda i, j, k: (i, j)))
        args.append(res)
    if fuse_ln:
        g2 = ln['g'].astype(jnp.float32).reshape(1, N)
        bb2 = ln['b'].astype(jnp.float32).reshape(1, N)
        in_specs.append(pl.BlockSpec((1, tn), lambda i, j, k: (0, j)))
        in_specs.append(pl.BlockSpec((1, tn), lambda i, j, k: (0, j)))
        args += [g2, bb2]

    out = pl.pallas_call(
        functools.partial(_linear_kernel, relu=relu, has_res=res is not None,
                          fuse_ln=fuse_ln, eps=eps),
        out_shape=jax.ShapeDtypeStruct((Mp, Np), out_dtype),
        grid=(Mp // tm, Np // tn, Kp // tk),
        in_specs=in_specs,
        out_specs=pl.BlockSpec((tm, tn), lambda i, j, k: (i, j)),
        scratch_shapes=[pltpu.VMEM((tm, tn), jnp.float32)],
        compiler_params=pltpu.CompilerParams(
            dimension_semantics=("parallel", "parallel", "arbitrary")),
    )(*args)

    if mpad or npad:
        out = out[:M, :N]
    if ln is not None and not fuse_ln:
        out = layernorm_pallas(out, ln['g'], ln['b'], eps=eps, out_dtype=out_dtype)
    return out


# ----------------------- standalone LayerNorm (pre-LN path) -----------------

def _layernorm_kernel(x_ref, g_ref, b_ref, o_ref, *, eps):
    x = x_ref[...].astype(jnp.float32)
    mu = jnp.mean(x, axis=-1, keepdims=True)
    var = jnp.mean((x - mu) ** 2, axis=-1, keepdims=True)
    y = (x - mu) * lax.rsqrt(var + eps) * g_ref[...] + b_ref[...]
    o_ref[...] = y.astype(o_ref.dtype)


def layernorm_pallas(x, gamma, beta, eps=1e-5, out_dtype=ACT_DTYPE):
    M, D = x.shape
    tm = _pick_tile(M, PREF_ROWS, (256, 128, 8))
    g2 = gamma.astype(jnp.float32).reshape(1, D)
    b2 = beta.astype(jnp.float32).reshape(1, D)
    return pl.pallas_call(
        functools.partial(_layernorm_kernel, eps=eps),
        out_shape=jax.ShapeDtypeStruct((M, D), out_dtype),
        grid=(M // tm,),
        in_specs=[
            pl.BlockSpec((tm, D), lambda i: (i, 0)),
            pl.BlockSpec((1, D), lambda i: (0, 0)),
            pl.BlockSpec((1, D), lambda i: (0, 0)),
        ],
        out_specs=pl.BlockSpec((tm, D), lambda i: (i, 0)),
        compiler_params=pltpu.CompilerParams(dimension_semantics=("parallel",)),
    )(x, g2, b2)


# ----------------------- flash attention (online softmax) -------------------

def _flash_attn_kernel(q_ref, k_ref, v_ref, kp_ref, o_ref,
                       m_sc, l_sc, acc_sc, *, heads, dk, scale, causal):
    ki = pl.program_id(2)
    tq = q_ref.shape[1]
    tk = k_ref.shape[1]

    @pl.when(ki == 0)
    def _():
        m_sc[...] = jnp.full_like(m_sc, _NEG_BIG)
        l_sc[...] = jnp.zeros_like(l_sc)
        acc_sc[...] = jnp.zeros_like(acc_sc)

    # key padding (+ causal) mask for this (q-tile, k-tile) block; shared by heads
    pad_mask = jnp.broadcast_to(kp_ref[0] > 0.5, (tq, tk))        # (tq, tk)
    if causal:
        qpos = pl.program_id(1) * tq + lax.broadcasted_iota(jnp.int32, (tq, tk), 0)
        kpos = ki * tk + lax.broadcasted_iota(jnp.int32, (tq, tk), 1)
        mask = pad_mask | (kpos > qpos)
    else:
        mask = pad_mask

    # 1/sqrt(dk) folded into q (O(tq*D) VPU work instead of O(tq*tk) per head)
    q = (q_ref[0].astype(jnp.float32) * scale).astype(q_ref.dtype)   # (tq,H,dk)
    k = k_ref[0]                                                      # (tk,H,dk)
    v = v_ref[0]                                                      # (tk,H,dk)

    for h in range(heads):
        qh = q[:, h, :]                                               # (tq,dk) bf16
        kh = k[:, h, :]                                               # (tk,dk) bf16
        s = lax.dot_general(qh, kh, (((1,), (1,)), ((), ())),
                            preferred_element_type=jnp.float32)       # (tq,tk)
        s = jnp.where(mask, _NEG_BIG, s)

        m_prev = m_sc[h]                                              # (tq,1)
        m_new = jnp.maximum(m_prev, jnp.max(s, axis=-1, keepdims=True))
        alpha = jnp.exp(m_prev - m_new)                               # (tq,1)
        p = jnp.exp(s - m_new)                                        # (tq,tk) f32
        l_sc[h] = alpha * l_sc[h] + jnp.sum(p, axis=-1, keepdims=True)
        acc_sc[h] = alpha * acc_sc[h] + lax.dot_general(
            p.astype(v.dtype), v[:, h, :], (((1,), (0,)), ((), ())),
            preferred_element_type=jnp.float32)
        m_sc[h] = m_new

    @pl.when(ki == pl.num_programs(2) - 1)
    def _():
        outs = []
        for h in range(heads):
            inv = pl.reciprocal(l_sc[h], approx=True)                 # (tq,1)
            outs.append((acc_sc[h] * inv).astype(o_ref.dtype))        # (tq,dk)
        o_ref[0] = jnp.concatenate(outs, axis=-1)                     # (tq, H*dk)


def flash_attention(q, k, v, key_pad, causal):
    """q:(B,Sq,H,dk) k/v:(B,Sk,H,dk) key_pad:(B,Sk) (1.0 = padded key).
    Returns (B, Sq, H*dk) in ACT_DTYPE, heads already concatenated (lane-dense)."""
    B, Sq, H, dk = q.shape
    Sk = k.shape[1]
    D = H * dk
    kp = key_pad.reshape(B, 1, Sk).astype(jnp.float32)
    scale = 1.0 / math.sqrt(dk)

    tq = _pick_tile(Sq, ATTN_TQ, (128, 8))
    tk = _pick_tile(Sk, ATTN_TK, (128,))
    grid = (B, Sq // tq, Sk // tk)

    return pl.pallas_call(
        functools.partial(_flash_attn_kernel, heads=H, dk=dk, scale=scale,
                          causal=causal),
        out_shape=jax.ShapeDtypeStruct((B, Sq, D), ACT_DTYPE),
        grid=grid,
        in_specs=[
            pl.BlockSpec((1, tq, H, dk), lambda b, qi, ki: (b, qi, 0, 0)),
            pl.BlockSpec((1, tk, H, dk), lambda b, qi, ki: (b, ki, 0, 0)),
            pl.BlockSpec((1, tk, H, dk), lambda b, qi, ki: (b, ki, 0, 0)),
            pl.BlockSpec((1, 1, tk), lambda b, qi, ki: (b, 0, ki)),
        ],
        out_specs=pl.BlockSpec((1, tq, D), lambda b, qi, ki: (b, qi, 0)),
        scratch_shapes=[
            pltpu.VMEM((H, tq, 1), jnp.float32),    # running max
            pltpu.VMEM((H, tq, 1), jnp.float32),    # running denom
            pltpu.VMEM((H, tq, dk), jnp.float32),   # running numerator
        ],
        compiler_params=pltpu.CompilerParams(
            dimension_semantics=("parallel", "parallel", "arbitrary")),
    )(q.astype(ACT_DTYPE), k.astype(ACT_DTYPE), v.astype(ACT_DTYPE), kp)


# ----------------------- fused FFN (Linear -> Linear -> ReLU) + res + LN ----

def _ffn_kernel(x_ref, w1_ref, b1_ref, w2_ref, b2_ref, r_ref, g_ref, bb_ref,
                o_ref, *, fuse_ln, eps):
    # Reference FeedForwardNetwork = Linear -> Linear -> ReLU (ReLU last),
    # then dropout(identity) + residual (+ post-LN).
    h = jnp.dot(x_ref[...], w1_ref[...],
                preferred_element_type=jnp.float32) + b1_ref[...]
    y = jnp.dot(h.astype(w2_ref.dtype), w2_ref[...],
                preferred_element_type=jnp.float32) + b2_ref[...]
    y = jnp.maximum(y, 0.0) + r_ref[...].astype(jnp.float32)
    if fuse_ln:
        mu = jnp.mean(y, axis=-1, keepdims=True)
        var = jnp.mean((y - mu) ** 2, axis=-1, keepdims=True)
        y = (y - mu) * lax.rsqrt(var + eps) * g_ref[...] + bb_ref[...]
    o_ref[...] = y.astype(o_ref.dtype)


def ffn_forward(p, x, residual, ln=None, eps=1e-5):
    B, S, D = x.shape
    M = B * S
    d_ff = p['w1'].shape[1]
    x2 = x.reshape(M, D).astype(ACT_DTYPE)
    r2 = residual.reshape(M, D)

    tm = _pick_tile(M, FFN_TM, (256, 128, 8))

    # VMEM estimate for the fused path: bf16 weights (double-buffered slots),
    # pipelined x/residual/out tiles and the f32 (tm, d_ff) intermediate.
    weight_bytes = 2 * 2 * 2 * D * d_ff
    act_bytes = 6 * tm * D * 2 + tm * d_ff * 4 + tm * D * 4 + 4 * (d_ff + 3 * D) * 4
    fused_ok = (weight_bytes + act_bytes) < FFN_FUSE_BUDGET

    if not fused_ok:
        # Fall back to two tiled K-accumulating matmuls (d_ff intermediate in HBM).
        h = linear_pallas(x2, p['w1'], p['b1'])
        y = linear_pallas(h, p['w2'], p['b2'], relu=True, residual=r2, ln=ln, eps=eps)
        return y.reshape(B, S, D)

    g2 = (ln['g'] if ln is not None else jnp.ones((D,))).astype(jnp.float32).reshape(1, D)
    bb2 = (ln['b'] if ln is not None else jnp.zeros((D,))).astype(jnp.float32).reshape(1, D)
    b1 = p['b1'].astype(jnp.float32).reshape(1, d_ff)
    b2r = p['b2'].astype(jnp.float32).reshape(1, D)

    cp_kwargs = dict(dimension_semantics=("parallel",))
    if FFN_VMEM_LIMIT is not None:
        cp_kwargs['vmem_limit_bytes'] = FFN_VMEM_LIMIT

    y = pl.pallas_call(
        functools.partial(_ffn_kernel, fuse_ln=ln is not None, eps=eps),
        out_shape=jax.ShapeDtypeStruct((M, D), ACT_DTYPE),
        grid=(M // tm,),
        in_specs=[
            pl.BlockSpec((tm, D), lambda i: (i, 0)),
            pl.BlockSpec((D, d_ff), lambda i: (0, 0)),
            pl.BlockSpec((1, d_ff), lambda i: (0, 0)),
            pl.BlockSpec((d_ff, D), lambda i: (0, 0)),
            pl.BlockSpec((1, D), lambda i: (0, 0)),
            pl.BlockSpec((tm, D), lambda i: (i, 0)),
            pl.BlockSpec((1, D), lambda i: (0, 0)),
            pl.BlockSpec((1, D), lambda i: (0, 0)),
        ],
        out_specs=pl.BlockSpec((tm, D), lambda i: (i, 0)),
        compiler_params=pltpu.CompilerParams(**cp_kwargs),
    )(x2, p['w1'].astype(ACT_DTYPE), b1, p['w2'].astype(ACT_DTYPE), b2r,
      r2, g2, bb2)
    return y.reshape(B, S, D)


# ----------------------- model glue (XLA: embeddings, PE, reshapes) ---------

def positional_encoding(max_seq_len, d_model):
    position = jnp.arange(max_seq_len, dtype=jnp.float32)[:, None]
    div_term = jnp.exp(jnp.arange(0, d_model, 2, dtype=jnp.float32)
                       * -(math.log(10000.0) / d_model))
    pe = jnp.zeros((max_seq_len, d_model), jnp.float32)
    pe = pe.at[:, 0::2].set(jnp.sin(position * div_term))
    pe = pe.at[:, 1::2].set(jnp.cos(position * div_term))
    return pe


def mha_forward(p, xq, xkv, key_pad, heads, causal, residual, ln=None):
    B, Sq, D = xq.shape
    Sk = xkv.shape[1]
    dk = D // heads
    xq2 = xq.reshape(B * Sq, D)

    if 'wqkv' in p:                      # self-attention: fused (D, 3D) projection
        qkv = linear_pallas(xq2, p['wqkv'])
        q2, k2, v2 = qkv[:, :D], qkv[:, D:2 * D], qkv[:, 2 * D:]
    else:                                # cross-attention: Q from xq, fused K/V from xkv
        xkv2 = xkv.reshape(B * Sk, D)
        q2 = linear_pallas(xq2, p['wq'])
        kv = linear_pallas(xkv2, p['wkv'])
        k2, v2 = kv[:, :D], kv[:, D:]

    # Free reshapes (no transposes): heads are split inside the attention kernel.
    q = q2.reshape(B, Sq, heads, dk)
    k = k2.reshape(B, Sk, heads, dk)
    v = v2.reshape(B, Sk, heads, dk)

    a = flash_attention(q, k, v, key_pad, causal)          # (B, Sq, D), lane-dense
    # Output projection with residual add (and post-LN, if requested) fused in.
    o = linear_pallas(a.reshape(B * Sq, D), p['wo'],
                      residual=residual.reshape(B * Sq, D), ln=ln)
    return o.reshape(B, Sq, D)


def ln_forward(p, x, eps=1e-5):
    B, S, D = x.shape
    return layernorm_pallas(x.reshape(B * S, D), p['g'], p['b'], eps=eps
                            ).reshape(B, S, D)


def encoder_block(p, x, in_kpad, heads, pre_ln):
    res = x
    h = ln_forward(p['ln1'], x) if pre_ln else x
    x = mha_forward(p['attn'], h, h, in_kpad, heads, causal=False,
                    residual=res, ln=None if pre_ln else p['ln1'])
    res = x
    h = ln_forward(p['ln2'], x) if pre_ln else x
    x = ffn_forward(p['ffn'], h, residual=res, ln=None if pre_ln else p['ln2'])
    return x


def decoder_block(p, x, encoded, in_kpad, out_kpad, heads, pre_ln):
    # masked self-attention
    res = x
    h = ln_forward(p['ln1'], x) if pre_ln else x
    x = mha_forward(p['mattn'], h, h, out_kpad, heads, causal=True,
                    residual=res, ln=None if pre_ln else p['ln1'])
    # cross attention over the encoder output
    res = x
    h = ln_forward(p['ln2'], x) if pre_ln else x
    x = mha_forward(p['attn'], h, encoded, in_kpad, heads, causal=False,
                    residual=res, ln=None if pre_ln else p['ln2'])
    # feed-forward
    res = x
    h = ln_forward(p['ln3'], x) if pre_ln else x
    x = ffn_forward(p['ffn'], h, residual=res, ln=None if pre_ln else p['ln3'])
    return x


def transformer_forward(params, inp, out, pe, heads, in_pad_id, out_pad_id,
                        pre_ln=False):
    B, S_in = inp.shape
    _, S_out = out.shape

    # Only per-key pad vectors are materialized; pad + causal masks are built
    # inside the attention kernel from these + broadcasted_iota.
    in_kpad = (inp == in_pad_id).astype(jnp.float32)        # (B, S_in)
    out_kpad = (out == out_pad_id).astype(jnp.float32)      # (B, S_out)

    x_enc = (jnp.take(params['enc_emb'], inp, axis=0) + pe[:S_in]).astype(ACT_DTYPE)
    x_dec = (jnp.take(params['dec_emb'], out, axis=0) + pe[:S_out]).astype(ACT_DTYPE)
    # enc_drop / dec_drop / per-block dropouts: identity (inference)

    for blk in params['enc']:
        x_enc = encoder_block(blk, x_enc, in_kpad, heads, pre_ln)
    for blk in params['dec']:
        x_dec = decoder_block(blk, x_dec, x_enc, in_kpad, out_kpad, heads, pre_ln)

    Bo, So, D = x_dec.shape
    logits = linear_pallas(x_dec.reshape(Bo * So, D), params['out_w'],
                           params['out_b'], out_dtype=jnp.float32)
    return logits.reshape(Bo, So, -1)


# ----------------------- parameter init (weights pre-fused, bf16) -----------

def init_params(key, in_vocab, out_vocab, N, heads, d_model, d_ff):
    keys = iter(jax.random.split(key, 1024))

    def w(shape, scale=0.02, dtype=ACT_DTYPE):
        return (jax.random.normal(next(keys), shape, jnp.float32) * scale).astype(dtype)

    def mha_self():
        return dict(wqkv=w((d_model, 3 * d_model)), wo=w((d_model, d_model)))

    def mha_cross():
        return dict(wq=w((d_model, d_model)), wkv=w((d_model, 2 * d_model)),
                    wo=w((d_model, d_model)))

    def ln_p():
        return dict(g=jnp.ones((d_model,), jnp.float32),
                    b=jnp.zeros((d_model,), jnp.float32))

    def ffn_p():
        return dict(w1=w((d_model, d_ff)), b1=jnp.zeros((d_ff,), jnp.float32),
                    w2=w((d_ff, d_model)), b2=jnp.zeros((d_model,), jnp.float32))

    enc_blocks = [dict(attn=mha_self(), ln1=ln_p(), ffn=ffn_p(), ln2=ln_p())
                  for _ in range(N)]
    dec_blocks = [dict(mattn=mha_self(), ln1=ln_p(), attn=mha_cross(), ln2=ln_p(),
                       ffn=ffn_p(), ln3=ln_p()) for _ in range(N)]
    return dict(
        enc_emb=w((in_vocab, d_model), 1.0, jnp.float32),
        dec_emb=w((out_vocab, d_model), 1.0, jnp.float32),
        enc=enc_blocks,
        dec=dec_blocks,
        out_w=w((d_model, out_vocab)),
        out_b=jnp.zeros((out_vocab,), jnp.float32),
    )


# ----------------------- main -----------------------------------------------

if __name__ == "__main__":
    B, S = 2, 8
    in_vocab, out_vocab = 20, 24
    max_seq_len = 16
    N_layers, heads, d_model, d_ff = 2, 4, 32, 64
    in_pad_id, out_pad_id = 0, 0

    key = jax.random.PRNGKey(0)
    kp, ki, ko = jax.random.split(key, 3)

    params = init_params(kp, in_vocab, out_vocab, N_layers, heads, d_model, d_ff)
    pe = positional_encoding(max_seq_len, d_model)

    inp = jax.random.randint(ki, (B, S), 1, in_vocab, dtype=jnp.int32)
    out = jax.random.randint(ko, (B, S), 1, out_vocab, dtype=jnp.int32)
    # add padding at the tail to exercise the masks
    inp = inp.at[1, -2:].set(in_pad_id)
    out = out.at[1, -3:].set(out_pad_id)

    fwd = jax.jit(lambda p, i, o, e: transformer_forward(
        p, i, o, e, heads, in_pad_id, out_pad_id, pre_ln=False))

    logits = fwd(params, inp, out, pe)
    logits = jax.block_until_ready(logits)

    assert logits.shape == (B, S, out_vocab), logits.shape
    assert bool(jnp.all(jnp.isfinite(logits)))
    print("KERNEL_OK")
</pallas_src>

<mosaic_0001>
module attributes {stable_mosaic.version = 11 : i64} {
  func.func @_linear_kernel(%arg0: i32, %arg1: i32, %arg2: i32, %arg3: memref<16x32xbf16, #tpu.memory_space<vmem>>, %arg4: memref<32x96xbf16, #tpu.memory_space<vmem>>, %arg5: memref<1x96xf32, #tpu.memory_space<vmem>>, %arg6: memref<16x96xbf16, #tpu.memory_space<vmem>>, %arg7: memref<16x96xf32, #tpu.memory_space<vmem>>) attributes {dimension_semantics = [#tpu.dimension_semantics<parallel>, #tpu.dimension_semantics<parallel>, #tpu.dimension_semantics<arbitrary>], iteration_bounds = array<i64: 1, 1, 1>, scalar_prefetch = 0 : i64, scratch_operands = 1 : i64, tpu.core_type = #tpu.core_type<tc>, window_params = [{transform_indices = @transform_0, window_bounds = array<i64: 16, 32>}, {transform_indices = @transform_1, window_bounds = array<i64: 32, 96>}, {transform_indices = @transform_2, window_bounds = array<i64: 1, 96>}, {transform_indices = @transform_3, window_bounds = array<i64: 16, 96>}]} {
    %c0_i32 = arith.constant 0 : i32
    %0 = arith.cmpi eq, %arg2, %c0_i32 : i32
    %1 = arith.extui %0 : i1 to i32
    %c0_i32_0 = arith.constant 0 : i32
    %2 = arith.cmpi ne, %1, %c0_i32_0 : i32
    scf.if %2 {
      %cst_10 = arith.constant 0.000000e+00 : f32
      %12 = vector.broadcast %cst_10 : f32 to vector<16x96xf32>
      %c0_11 = arith.constant 0 : index
      %c0_12 = arith.constant 0 : index
      %13 = vector.load %arg7[%c0_11, %c0_12] : memref<16x96xf32, #tpu.memory_space<vmem>>, vector<16x96xf32>
      tpu.vector_store %arg7[%c0_11, %c0_12], %12 {strides = array<i32>} : memref<16x96xf32, #tpu.memory_space<vmem>>, vector<16x96xf32>,
    } else {
    }
    %c0 = arith.constant 0 : index
    %c0_1 = arith.constant 0 : index
    %3 = vector.load %arg7[%c0, %c0_1] : memref<16x96xf32, #tpu.memory_space<vmem>>, vector<16x96xf32>
    %c0_2 = arith.constant 0 : index
    %c0_3 = arith.constant 0 : index
    %4 = vector.load %arg3[%c0_2, %c0_3] : memref<16x32xbf16, #tpu.memory_space<vmem>>, vector<16x32xbf16>
    %c0_4 = arith.constant 0 : index
    %c0_5 = arith.constant 0 : index
    %5 = vector.load %arg4[%c0_4, %c0_5] : memref<32x96xbf16, #tpu.memory_space<vmem>>, vector<32x96xbf16>
    %cst = arith.constant dense<0.000000e+00> : vector<16x96xf32>
    %6 = tpu.matmul %4, %5, %cst {dimension_numbers = #tpu.dot_dimension_numbers<[1], [0], [0], [1], [0, 0, 1, 1], [], []>} : vector<16x32xbf16>, vector<32x96xbf16>, vector<16x96xf32> -> vector<16x96xf32>
    %7 = arith.addf %3, %6 : vector<16x96xf32>
    %c0_6 = arith.constant 0 : index
    %c0_7 = arith.constant 0 : index
    %8 = vector.load %arg7[%c0_6, %c0_7] : memref<16x96xf32, #tpu.memory_space<vmem>>, vector<16x96xf32>
    tpu.vector_store %arg7[%c0_6, %c0_7], %7 {strides = array<i32>} : memref<16x96xf32, #tpu.memory_space<vmem>>, vector<16x96xf32>,
    %c0_i32_8 = arith.constant 0 : i32
    %9 = arith.cmpi eq, %arg2, %c0_i32_8 : i32
    %10 = arith.extui %9 : i1 to i32
    %c0_i32_9 = arith.constant 0 : i32
    %11 = arith.cmpi ne, %10, %c0_i32_9 : i32
    scf.if %11 {
      %c0_10 = arith.constant 0 : index
      %c0_11 = arith.constant 0 : index
      %12 = vector.load %arg7[%c0_10, %c0_11] : memref<16x96xf32, #tpu.memory_space<vmem>>, vector<16x96xf32>
      %c0_12 = arith.constant 0 : index
      %c0_13 = arith.constant 0 : index
      %13 = vector.load %arg5[%c0_12, %c0_13] : memref<1x96xf32, #tpu.memory_space<vmem>>, vector<1x96xf32>
      %14 = vector.broadcast %13 : vector<1x96xf32> to vector<16x96xf32>
      %15 = arith.addf %12, %14 : vector<16x96xf32>
      %16 = arith.truncf %15 : vector<16x96xf32> to vector<16x96xbf16>
      %c0_14 = arith.constant 0 : index
      %c0_15 = arith.constant 0 : index
      %17 = vector.load %arg6[%c0_14, %c0_15] : memref<16x96xbf16, #tpu.memory_space<vmem>>, vector<16x96xbf16>
      tpu.vector_store %arg6[%c0_14, %c0_15], %16 {strides = array<i32>} : memref<16x96xbf16, #tpu.memory_space<vmem>>, vector<16x96xbf16>,
    } else {
    }
    return
  }
  func.func @transform_0(%arg0: i32, %arg1: i32, %arg2: i32) -> (i32, i32) {
    %c0_i32 = arith.constant 0 : i32
    return %arg0, %arg2 : i32, i32
  }
  func.func @transform_1(%arg0: i32, %arg1: i32, %arg2: i32) -> (i32, i32) {
    %c0_i32 = arith.constant 0 : i32
    return %arg2, %arg1 : i32, i32
  }
  func.func @transform_2(%arg0: i32, %arg1: i32, %arg2: i32) -> (i32, i32) {
    %c0_i32 = arith.constant 0 : i32
    %c0_i32_0 = arith.constant 0 : i32
    return %c0_i32, %arg1 : i32, i32
  }
  func.func @transform_3(%arg0: i32, %arg1: i32, %arg2: i32) -> (i32, i32) {
    %c0_i32 = arith.constant 0 : i32
    return %arg0, %arg1 : i32, i32
  }
}

module attributes {stable_mosaic.version = 11 : i64} {
  func.func @_flash_attn_kernel(%arg0: i32, %arg1: i32, %arg2: i32, %arg3: memref<1x8x4x8xbf16, #tpu.memory_space<vmem>>, %arg4: memref<1x8x4x8xbf16, #tpu.memory_space<vmem>>, %arg5: memref<1x8x4x8xbf16, #tpu.memory_space<vmem>>, %arg6: memref<1x1x8xf32, #tpu.memory_space<vmem>>, %arg7: memref<1x8x32xbf16, #tpu.memory_space<vmem>>, %arg8: memref<4x8x1xf32, #tpu.memory_space<vmem>>, %arg9: memref<4x8x1xf32, #tpu.memory_space<vmem>>, %arg10: memref<4x8x8xf32, #tpu.memory_space<vmem>>) attributes {dimension_semantics = [#tpu.dimension_semantics<parallel>, #tpu.dimension_semantics<parallel>, #tpu.dimension_semantics<arbitrary>], iteration_bounds = array<i64: 2, 1, 1>, scalar_prefetch = 0 : i64, scratch_operands = 3 : i64, tpu.core_type = #tpu.core_type<tc>, window_params = [{transform_indices = @transform_0, window_bounds = array<i64: 1, 8, 4, 8>}, {transform_indices = @transform_1, window_bounds = array<i64: 1, 8, 4, 8>}, {transform_indices = @transform_2, window_bounds = array<i64: 1, 8, 4, 8>}, {transform_indices = @transform_3, window_bounds = array<i64: 1, 1, 8>}, {transform_indices = @transform_4, window_bounds = array<i64: 1, 8, 32>}]} {
    %c0_i32 = arith.constant 0 : i32
    %0 = arith.cmpi eq, %arg2, %c0_i32 : i32
    %1 = arith.extui %0 : i1 to i32
    %c0_i32_0 = arith.constant 0 : i32
    %2 = arith.cmpi ne, %1, %c0_i32_0 : i32
    scf.if %2 {
      %cst_108 = arith.constant -1.000000e+30 : f32
      %196 = vector.broadcast %cst_108 : f32 to vector<4x8x1xf32>
      %c0_109 = arith.constant 0 : index
      %c0_110 = arith.constant 0 : index
      %c0_111 = arith.constant 0 : index
      %197 = vector.load %arg8[%c0_109, %c0_110, %c0_111] : memref<4x8x1xf32, #tpu.memory_space<vmem>>, vector<4x8x1xf32>
      tpu.vector_store %arg8[%c0_109, %c0_110, %c0_111], %196 {strides = array<i32>} : memref<4x8x1xf32, #tpu.memory_space<vmem>>, vector<4x8x1xf32>,
      %cst_112 = arith.constant 0.000000e+00 : f32
      %198 = vector.broadcast %cst_112 : f32 to vector<4x8x1xf32>
      %c0_113 = arith.constant 0 : index
      %c0_114 = arith.constant 0 : index
      %c0_115 = arith.constant 0 : index
      %199 = vector.load %arg9[%c0_113, %c0_114, %c0_115] : memref<4x8x1xf32, #tpu.memory_space<vmem>>, vector<4x8x1xf32>
      tpu.vector_store %arg9[%c0_113, %c0_114, %c0_115], %198 {strides = array<i32>} : memref<4x8x1xf32, #tpu.memory_space<vmem>>, vector<4x8x1xf32>,
      %cst_116 = arith.constant 0.000000e+00 : f32
      %200 = vector.broadcast %cst_116 : f32 to vector<4x8x8xf32>
      %c0_117 = arith.constant 0 : index
      %c0_118 = arith.constant 0 : index
      %c0_119 = arith.constant 0 : index
      %201 = vector.load %arg10[%c0_117, %c0_118, %c0_119] : memref<4x8x8xf32, #tpu.memory_space<vmem>>, vector<4x8x8xf32>
      tpu.vector_store %arg10[%c0_117, %c0_118, %c0_119], %200 {strides = array<i32>} : memref<4x8x8xf32, #tpu.memory_space<vmem>>, vector<4x8x8xf32>,
    } else {
    }
    %c0 = arith.constant 0 : index
    %c0_1 = arith.constant 0 : index
    %c0_2 = arith.constant 0 : index
    %3 = vector.load %arg6[%c0, %c0_1, %c0_2] : memref<1x1x8xf32, #tpu.memory_space<vmem>>, vector<1x1x8xf32>
    %4 = vector.shape_cast %3 : vector<1x1x8xf32> to vector<1x8xf32>
    %cst = arith.constant 5.000000e-01 : f32
    %5 = vector.broadcast %cst : f32 to vector<1x8xf32>
    %6 = arith.cmpf ogt, %4, %5 : vector<1x8xf32>
    %7 = vector.shape_cast %6 : vector<1x8xi1> to vector<1x8xi1>
    %8 = vector.broadcast %7 : vector<1x8xi1> to vector<8x8xi1>
    %c8_i32 = arith.constant 8 : i32
    %9 = arith.muli %arg1, %c8_i32 : i32
    %10 = tpu.iota {dimensions = array<i32: 0>} : vector<8x8xi32>
    %11 = vector.broadcast %9 : i32 to vector<8x8xi32>
    %12 = arith.addi %11, %10 : vector<8x8xi32>
    %c8_i32_3 = arith.constant 8 : i32
    %13 = arith.muli %arg2, %c8_i32_3 : i32
    %14 = tpu.iota {dimensions = array<i32: 1>} : vector<8x8xi32>
    %15 = vector.broadcast %13 : i32 to vector<8x8xi32>
    %16 = arith.addi %15, %14 : vector<8x8xi32>
    %17 = arith.cmpi sgt, %16, %12 : vector<8x8xi32>
    %18 = arith.ori %8, %17 : vector<8x8xi1>
    %c0_4 = arith.constant 0 : index
    %c0_5 = arith.constant 0 : index
    %c0_6 = arith.constant 0 : index
    %c0_7 = arith.constant 0 : index
    %19 = vector.load %arg3[%c0_4, %c0_5, %c0_6, %c0_7] : memref<1x8x4x8xbf16, #tpu.memory_space<vmem>>, vector<1x8x4x8xbf16>
    %20 = vector.shape_cast %19 : vector<1x8x4x8xbf16> to vector<8x4x8xbf16>
    %21 = arith.extf %20 : vector<8x4x8xbf16> to vector<8x4x8xf32>
    %cst_8 = arith.constant 0.353553385 : f32
    %22 = vector.broadcast %cst_8 : f32 to vector<8x4x8xf32>
    %23 = arith.mulf %21, %22 : vector<8x4x8xf32>
    %24 = arith.truncf %23 : vector<8x4x8xf32> to vector<8x4x8xbf16>
    %c0_9 = arith.constant 0 : index
    %c0_10 = arith.constant 0 : index
    %c0_11 = arith.constant 0 : index
    %c0_12 = arith.constant 0 : index
    %25 = vector.load %arg4[%c0_9, %c0_10, %c0_11, %c0_12] : memref<1x8x4x8xbf16, #tpu.memory_space<vmem>>, vector<1x8x4x8xbf16>
    %26 = vector.shape_cast %25 : vector<1x8x4x8xbf16> to vector<8x4x8xbf16>
    %c0_13 = arith.constant 0 : index
    %c0_14 = arith.constant 0 : index
    %c0_15 = arith.constant 0 : index
    %c0_16 = arith.constant 0 : index
    %27 = vector.load %arg5[%c0_13, %c0_14, %c0_15, %c0_16] : memref<1x8x4x8xbf16, #tpu.memory_space<vmem>>, vector<1x8x4x8xbf16>
    %28 = vector.shape_cast %27 : vector<1x8x4x8xbf16> to vector<8x4x8xbf16>
    %29 = vector.extract_strided_slice %24 {offsets = [0, 0, 0], sizes = [8, 1, 8], strides = [1, 1, 1]} : vector<8x4x8xbf16> to vector<8x1x8xbf16>
    %30 = vector.shape_cast %29 : vector<8x1x8xbf16> to vector<8x8xbf16>
    %31 = vector.extract_strided_slice %26 {offsets = [0, 0, 0], sizes = [8, 1, 8], strides = [1, 1, 1]} : vector<8x4x8xbf16> to vector<8x1x8xbf16>
    %32 = vector.shape_cast %31 : vector<8x1x8xbf16> to vector<8x8xbf16>
    %cst_17 = arith.constant dense<0.000000e+00> : vector<8x8xf32>
    %33 = tpu.matmul %30, %32, %cst_17 {dimension_numbers = #tpu.dot_dimension_numbers<[1], [1], [0], [0], [0, 0, 1, 0], [], []>} : vector<8x8xbf16>, vector<8x8xbf16>, vector<8x8xf32> -> vector<8x8xf32>
    %cst_18 = arith.constant -1.000000e+30 : f32
    %34 = vector.broadcast %cst_18 : f32 to vector<8x8xf32>
    %35 = arith.select %18, %34, %33 : vector<8x8xi1>, vector<8x8xf32>
    %c0_19 = arith.constant 0 : index
    %c0_20 = arith.constant 0 : index
    %c0_21 = arith.constant 0 : index
    %36 = vector.load %arg8[%c0_19, %c0_20, %c0_21] : memref<4x8x1xf32, #tpu.memory_space<vmem>>, vector<1x8x1xf32>
    %37 = vector.shape_cast %36 : vector<1x8x1xf32> to vector<8x1xf32>
    %cst_22 = arith.constant dense<0xFF800000> : vector<8xf32>
    %38 = vector.multi_reduction <maximumf>, %35, %cst_22 [1] : vector<8x8xf32> to vector<8xf32>
    %39 = vector.shape_cast %38 : vector<8xf32> to vector<8x1xf32>
    %40 = arith.maximumf %37, %39 : vector<8x1xf32>
    %41 = arith.subf %37, %40 : vector<8x1xf32>
    %42 = math.exp %41 : vector<8x1xf32>
    %43 = vector.broadcast %40 : vector<8x1xf32> to vector<8x8xf32>
    %44 = arith.subf %35, %43 : vector<8x8xf32>
    %45 = math.exp %44 : vector<8x8xf32>
    %c0_23 = arith.constant 0 : index
    %c0_24 = arith.constant 0 : index
    %c0_25 = arith.constant 0 : index
    %46 = vector.load %arg9[%c0_23, %c0_24, %c0_25] : memref<4x8x1xf32, #tpu.memory_space<vmem>>, vector<1x8x1xf32>
    %47 = vector.shape_cast %46 : vector<1x8x1xf32> to vector<8x1xf32>
    %48 = arith.mulf %42, %47 : vector<8x1xf32>
    %cst_26 = arith.constant dense<0.000000e+00> : vector<8xf32>
    %49 = vector.multi_reduction <add>, %45, %cst_26 [1] : vector<8x8xf32> to vector<8xf32>
    %50 = vector.shape_cast %49 : vector<8xf32> to vector<8x1xf32>
    %51 = arith.addf %48, %50 : vector<8x1xf32>
    %c0_27 = arith.constant 0 : index
    %c0_28 = arith.constant 0 : index
    %c0_29 = arith.constant 0 : index
    %52 = vector.load %arg9[%c0_27, %c0_28, %c0_29] : memref<4x8x1xf32, #tpu.memory_space<vmem>>, vector<1x8x1xf32>
    %53 = vector.shape_cast %52 : vector<1x8x1xf32> to vector<8x1xf32>
    %54 = vector.shape_cast %51 : vector<8x1xf32> to vector<1x8x1xf32>
    tpu.vector_store %arg9[%c0_27, %c0_28, %c0_29], %54 {strides = array<i32>} : memref<4x8x1xf32, #tpu.memory_space<vmem>>, vector<1x8x1xf32>,
    %c0_30 = arith.constant 0 : index
    %c0_31 = arith.constant 0 : index
    %c0_32 = arith.constant 0 : index
    %55 = vector.load %arg10[%c0_30, %c0_31, %c0_32] : memref<4x8x8xf32, #tpu.memory_space<vmem>>, vector<1x8x8xf32>
    %56 = vector.shape_cast %55 : vector<1x8x8xf32> to vector<8x8xf32>
    %57 = vector.broadcast %42 : vector<8x1xf32> to vector<8x8xf32>
    %58 = arith.mulf %57, %56 : vector<8x8xf32>
    %59 = arith.truncf %45 : vector<8x8xf32> to vector<8x8xbf16>
    %60 = vector.extract_strided_slice %28 {offsets = [0, 0, 0], sizes = [8, 1, 8], strides = [1, 1, 1]} : vector<8x4x8xbf16> to vector<8x1x8xbf16>
    %61 = vector.shape_cast %60 : vector<8x1x8xbf16> to vector<8x8xbf16>
    %cst_33 = arith.constant dense<0.000000e+00> : vector<8x8xf32>
    %62 = tpu.matmul %59, %61, %cst_33 {dimension_numbers = #tpu.dot_dimension_numbers<[1], [0], [0], [1], [0, 0, 1, 1], [], []>} : vector<8x8xbf16>, vector<8x8xbf16>, vector<8x8xf32> -> vector<8x8xf32>
    %63 = arith.addf %58, %62 : vector<8x8xf32>
    %c0_34 = arith.constant 0 : index
    %c0_35 = arith.constant 0 : index
    %c0_36 = arith.constant 0 : index
    %64 = vector.load %arg10[%c0_34, %c0_35, %c0_36] : memref<4x8x8xf32, #tpu.memory_space<vmem>>, vector<1x8x8xf32>
    %65 = vector.shape_cast %64 : vector<1x8x8xf32> to vector<8x8xf32>
    %66 = vector.shape_cast %63 : vector<8x8xf32> to vector<1x8x8xf32>
    tpu.vector_store %arg10[%c0_34, %c0_35, %c0_36], %66 {strides = array<i32>} : memref<4x8x8xf32, #tpu.memory_space<vmem>>, vector<1x8x8xf32>,
    %c0_37 = arith.constant 0 : index
    %c0_38 = arith.constant 0 : index
    %c0_39 = arith.constant 0 : index
    %67 = vector.load %arg8[%c0_37, %c0_38, %c0_39] : memref<4x8x1xf32, #tpu.memory_space<vmem>>, vector<1x8x1xf32>
    %68 = vector.shape_cast %67 : vector<1x8x1xf32> to vector<8x1xf32>
    %69 = vector.shape_cast %40 : vector<8x1xf32> to vector<1x8x1xf32>
    tpu.vector_store %arg8[%c0_37, %c0_38, %c0_39], %69 {strides = array<i32>} : memref<4x8x1xf32, #tpu.memory_space<vmem>>, vector<1x8x1xf32>,
    %70 = vector.extract_strided_slice %24 {offsets = [0, 1, 0], sizes = [8, 1, 8], strides = [1, 1, 1]} : vector<8x4x8xbf16> to vector<8x1x8xbf16>
    %71 = vector.shape_cast %70 : vector<8x1x8xbf16> to vector<8x8xbf16>
    %72 = vector.extract_strided_slice %26 {offsets = [0, 1, 0], sizes = [8, 1, 8], strides = [1, 1, 1]} : vector<8x4x8xbf16> to vector<8x1x8xbf16>
    %73 = vector.shape_cast %72 : vector<8x1x8xbf16> to vector<8x8xbf16>
    %cst_40 = arith.constant dense<0.000000e+00> : vector<8x8xf32>
    %74 = tpu.matmul %71, %73, %cst_40 {dimension_numbers = #tpu.dot_dimension_numbers<[1], [1], [0], [0], [0, 0, 1, 0], [], []>} : vector<8x8xbf16>, vector<8x8xbf16>, vector<8x8xf32> -> vector<8x8xf32>
    %cst_41 = arith.constant -1.000000e+30 : f32
    %75 = vector.broadcast %cst_41 : f32 to vector<8x8xf32>
    %76 = arith.select %18, %75, %74 : vector<8x8xi1>, vector<8x8xf32>
    %c1 = arith.constant 1 : index
    %c0_42 = arith.constant 0 : index
    %c0_43 = arith.constant 0 : index
    %77 = vector.load %arg8[%c1, %c0_42, %c0_43] : memref<4x8x1xf32, #tpu.memory_space<vmem>>, vector<1x8x1xf32>
    %78 = vector.shape_cast %77 : vector<1x8x1xf32> to vector<8x1xf32>
    %cst_44 = arith.constant dense<0xFF800000> : vector<8xf32>
    %79 = vector.multi_reduction <maximumf>, %76, %cst_44 [1] : vector<8x8xf32> to vector<8xf32>
    %80 = vector.shape_cast %79 : vector<8xf32> to vector<8x1xf32>
    %81 = arith.maximumf %78, %80 : vector<8x1xf32>
    %82 = arith.subf %78, %81 : vector<8x1xf32>
    %83 = math.exp %82 : vector<8x1xf32>
    %84 = vector.broadcast %81 : vector<8x1xf32> to vector<8x8xf32>
    %85 = arith.subf %76, %84 : vector<8x8xf32>
    %86 = math.exp %85 : vector<8x8xf32>
    %c1_45 = arith.constant 1 : index
    %c0_46 = arith.constant 0 : index
    %c0_47 = arith.constant 0 : index
    %87 = vector.load %arg9[%c1_45, %c0_46, %c0_47] : memref<4x8x1xf32, #tpu.memory_space<vmem>>, vector<1x8x1xf32>
    %88 = vector.shape_cast %87 : vector<1x8x1xf32> to vector<8x1xf32>
    %89 = arith.mulf %83, %88 : vector<8x1xf32>
    %cst_48 = arith.constant dense<0.000000e+00> : vector<8xf32>
    %90 = vector.multi_reduction <add>, %86, %cst_48 [1] : vector<8x8xf32> to vector<8xf32>
    %91 = vector.shape_cast %90 : vector<8xf32> to vector<8x1xf32>
    %92 = arith.addf %89, %91 : vector<8x1xf32>
    %c1_49 = arith.constant 1 : index
    %c0_50 = arith.constant 0 : index
    %c0_51 = arith.constant 0 : index
    %93 = vector.load %arg9[%c1_49, %c0_50, %c0_51] : memref<4x8x1xf32, #tpu.memory_space<vmem>>, vector<1x8x1xf32>
    %94 = vector.shape_cast %93 : vector<1x8x1xf32> to vector<8x1xf32>
    %95 = vector.shape_cast %92 : vector<8x1xf32> to vector<1x8x1xf32>
    tpu.vector_store %arg9[%c1_49, %c0_50, %c0_51], %95 {strides = array<i32>} : memref<4x8x1xf32, #tpu.memory_space<vmem>>, vector<1x8x1xf32>,
    %c1_52 = arith.constant 1 : index
    %c0_53 = arith.constant 0 : index
    %c0_54 = arith.constant 0 : index
    %96 = vector.load %arg10[%c1_52, %c0_53, %c0_54] : memref<4x8x8xf32, #tpu.memory_space<vmem>>, vector<1x8x8xf32>
    %97 = vector.shape_cast %96 : vector<1x8x8xf32> to vector<8x8xf32>
    %98 = vector.broadcast %83 : vector<8x1xf32> to vector<8x8xf32>
    %99 = arith.mulf %98, %97 : vector<8x8xf32>
    %100 = arith.truncf %86 : vector<8x8xf32> to vector<8x8xbf16>
    %101 = vector.extract_strided_slice %28 {offsets = [0, 1, 0], sizes = [8, 1, 8], strides = [1, 1, 1]} : vector<8x4x8xbf16> to vector<8x1x8xbf16>
    %102 = vector.shape_cast %101 : vector<8x1x8xbf16> to vector<8x8xbf16>
    %cst_55 = arith.constant dense<0.000000e+00> : vector<8x8xf32>
    %103 = tpu.matmul %100, %102, %cst_55 {dimension_numbers = #tpu.dot_dimension_numbers<[1], [0], [0], [1], [0, 0, 1, 1], [], []>} : vector<8x8xbf16>, vector<8x8xbf16>, vector<8x8xf32> -> vector<8x8xf32>
    %104 = arith.addf %99, %103 : vector<8x8xf32>
    %c1_56 = arith.constant 1 : index
    %c0_57 = arith.constant 0 : index
    %c0_58 = arith.constant 0 : index
    %105 = vector.load %arg10[%c1_56, %c0_57, %c0_58] : memref<4x8x8xf32, #tpu.memory_space<vmem>>, vector<1x8x8xf32>
    %106 = vector.shape_cast %105 : vector<1x8x8xf32> to vector<8x8xf32>
    %107 = vector.shape_cast %104 : vector<8x8xf32> to vector<1x8x8xf32>
    tpu.vector_store %arg10[%c1_56, %c0_57, %c0_58], %107 {strides = array<i32>} : memref<4x8x8xf32, #tpu.memory_space<vmem>>, vector<1x8x8xf32>,
    %c1_59 = arith.constant 1 : index
    %c0_60 = arith.constant 0 : index
    %c0_61 = arith.constant 0 : index
    %108 = vector.load %arg8[%c1_59, %c0_60, %c0_61] : memref<4x8x1xf32, #tpu.memory_space<vmem>>, vector<1x8x1xf32>
    %109 = vector.shape_cast %108 : vector<1x8x1xf32> to vector<8x1xf32>
    %110 = vector.shape_cast %81 : vector<8x1xf32> to vector<1x8x1xf32>
    tpu.vector_store %arg8[%c1_59, %c0_60, %c0_61], %110 {strides = array<i32>} : memref<4x8x1xf32, #tpu.memory_space<vmem>>, vector<1x8x1xf32>,
    %111 = vector.extract_strided_slice %24 {offsets = [0, 2, 0], sizes = [8, 1, 8], strides = [1, 1, 1]} : vector<8x4x8xbf16> to vector<8x1x8xbf16>
    %112 = vector.shape_cast %111 : vector<8x1x8xbf16> to vector<8x8xbf16>
    %113 = vector.extract_strided_slice %26 {offsets = [0, 2, 0], sizes = [8, 1, 8], strides = [1, 1, 1]} : vector<8x4x8xbf16> to vector<8x1x8xbf16>
    %114 = vector.shape_cast %113 : vector<8x1x8xbf16> to vector<8x8xbf16>
    %cst_62 = arith.constant dense<0.000000e+00> : vector<8x8xf32>
    %115 = tpu.matmul %112, %114, %cst_62 {dimension_numbers = #tpu.dot_dimension_numbers<[1], [1], [0], [0], [0, 0, 1, 0], [], []>} : vector<8x8xbf16>, vector<8x8xbf16>, vector<8x8xf32> -> vector<8x8xf32>
    %cst_63 = arith.constant -1.000000e+30 : f32
    %116 = vector.broadcast %cst_63 : f32 to vector<8x8xf32>
    %117 = arith.select %18, %116, %115 : vector<8x8xi1>, vector<8x8xf32>
    %c2 = arith.constant 2 : index
    %c0_64 = arith.constant 0 : index
    %c0_65 = arith.constant 0 : index
    %118 = vector.load %arg8[%c2, %c0_64, %c0_65] : memref<4x8x1xf32, #tpu.memory_space<vmem>>, vector<1x8x1xf32>
    %119 = vector.shape_cast %118 : vector<1x8x1xf32> to vector<8x1xf32>
    %cst_66 = arith.constant dense<0xFF800000> : vector<8xf32>
    %120 = vector.multi_reduction <maximumf>, %117, %cst_66 [1] : vector<8x8xf32> to vector<8xf32>
    %121 = vector.shape_cast %120 : vector<8xf32> to vector<8x1xf32>
    %122 = arith.maximumf %119, %121 : vector<8x1xf32>
    %123 = arith.subf %119, %122 : vector<8x1xf32>
    %124 = math.exp %123 : vector<8x1xf32>
    %125 = vector.broadcast %122 : vector<8x1xf32> to vector<8x8xf32>
    %126 = arith.subf %117, %125 : vector<8x8xf32>
    %127 = math.exp %126 : vector<8x8xf32>
    %c2_67 = arith.constant 2 : index
    %c0_68 = arith.constant 0 : index
    %c0_69 = arith.constant 0 : index
    %128 = vector.load %arg9[%c2_67, %c0_68, %c0_69] : memref<4x8x1xf32, #tpu.memory_space<vmem>>, vector<1x8x1xf32>
    %129 = vector.shape_cast %128 : vector<1x8x1xf32> to vector<8x1xf32>
    %130 = arith.mulf %124, %129 : vector<8x1xf32>
    %cst_70 = arith.constant dense<0.000000e+00> : vector<8xf32>
    %131 = vector.multi_reduction <add>, %127, %cst_70 [1] : vector<8x8xf32> to vector<8xf32>
    %132 = vector.shape_cast %131 : vector<8xf32> to vector<8x1xf32>
    %133 = arith.addf %130, %132 : vector<8x1xf32>
    %c2_71 = arith.constant 2 : index
    %c0_72 = arith.constant 0 : index
    %c0_73 = arith.constant 0 : index
    %134 = vector.load %arg9[%c2_71, %c0_72, %c0_73] : memref<4x8x1xf32, #tpu.memory_space<vmem>>, vector<1x8x1xf32>
    %135 = vector.shape_cast %134 : vector<1x8x1xf32> to vector<8x1xf32>
    %136 = vector.shape_cast %133 : vector<8x1xf32> to vector<1x8x1xf32>
    tpu.vector_store %arg9[%c2_71, %c0_72, %c0_73], %136 {strides = array<i32>} : memref<4x8x1xf32, #tpu.memory_space<vmem>>, vector<1x8x1xf32>,
    %c2_74 = arith.constant 2 : index
    %c0_75 = arith.constant 0 : index
    %c0_76 = arith.constant 0 : index
    %137 = vector.load %arg10[%c2_74, %c0_75, %c0_76] : memref<4x8x8xf32, #tpu.memory_space<vmem>>, vector<1x8x8xf32>
    %138 = vector.shape_cast %137 : vector<1x8x8xf32> to vector<8x8xf32>
    %139 = vector.broadcast %124 : vector<8x1xf32> to vector<8x8xf32>
    %140 = arith.mulf %139, %138 : vector<8x8xf32>
    %141 = arith.truncf %127 : vector<8x8xf32> to vector<8x8xbf16>
    %142 = vector.extract_strided_slice %28 {offsets = [0, 2, 0], sizes = [8, 1, 8], strides = [1, 1, 1]} : vector<8x4x8xbf16> to vector<8x1x8xbf16>
    %143 = vector.shape_cast %142 : vector<8x1x8xbf16> to vector<8x8xbf16>
    %cst_77 = arith.constant dense<0.000000e+00> : vector<8x8xf32>
    %144 = tpu.matmul %141, %143, %cst_77 {dimension_numbers = #tpu.dot_dimension_numbers<[1], [0], [0], [1], [0, 0, 1, 1], [], []>} : vector<8x8xbf16>, vector<8x8xbf16>, vector<8x8xf32> -> vector<8x8xf32>
    %145 = arith.addf %140, %144 : vector<8x8xf32>
    %c2_78 = arith.constant 2 : index
    %c0_79 = arith.constant 0 : index
    %c0_80 = arith.constant 0 : index
    %146 = vector.load %arg10[%c2_78, %c0_79, %c0_80] : memref<4x8x8xf32, #tpu.memory_space<vmem>>, vector<1x8x8xf32>
    %147 = vector.shape_cast %146 : vector<1x8x8xf32> to vector<8x8xf32>
    %148 = vector.shape_cast %145 : vector<8x8xf32> to vector<1x8x8xf32>
    tpu.vector_store %arg10[%c2_78, %c0_79, %c0_80], %148 {strides = array<i32>} : memref<4x8x8xf32, #tpu.memory_space<vmem>>, vector<1x8x8xf32>,
    %c2_81 = arith.constant 2 : index
    %c0_82 = arith.constant 0 : index
    %c0_83 = arith.constant 0 : index
    %149 = vector.load %arg8[%c2_81, %c0_82, %c0_83] : memref<4x8x1xf32, #tpu.memory_space<vmem>>, vector<1x8x1xf32>
    %150 = vector.shape_cast %149 : vector<1x8x1xf32> to vector<8x1xf32>
    %151 = vector.shape_cast %122 : vector<8x1xf32> to vector<1x8x1xf32>
    tpu.vector_store %arg8[%c2_81, %c0_82, %c0_83], %151 {strides = array<i32>} : memref<4x8x1xf32, #tpu.memory_space<vmem>>, vector<1x8x1xf32>,
    %152 = vector.extract_strided_slice %24 {offsets = [0, 3, 0], sizes = [8, 1, 8], strides = [1, 1, 1]} : vector<8x4x8xbf16> to vector<8x1x8xbf16>
    %153 = vector.shape_cast %152 : vector<8x1x8xbf16> to vector<8x8xbf16>
    %154 = vector.extract_strided_slice %26 {offsets = [0, 3, 0], sizes = [8, 1, 8], strides = [1, 1, 1]} : vector<8x4x8xbf16> to vector<8x1x8xbf16>
    %155 = vector.shape_cast %154 : vector<8x1x8xbf16> to vector<8x8xbf16>
    %cst_84 = arith.constant dense<0.000000e+00> : vector<8x8xf32>
    %156 = tpu.matmul %153, %155, %cst_84 {dimension_numbers = #tpu.dot_dimension_numbers<[1], [1], [0], [0], [0, 0, 1, 0], [], []>} : vector<8x8xbf16>, vector<8x8xbf16>, vector<8x8xf32> -> vector<8x8xf32>
    %cst_85 = arith.constant -1.000000e+30 : f32
    %157 = vector.broadcast %cst_85 : f32 to vector<8x8xf32>
    %158 = arith.select %18, %157, %156 : vector<8x8xi1>, vector<8x8xf32>
    %c3 = arith.constant 3 : index
    %c0_86 = arith.constant 0 : index
    %c0_87 = arith.constant 0 : index
    %159 = vector.load %arg8[%c3, %c0_86, %c0_87] : memref<4x8x1xf32, #tpu.memory_space<vmem>>, vector<1x8x1xf32>
    %160 = vector.shape_cast %159 : vector<1x8x1xf32> to vector<8x1xf32>
    %cst_88 = arith.constant dense<0xFF800000> : vector<8xf32>
    %161 = vector.multi_reduction <maximumf>, %158, %cst_88 [1] : vector<8x8xf32> to vector<8xf32>
    %162 = vector.shape_cast %161 : vector<8xf32> to vector<8x1xf32>
    %163 = arith.maximumf %160, %162 : vector<8x1xf32>
    %164 = arith.subf %160, %163 : vector<8x1xf32>
    %165 = math.exp %164 : vector<8x1xf32>
    %166 = vector.broadcast %163 : vector<8x1xf32> to vector<8x8xf32>
    %167 = arith.subf %158, %166 : vector<8x8xf32>
    %168 = math.exp %167 : vector<8x8xf32>
    %c3_89 = arith.constant 3 : index
    %c0_90 = arith.constant 0 : index
    %c0_91 = arith.constant 0 : index
    %169 = vector.load %arg9[%c3_89, %c0_90, %c0_91] : memref<4x8x1xf32, #tpu.memory_space<vmem>>, vector<1x8x1xf32>
    %170 = vector.shape_cast %169 : vector<1x8x1xf32> to vector<8x1xf32>
    %171 = arith.mulf %165, %170 : vector<8x1xf32>
    %cst_92 = arith.constant dense<0.000000e+00> : vector<8xf32>
    %172 = vector.multi_reduction <add>, %168, %cst_92 [1] : vector<8x8xf32> to vector<8xf32>
    %173 = vector.shape_cast %172 : vector<8xf32> to vector<8x1xf32>
    %174 = arith.addf %171, %173 : vector<8x1xf32>
    %c3_93 = arith.constant 3 : index
    %c0_94 = arith.constant 0 : index
    %c0_95 = arith.constant 0 : index
    %175 = vector.load %arg9[%c3_93, %c0_94, %c0_95] : memref<4x8x1xf32, #tpu.memory_space<vmem>>, vector<1x8x1xf32>
    %176 = vector.shape_cast %175 : vector<1x8x1xf32> to vector<8x1xf32>
    %177 = vector.shape_cast %174 : vector<8x1xf32> to vector<1x8x1xf32>
    tpu.vector_store %arg9[%c3_93, %c0_94, %c0_95], %177 {strides = array<i32>} : memref<4x8x1xf32, #tpu.memory_space<vmem>>, vector<1x8x1xf32>,
    %c3_96 = arith.constant 3 : index
    %c0_97 = arith.constant 0 : index
    %c0_98 = arith.constant 0 : index
    %178 = vector.load %arg10[%c3_96, %c0_97, %c0_98] : memref<4x8x8xf32, #tpu.memory_space<vmem>>, vector<1x8x8xf32>
    %179 = vector.shape_cast %178 : vector<1x8x8xf32> to vector<8x8xf32>
    %180 = vector.broadcast %165 : vector<8x1xf32> to vector<8x8xf32>
    %181 = arith.mulf %180, %179 : vector<8x8xf32>
    %182 = arith.truncf %168 : vector<8x8xf32> to vector<8x8xbf16>
    %183 = vector.extract_strided_slice %28 {offsets = [0, 3, 0], sizes = [8, 1, 8], strides = [1, 1, 1]} : vector<8x4x8xbf16> to vector<8x1x8xbf16>
    %184 = vector.shape_cast %183 : vector<8x1x8xbf16> to vector<8x8xbf16>
    %cst_99 = arith.constant dense<0.000000e+00> : vector<8x8xf32>
    %185 = tpu.matmul %182, %184, %cst_99 {dimension_numbers = #tpu.dot_dimension_numbers<[1], [0], [0], [1], [0, 0, 1, 1], [], []>} : vector<8x8xbf16>, vector<8x8xbf16>, vector<8x8xf32> -> vector<8x8xf32>
    %186 = arith.addf %181, %185 : vector<8x8xf32>
    %c3_100 = arith.constant 3 : index
    %c0_101 = arith.constant 0 : index
    %c0_102 = arith.constant 0 : index
    %187 = vector.load %arg10[%c3_100, %c0_101, %c0_102] : memref<4x8x8xf32, #tpu.memory_space<vmem>>, vector<1x8x8xf32>
    %188 = vector.shape_cast %187 : vector<1x8x8xf32> to vector<8x8xf32>
    %189 = vector.shape_cast %186 : vector<8x8xf32> to vector<1x8x8xf32>
    tpu.vector_store %arg10[%c3_100, %c0_101, %c0_102], %189 {strides = array<i32>} : memref<4x8x8xf32, #tpu.memory_space<vmem>>, vector<1x8x8xf32>,
    %c3_103 = arith.constant 3 : index
    %c0_104 = arith.constant 0 : index
    %c0_105 = arith.constant 0 : index
    %190 = vector.load %arg8[%c3_103, %c0_104, %c0_105] : memref<4x8x1xf32, #tpu.memory_space<vmem>>, vector<1x8x1xf32>
    %191 = vector.shape_cast %190 : vector<1x8x1xf32> to vector<8x1xf32>
    %192 = vector.shape_cast %163 : vector<8x1xf32> to vector<1x8x1xf32>
    tpu.vector_store %arg8[%c3_103, %c0_104, %c0_105], %192 {strides = array<i32>} : memref<4x8x1xf32, #tpu.memory_space<vmem>>, vector<1x8x1xf32>,
    %c0_i32_106 = arith.constant 0 : i32
    %193 = arith.cmpi eq, %arg2, %c0_i32_106 : i32
    %194 = arith.extui %193 : i1 to i32
    %c0_i32_107 = arith.constant 0 : i32
    %195 = arith.cmpi ne, %194, %c0_i32_107 : i32
    scf.if %195 {
      %c0_108 = arith.constant 0 : index
      %c0_109 = arith.constant 0 : index
      %c0_110 = arith.constant 0 : index
      %196 = vector.load %arg9[%c0_108, %c0_109, %c0_110] : memref<4x8x1xf32, #tpu.memory_space<vmem>>, vector<1x8x1xf32>
      %197 = vector.shape_cast %196 : vector<1x8x1xf32> to vector<8x1xf32>
      %198 = tpu.reciprocal %197 {approx = true} : vector<8x1xf32> -> vector<8x1xf32>
      %c0_111 = arith.constant 0 : index
      %c0_112 = arith.constant 0 : index
      %c0_113 = arith.constant 0 : index
      %199 = vector.load %arg10[%c0_111, %c0_112, %c0_113] : memref<4x8x8xf32, #tpu.memory_space<vmem>>, vector<1x8x8xf32>
      %200 = vector.shape_cast %199 : vector<1x8x8xf32> to vector<8x8xf32>
      %201 = vector.broadcast %198 : vector<8x1xf32> to vector<8x8xf32>
      %202 = arith.mulf %200, %201 : vector<8x8xf32>
      %203 = arith.truncf %202 : vector<8x8xf32> to vector<8x8xbf16>
      %c1_114 = arith.constant 1 : index
      %c0_115 = arith.constant 0 : index
      %c0_116 = arith.constant 0 : index
      %204 = vector.load %arg9[%c1_114, %c0_115, %c0_116] : memref<4x8x1xf32, #tpu.memory_space<vmem>>, vector<1x8x1xf32>
      %205 = vector.shape_cast %204 : vector<1x8x1xf32> to vector<8x1xf32>
      %206 = tpu.reciprocal %205 {approx = true} : vector<8x1xf32> -> vector<8x1xf32>
      %c1_117 = arith.constant 1 : index
      %c0_118 = arith.constant 0 : index
      %c0_119 = arith.constant 0 : index
      %207 = vector.load %arg10[%c1_117, %c0_118, %c0_119] : memref<4x8x8xf32, #tpu.memory_space<vmem>>, vector<1x8x8xf32>
      %208 = vector.shape_cast %207 : vector<1x8x8xf32> to vector<8x8xf32>
      %209 = vector.broadcast %206 : vector<8x1xf32> to vector<8x8xf32>
      %210 = arith.mulf %208, %209 : vector<8x8xf32>
      %211 = arith.truncf %210 : vector<8x8xf32> to vector<8x8xbf16>
      %c2_120 = arith.constant 2 : index
      %c0_121 = arith.constant 0 : index
      %c0_122 = arith.constant 0 : index
      %212 = vector.load %arg9[%c2_120, %c0_121, %c0_122] : memref<4x8x1xf32, #tpu.memory_space<vmem>>, vector<1x8x1xf32>
      %213 = vector.shape_cast %212 : vector<1x8x1xf32> to vector<8x1xf32>
      %214 = tpu.reciprocal %213 {approx = true} : vector<8x1xf32> -> vector<8x1xf32>
      %c2_123 = arith.constant 2 : index
      %c0_124 = arith.constant 0 : index
      %c0_125 = arith.constant 0 : index
      %215 = vector.load %arg10[%c2_123, %c0_124, %c0_125] : memref<4x8x8xf32, #tpu.memory_space<vmem>>, vector<1x8x8xf32>
      %216 = vector.shape_cast %215 : vector<1x8x8xf32> to vector<8x8xf32>
      %217 = vector.broadcast %214 : vector<8x1xf32> to vector<8x8xf32>
      %218 = arith.mulf %216, %217 : vector<8x8xf32>
      %219 = arith.truncf %218 : vector<8x8xf32> to vector<8x8xbf16>
      %c3_126 = arith.constant 3 : index
      %c0_127 = arith.constant 0 : index
      %c0_128 = arith.constant 0 : index
      %220 = vector.load %arg9[%c3_126, %c0_127, %c0_128] : memref<4x8x1xf32, #tpu.memory_space<vmem>>, vector<1x8x1xf32>
      %221 = vector.shape_cast %220 : vector<1x8x1xf32> to vector<8x1xf32>
      %222 = tpu.reciprocal %221 {approx = true} : vector<8x1xf32> -> vector<8x1xf32>
      %c3_129 = arith.constant 3 : index
      %c0_130 = arith.constant 0 : index
      %c0_131 = arith.constant 0 : index
      %223 = vector.load %arg10[%c3_129, %c0_130, %c0_131] : memref<4x8x8xf32, #tpu.memory_space<vmem>>, vector<1x8x8xf32>
      %224 = vector.shape_cast %223 : vector<1x8x8xf32> to vector<8x8xf32>
      %225 = vector.broadcast %222 : vector<8x1xf32> to vector<8x8xf32>
      %226 = arith.mulf %224, %225 : vector<8x8xf32>
      %227 = arith.truncf %226 : vector<8x8xf32> to vector<8x8xbf16>
      %228 = tpu.concatenate %203, %211, %219, %227 in 1 : vector<8x8xbf16>, vector<8x8xbf16>, vector<8x8xbf16>, vector<8x8xbf16> -> vector<8x32xbf16>
      %c0_132 = arith.constant 0 : index
      %c0_133 = arith.constant 0 : index
      %c0_134 = arith.constant 0 : index
      %229 = vector.load %arg7[%c0_132, %c0_133, %c0_134] : memref<1x8x32xbf16, #tpu.memory_space<vmem>>, vector<1x8x32xbf16>
      %230 = vector.shape_cast %229 : vector<1x8x32xbf16> to vector<8x32xbf16>
      %231 = vector.shape_cast %228 : vector<8x32xbf16> to vector<1x8x32xbf16>
      tpu.vector_store %arg7[%c0_132, %c0_133, %c0_134], %231 {strides = array<i32>} : memref<1x8x32xbf16, #tpu.memory_space<vmem>>, vector<1x8x32xbf16>,
    } else {
    }
    return
  }
  func.func @transform_0(%arg0: i32, %arg1: i32, %arg2: i32) -> (i32, i32, i32, i32) {
    %c0_i32 = arith.constant 0 : i32
    %c0_i32_0 = arith.constant 0 : i32
    %c0_i32_1 = arith.constant 0 : i32
    return %arg0, %arg1, %c0_i32, %c0_i32_0 : i32, i32, i32, i32
  }
  func.func @transform_1(%arg0: i32, %arg1: i32, %arg2: i32) -> (i32, i32, i32, i32) {
    %c0_i32 = arith.constant 0 : i32
    %c0_i32_0 = arith.constant 0 : i32
    %c0_i32_1 = arith.constant 0 : i32
    return %arg0, %arg2, %c0_i32, %c0_i32_0 : i32, i32, i32, i32
  }
  func.func @transform_2(%arg0: i32, %arg1: i32, %arg2: i32) -> (i32, i32, i32, i32) {
    %c0_i32 = arith.constant 0 : i32
    %c0_i32_0 = arith.constant 0 : i32
    %c0_i32_1 = arith.constant 0 : i32
    return %arg0, %arg2, %c0_i32, %c0_i32_0 : i32, i32, i32, i32
  }
  func.func @transform_3(%arg0: i32, %arg1: i32, %arg2: i32) -> (i32, i32, i32) {
    %c0_i32 = arith.constant 0 : i32
    %c0_i32_0 = arith.constant 0 : i32
    return %arg0, %c0_i32, %arg2 : i32, i32, i32
  }
  func.func @transform_4(%arg0: i32, %arg1: i32, %arg2: i32) -> (i32, i32, i32) {
    %c0_i32 = arith.constant 0 : i32
    %c0_i32_0 = arith.constant 0 : i32
    return %arg0, %arg1, %c0_i32 : i32, i32, i32
  }
}

module attributes {stable_mosaic.version = 11 : i64} {
  func.func @_linear_kernel(%arg0: i32, %arg1: i32, %arg2: i32, %arg3: memref<16x32xbf16, #tpu.memory_space<vmem>>, %arg4: memref<32x32xbf16, #tpu.memory_space<vmem>>, %arg5: memref<1x32xf32, #tpu.memory_space<vmem>>, %arg6: memref<16x32xbf16, #tpu.memory_space<vmem>>, %arg7: memref<1x32xf32, #tpu.memory_space<vmem>>, %arg8: memref<1x32xf32, #tpu.memory_space<vmem>>, %arg9: memref<16x32xbf16, #tpu.memory_space<vmem>>, %arg10: memref<16x32xf32, #tpu.memory_space<vmem>>) attributes {dimension_semantics = [#tpu.dimension_semantics<parallel>, #tpu.dimension_semantics<parallel>, #tpu.dimension_semantics<arbitrary>], iteration_bounds = array<i64: 1, 1, 1>, scalar_prefetch = 0 : i64, scratch_operands = 1 : i64, tpu.core_type = #tpu.core_type<tc>, window_params = [{transform_indices = @transform_0, window_bounds = array<i64: 16, 32>}, {transform_indices = @transform_1, window_bounds = array<i64: 32, 32>}, {transform_indices = @transform_2, window_bounds = array<i64: 1, 32>}, {transform_indices = @transform_3, window_bounds = array<i64: 16, 32>}, {transform_indices = @transform_4, window_bounds = array<i64: 1, 32>}, {transform_indices = @transform_5, window_bounds = array<i64: 1, 32>}, {transform_indices = @transform_6, window_bounds = array<i64: 16, 32>}]} {
    %c0_i32 = arith.constant 0 : i32
    %0 = arith.cmpi eq, %arg2, %c0_i32 : i32
    %1 = arith.extui %0 : i1 to i32
    %c0_i32_0 = arith.constant 0 : i32
    %2 = arith.cmpi ne, %1, %c0_i32_0 : i32
    scf.if %2 {
      %cst_10 = arith.constant 0.000000e+00 : f32
      %12 = vector.broadcast %cst_10 : f32 to vector<16x32xf32>
      %c0_11 = arith.constant 0 : index
      %c0_12 = arith.constant 0 : index
      %13 = vector.load %arg10[%c0_11, %c0_12] : memref<16x32xf32, #tpu.memory_space<vmem>>, vector<16x32xf32>
      tpu.vector_store %arg10[%c0_11, %c0_12], %12 {strides = array<i32>} : memref<16x32xf32, #tpu.memory_space<vmem>>, vector<16x32xf32>,
    } else {
    }
    %c0 = arith.constant 0 : index
    %c0_1 = arith.constant 0 : index
    %3 = vector.load %arg10[%c0, %c0_1] : memref<16x32xf32, #tpu.memory_space<vmem>>, vector<16x32xf32>
    %c0_2 = arith.constant 0 : index
    %c0_3 = arith.constant 0 : index
    %4 = vector.load %arg3[%c0_2, %c0_3] : memref<16x32xbf16, #tpu.memory_space<vmem>>, vector<16x32xbf16>
    %c0_4 = arith.constant 0 : index
    %c0_5 = arith.constant 0 : index
    %5 = vector.load %arg4[%c0_4, %c0_5] : memref<32x32xbf16, #tpu.memory_space<vmem>>, vector<32x32xbf16>
    %cst = arith.constant dense<0.000000e+00> : vector<16x32xf32>
    %6 = tpu.matmul %4, %5, %cst {dimension_numbers = #tpu.dot_dimension_numbers<[1], [0], [0], [1], [0, 0, 1, 1], [], []>} : vector<16x32xbf16>, vector<32x32xbf16>, vector<16x32xf32> -> vector<16x32xf32>
    %7 = arith.addf %3, %6 : vector<16x32xf32>
    %c0_6 = arith.constant 0 : index
    %c0_7 = arith.constant 0 : index
    %8 = vector.load %arg10[%c0_6, %c0_7] : memref<16x32xf32, #tpu.memory_space<vmem>>, vector<16x32xf32>
    tpu.vector_store %arg10[%c0_6, %c0_7], %7 {strides = array<i32>} : memref<16x32xf32, #tpu.memory_space<vmem>>, vector<16x32xf32>,
    %c0_i32_8 = arith.constant 0 : i32
    %9 = arith.cmpi eq, %arg2, %c0_i32_8 : i32
    %10 = arith.extui %9 : i1 to i32
    %c0_i32_9 = arith.constant 0 : i32
    %11 = arith.cmpi ne, %10, %c0_i32_9 : i32
    scf.if %11 {
      %c0_10 = arith.constant 0 : index
      %c0_11 = arith.constant 0 : index
      %12 = vector.load %arg10[%c0_10, %c0_11] : memref<16x32xf32, #tpu.memory_space<vmem>>, vector<16x32xf32>
      %c0_12 = arith.constant 0 : index
      %c0_13 = arith.constant 0 : index
      %13 = vector.load %arg5[%c0_12, %c0_13] : memref<1x32xf32, #tpu.memory_space<vmem>>, vector<1x32xf32>
      %14 = vector.broadcast %13 : vector<1x32xf32> to vector<16x32xf32>
      %15 = arith.addf %12, %14 : vector<16x32xf32>
      %c0_14 = arith.constant 0 : index
      %c0_15 = arith.constant 0 : index
      %16 = vector.load %arg6[%c0_14, %c0_15] : memref<16x32xbf16, #tpu.memory_space<vmem>>, vector<16x32xbf16>
      %17 = arith.extf %16 : vector<16x32xbf16> to vector<16x32xf32>
      %18 = arith.addf %15, %17 : vector<16x32xf32>
      %cst_16 = arith.constant dense<0.000000e+00> : vector<16xf32>
      %19 = vector.multi_reduction <add>, %18, %cst_16 [1] : vector<16x32xf32> to vector<16xf32>
      %20 = vector.shape_cast %19 : vector<16xf32> to vector<16x1xf32>
      %cst_17 = arith.constant 3.200000e+01 : f32
      %21 = vector.broadcast %cst_17 : f32 to vector<16x1xf32>
      %22 = arith.divf %20, %21 : vector<16x1xf32>
      %23 = vector.broadcast %22 : vector<16x1xf32> to vector<16x32xf32>
      %24 = arith.subf %18, %23 : vector<16x32xf32>
      %25 = arith.mulf %24, %24 : vector<16x32xf32>
      %cst_18 = arith.constant dense<0.000000e+00> : vector<16xf32>
      %26 = vector.multi_reduction <add>, %25, %cst_18 [1] : vector<16x32xf32> to vector<16xf32>
      %27 = vector.shape_cast %26 : vector<16xf32> to vector<16x1xf32>
      %cst_19 = arith.constant 3.200000e+01 : f32
      %28 = vector.broadcast %cst_19 : f32 to vector<16x1xf32>
      %29 = arith.divf %27, %28 : vector<16x1xf32>
      %30 = vector.broadcast %22 : vector<16x1xf32> to vector<16x32xf32>
      %31 = arith.subf %18, %30 : vector<16x32xf32>
      %cst_20 = arith.constant 9.99999974E-6 : f32
      %32 = vector.broadcast %cst_20 : f32 to vector<16x1xf32>
      %33 = arith.addf %29, %32 : vector<16x1xf32>
      %34 = math.rsqrt %33 : vector<16x1xf32>
      %35 = vector.broadcast %34 : vector<16x1xf32> to vector<16x32xf32>
      %36 = arith.mulf %31, %35 : vector<16x32xf32>
      %c0_21 = arith.constant 0 : index
      %c0_22 = arith.constant 0 : index
      %37 = vector.load %arg7[%c0_21, %c0_22] : memref<1x32xf32, #tpu.memory_space<vmem>>, vector<1x32xf32>
      %38 = vector.broadcast %37 : vector<1x32xf32> to vector<16x32xf32>
      %39 = arith.mulf %36, %38 : vector<16x32xf32>
      %c0_23 = arith.constant 0 : index
      %c0_24 = arith.constant 0 : index
      %40 = vector.load %arg8[%c0_23, %c0_24] : memref<1x32xf32, #tpu.memory_space<vmem>>, vector<1x32xf32>
      %41 = vector.broadcast %40 : vector<1x32xf32> to vector<16x32xf32>
      %42 = arith.addf %39, %41 : vector<16x32xf32>
      %43 = arith.truncf %42 : vector<16x32xf32> to vector<16x32xbf16>
      %c0_25 = arith.constant 0 : index
      %c0_26 = arith.constant 0 : index
      %44 = vector.load %arg9[%c0_25, %c0_26] : memref<16x32xbf16, #tpu.memory_space<vmem>>, vector<16x32xbf16>
      tpu.vector_store %arg9[%c0_25, %c0_26], %43 {strides = array<i32>} : memref<16x32xbf16, #tpu.memory_space<vmem>>, vector<16x32xbf16>,
    } else {
    }
    return
  }
  func.func @transform_0(%arg0: i32, %arg1: i32, %arg2: i32) -> (i32, i32) {
    %c0_i32 = arith.constant 0 : i32
    return %arg0, %arg2 : i32, i32
  }
  func.func @transform_1(%arg0: i32, %arg1: i32, %arg2: i32) -> (i32, i32) {
    %c0_i32 = arith.constant 0 : i32
    return %arg2, %arg1 : i32, i32
  }
  func.func @transform_2(%arg0: i32, %arg1: i32, %arg2: i32) -> (i32, i32) {
    %c0_i32 = arith.constant 0 : i32
    %c0_i32_0 = arith.constant 0 : i32
    return %c0_i32, %arg1 : i32, i32
  }
  func.func @transform_3(%arg0: i32, %arg1: i32, %arg2: i32) -> (i32, i32) {
    %c0_i32 = arith.constant 0 : i32
    return %arg0, %arg1 : i32, i32
  }
  func.func @transform_4(%arg0: i32, %arg1: i32, %arg2: i32) -> (i32, i32) {
    %c0_i32 = arith.constant 0 : i32
    %c0_i32_0 = arith.constant 0 : i32
    return %c0_i32, %arg1 : i32, i32
  }
  func.func @transform_5(%arg0: i32, %arg1: i32, %arg2: i32) -> (i32, i32) {
    %c0_i32 = arith.constant 0 : i32
    %c0_i32_0 = arith.constant 0 : i32
    return %c0_i32, %arg1 : i32, i32
  }
  func.func @transform_6(%arg0: i32, %arg1: i32, %arg2: i32) -> (i32, i32) {
    %c0_i32 = arith.constant 0 : i32
    return %arg0, %arg1 : i32, i32
  }
}

module attributes {stable_mosaic.version = 11 : i64} {
  func.func @_linear_kernel(%arg0: i32, %arg1: i32, %arg2: i32, %arg3: memref<16x32xbf16, #tpu.memory_space<vmem>>, %arg4: memref<32x32xbf16, #tpu.memory_space<vmem>>, %arg5: memref<1x32xf32, #tpu.memory_space<vmem>>, %arg6: memref<16x32xbf16, #tpu.memory_space<vmem>>, %arg7: memref<16x32xf32, #tpu.memory_space<vmem>>) attributes {dimension_semantics = [#tpu.dimension_semantics<parallel>, #tpu.dimension_semantics<parallel>, #tpu.dimension_semantics<arbitrary>], iteration_bounds = array<i64: 1, 1, 1>, scalar_prefetch = 0 : i64, scratch_operands = 1 : i64, tpu.core_type = #tpu.core_type<tc>, window_params = [{transform_indices = @transform_0, window_bounds = array<i64: 16, 32>}, {transform_indices = @transform_1, window_bounds = array<i64: 32, 32>}, {transform_indices = @transform_2, window_bounds = array<i64: 1, 32>}, {transform_indices = @transform_3, window_bounds = array<i64: 16, 32>}]} {
    %c0_i32 = arith.constant 0 : i32
    %0 = arith.cmpi eq, %arg2, %c0_i32 : i32
    %1 = arith.extui %0 : i1 to i32
    %c0_i32_0 = arith.constant 0 : i32
    %2 = arith.cmpi ne, %1, %c0_i32_0 : i32
    scf.if %2 {
      %cst_10 = arith.constant 0.000000e+00 : f32
      %12 = vector.broadcast %cst_10 : f32 to vector<16x32xf32>
      %c0_11 = arith.constant 0 : index
      %c0_12 = arith.constant 0 : index
      %13 = vector.load %arg7[%c0_11, %c0_12] : memref<16x32xf32, #tpu.memory_space<vmem>>, vector<16x32xf32>
      tpu.vector_store %arg7[%c0_11, %c0_12], %12 {strides = array<i32>} : memref<16x32xf32, #tpu.memory_space<vmem>>, vector<16x32xf32>,
    } else {
    }
    %c0 = arith.constant 0 : index
    %c0_1 = arith.constant 0 : index
    %3 = vector.load %arg7[%c0, %c0_1] : memref<16x32xf32, #tpu.memory_space<vmem>>, vector<16x32xf32>
    %c0_2 = arith.constant 0 : index
    %c0_3 = arith.constant 0 : index
    %4 = vector.load %arg3[%c0_2, %c0_3] : memref<16x32xbf16, #tpu.memory_space<vmem>>, vector<16x32xbf16>
    %c0_4 = arith.constant 0 : index
    %c0_5 = arith.constant 0 : index
    %5 = vector.load %arg4[%c0_4, %c0_5] : memref<32x32xbf16, #tpu.memory_space<vmem>>, vector<32x32xbf16>
    %cst = arith.constant dense<0.000000e+00> : vector<16x32xf32>
    %6 = tpu.matmul %4, %5, %cst {dimension_numbers = #tpu.dot_dimension_numbers<[1], [0], [0], [1], [0, 0, 1, 1], [], []>} : vector<16x32xbf16>, vector<32x32xbf16>, vector<16x32xf32> -> vector<16x32xf32>
    %7 = arith.addf %3, %6 : vector<16x32xf32>
    %c0_6 = arith.constant 0 : index
    %c0_7 = arith.constant 0 : index
    %8 = vector.load %arg7[%c0_6, %c0_7] : memref<16x32xf32, #tpu.memory_space<vmem>>, vector<16x32xf32>
    tpu.vector_store %arg7[%c0_6, %c0_7], %7 {strides = array<i32>} : memref<16x32xf32, #tpu.memory_space<vmem>>, vector<16x32xf32>,
    %c0_i32_8 = arith.constant 0 : i32
    %9 = arith.cmpi eq, %arg2, %c0_i32_8 : i32
    %10 = arith.extui %9 : i1 to i32
    %c0_i32_9 = arith.constant 0 : i32
    %11 = arith.cmpi ne, %10, %c0_i32_9 : i32
    scf.if %11 {
      %c0_10 = arith.constant 0 : index
      %c0_11 = arith.constant 0 : index
      %12 = vector.load %arg7[%c0_10, %c0_11] : memref<16x32xf32, #tpu.memory_space<vmem>>, vector<16x32xf32>
      %c0_12 = arith.constant 0 : index
      %c0_13 = arith.constant 0 : index
      %13 = vector.load %arg5[%c0_12, %c0_13] : memref<1x32xf32, #tpu.memory_space<vmem>>, vector<1x32xf32>
      %14 = vector.broadcast %13 : vector<1x32xf32> to vector<16x32xf32>
      %15 = arith.addf %12, %14 : vector<16x32xf32>
      %16 = arith.truncf %15 : vector<16x32xf32> to vector<16x32xbf16>
      %c0_14 = arith.constant 0 : index
      %c0_15 = arith.constant 0 : index
      %17 = vector.load %arg6[%c0_14, %c0_15] : memref<16x32xbf16, #tpu.memory_space<vmem>>, vector<16x32xbf16>
      tpu.vector_store %arg6[%c0_14, %c0_15], %16 {strides = array<i32>} : memref<16x32xbf16, #tpu.memory_space<vmem>>, vector<16x32xbf16>,
    } else {
    }
    return
  }
  func.func @transform_0(%arg0: i32, %arg1: i32, %arg2: i32) -> (i32, i32) {
    %c0_i32 = arith.constant 0 : i32
    return %arg0, %arg2 : i32, i32
  }
  func.func @transform_1(%arg0: i32, %arg1: i32, %arg2: i32) -> (i32, i32) {
    %c0_i32 = arith.constant 0 : i32
    return %arg2, %arg1 : i32, i32
  }
  func.func @transform_2(%arg0: i32, %arg1: i32, %arg2: i32) -> (i32, i32) {
    %c0_i32 = arith.constant 0 : i32
    %c0_i32_0 = arith.constant 0 : i32
    return %c0_i32, %arg1 : i32, i32
  }
  func.func @transform_3(%arg0: i32, %arg1: i32, %arg2: i32) -> (i32, i32) {
    %c0_i32 = arith.constant 0 : i32
    return %arg0, %arg1 : i32, i32
  }
}

module attributes {stable_mosaic.version = 11 : i64} {
  func.func @_flash_attn_kernel(%arg0: i32, %arg1: i32, %arg2: i32, %arg3: memref<1x8x4x8xbf16, #tpu.memory_space<vmem>>, %arg4: memref<1x8x4x8xbf16, #tpu.memory_space<vmem>>, %arg5: memref<1x8x4x8xbf16, #tpu.memory_space<vmem>>, %arg6: memref<1x1x8xf32, #tpu.memory_space<vmem>>, %arg7: memref<1x8x32xbf16, #tpu.memory_space<vmem>>, %arg8: memref<4x8x1xf32, #tpu.memory_space<vmem>>, %arg9: memref<4x8x1xf32, #tpu.memory_space<vmem>>, %arg10: memref<4x8x8xf32, #tpu.memory_space<vmem>>) attributes {dimension_semantics = [#tpu.dimension_semantics<parallel>, #tpu.dimension_semantics<parallel>, #tpu.dimension_semantics<arbitrary>], iteration_bounds = array<i64: 2, 1, 1>, scalar_prefetch = 0 : i64, scratch_operands = 3 : i64, tpu.core_type = #tpu.core_type<tc>, window_params = [{transform_indices = @transform_0, window_bounds = array<i64: 1, 8, 4, 8>}, {transform_indices = @transform_1, window_bounds = array<i64: 1, 8, 4, 8>}, {transform_indices = @transform_2, window_bounds = array<i64: 1, 8, 4, 8>}, {transform_indices = @transform_3, window_bounds = array<i64: 1, 1, 8>}, {transform_indices = @transform_4, window_bounds = array<i64: 1, 8, 32>}]} {
    %c0_i32 = arith.constant 0 : i32
    %0 = arith.cmpi eq, %arg2, %c0_i32 : i32
    %1 = arith.extui %0 : i1 to i32
    %c0_i32_0 = arith.constant 0 : i32
    %2 = arith.cmpi ne, %1, %c0_i32_0 : i32
    scf.if %2 {
      %cst_107 = arith.constant -1.000000e+30 : f32
      %186 = vector.broadcast %cst_107 : f32 to vector<4x8x1xf32>
      %c0_108 = arith.constant 0 : index
      %c0_109 = arith.constant 0 : index
      %c0_110 = arith.constant 0 : index
      %187 = vector.load %arg8[%c0_108, %c0_109, %c0_110] : memref<4x8x1xf32, #tpu.memory_space<vmem>>, vector<4x8x1xf32>
      tpu.vector_store %arg8[%c0_108, %c0_109, %c0_110], %186 {strides = array<i32>} : memref<4x8x1xf32, #tpu.memory_space<vmem>>, vector<4x8x1xf32>,
      %cst_111 = arith.constant 0.000000e+00 : f32
      %188 = vector.broadcast %cst_111 : f32 to vector<4x8x1xf32>
      %c0_112 = arith.constant 0 : index
      %c0_113 = arith.constant 0 : index
      %c0_114 = arith.constant 0 : index
      %189 = vector.load %arg9[%c0_112, %c0_113, %c0_114] : memref<4x8x1xf32, #tpu.memory_space<vmem>>, vector<4x8x1xf32>
      tpu.vector_store %arg9[%c0_112, %c0_113, %c0_114], %188 {strides = array<i32>} : memref<4x8x1xf32, #tpu.memory_space<vmem>>, vector<4x8x1xf32>,
      %cst_115 = arith.constant 0.000000e+00 : f32
      %190 = vector.broadcast %cst_115 : f32 to vector<4x8x8xf32>
      %c0_116 = arith.constant 0 : index
      %c0_117 = arith.constant 0 : index
      %c0_118 = arith.constant 0 : index
      %191 = vector.load %arg10[%c0_116, %c0_117, %c0_118] : memref<4x8x8xf32, #tpu.memory_space<vmem>>, vector<4x8x8xf32>
      tpu.vector_store %arg10[%c0_116, %c0_117, %c0_118], %190 {strides = array<i32>} : memref<4x8x8xf32, #tpu.memory_space<vmem>>, vector<4x8x8xf32>,
    } else {
    }
    %c0 = arith.constant 0 : index
    %c0_1 = arith.constant 0 : index
    %c0_2 = arith.constant 0 : index
    %3 = vector.load %arg6[%c0, %c0_1, %c0_2] : memref<1x1x8xf32, #tpu.memory_space<vmem>>, vector<1x1x8xf32>
    %4 = vector.shape_cast %3 : vector<1x1x8xf32> to vector<1x8xf32>
    %cst = arith.constant 5.000000e-01 : f32
    %5 = vector.broadcast %cst : f32 to vector<1x8xf32>
    %6 = arith.cmpf ogt, %4, %5 : vector<1x8xf32>
    %7 = vector.shape_cast %6 : vector<1x8xi1> to vector<1x8xi1>
    %8 = vector.broadcast %7 : vector<1x8xi1> to vector<8x8xi1>
    %c0_3 = arith.constant 0 : index
    %c0_4 = arith.constant 0 : index
    %c0_5 = arith.constant 0 : index
    %c0_6 = arith.constant 0 : index
    %9 = vector.load %arg3[%c0_3, %c0_4, %c0_5, %c0_6] : memref<1x8x4x8xbf16, #tpu.memory_space<vmem>>, vector<1x8x4x8xbf16>
    %10 = vector.shape_cast %9 : vector<1x8x4x8xbf16> to vector<8x4x8xbf16>
    %11 = arith.extf %10 : vector<8x4x8xbf16> to vector<8x4x8xf32>
    %cst_7 = arith.constant 0.353553385 : f32
    %12 = vector.broadcast %cst_7 : f32 to vector<8x4x8xf32>
    %13 = arith.mulf %11, %12 : vector<8x4x8xf32>
    %14 = arith.truncf %13 : vector<8x4x8xf32> to vector<8x4x8xbf16>
    %c0_8 = arith.constant 0 : index
    %c0_9 = arith.constant 0 : index
    %c0_10 = arith.constant 0 : index
    %c0_11 = arith.constant 0 : index
    %15 = vector.load %arg4[%c0_8, %c0_9, %c0_10, %c0_11] : memref<1x8x4x8xbf16, #tpu.memory_space<vmem>>, vector<1x8x4x8xbf16>
    %16 = vector.shape_cast %15 : vector<1x8x4x8xbf16> to vector<8x4x8xbf16>
    %c0_12 = arith.constant 0 : index
    %c0_13 = arith.constant 0 : index
    %c0_14 = arith.constant 0 : index
    %c0_15 = arith.constant 0 : index
    %17 = vector.load %arg5[%c0_12, %c0_13, %c0_14, %c0_15] : memref<1x8x4x8xbf16, #tpu.memory_space<vmem>>, vector<1x8x4x8xbf16>
    %18 = vector.shape_cast %17 : vector<1x8x4x8xbf16> to vector<8x4x8xbf16>
    %19 = vector.extract_strided_slice %14 {offsets = [0, 0, 0], sizes = [8, 1, 8], strides = [1, 1, 1]} : vector<8x4x8xbf16> to vector<8x1x8xbf16>
    %20 = vector.shape_cast %19 : vector<8x1x8xbf16> to vector<8x8xbf16>
    %21 = vector.extract_strided_slice %16 {offsets = [0, 0, 0], sizes = [8, 1, 8], strides = [1, 1, 1]} : vector<8x4x8xbf16> to vector<8x1x8xbf16>
    %22 = vector.shape_cast %21 : vector<8x1x8xbf16> to vector<8x8xbf16>
    %cst_16 = arith.constant dense<0.000000e+00> : vector<8x8xf32>
    %23 = tpu.matmul %20, %22, %cst_16 {dimension_numbers = #tpu.dot_dimension_numbers<[1], [1], [0], [0], [0, 0, 1, 0], [], []>} : vector<8x8xbf16>, vector<8x8xbf16>, vector<8x8xf32> -> vector<8x8xf32>
    %cst_17 = arith.constant -1.000000e+30 : f32
    %24 = vector.broadcast %cst_17 : f32 to vector<8x8xf32>
    %25 = arith.select %8, %24, %23 : vector<8x8xi1>, vector<8x8xf32>
    %c0_18 = arith.constant 0 : index
    %c0_19 = arith.constant 0 : index
    %c0_20 = arith.constant 0 : index
    %26 = vector.load %arg8[%c0_18, %c0_19, %c0_20] : memref<4x8x1xf32, #tpu.memory_space<vmem>>, vector<1x8x1xf32>
    %27 = vector.shape_cast %26 : vector<1x8x1xf32> to vector<8x1xf32>
    %cst_21 = arith.constant dense<0xFF800000> : vector<8xf32>
    %28 = vector.multi_reduction <maximumf>, %25, %cst_21 [1] : vector<8x8xf32> to vector<8xf32>
    %29 = vector.shape_cast %28 : vector<8xf32> to vector<8x1xf32>
    %30 = arith.maximumf %27, %29 : vector<8x1xf32>
    %31 = arith.subf %27, %30 : vector<8x1xf32>
    %32 = math.exp %31 : vector<8x1xf32>
    %33 = vector.broadcast %30 : vector<8x1xf32> to vector<8x8xf32>
    %34 = arith.subf %25, %33 : vector<8x8xf32>
    %35 = math.exp %34 : vector<8x8xf32>
    %c0_22 = arith.constant 0 : index
    %c0_23 = arith.constant 0 : index
    %c0_24 = arith.constant 0 : index
    %36 = vector.load %arg9[%c0_22, %c0_23, %c0_24] : memref<4x8x1xf32, #tpu.memory_space<vmem>>, vector<1x8x1xf32>
    %37 = vector.shape_cast %36 : vector<1x8x1xf32> to vector<8x1xf32>
    %38 = arith.mulf %32, %37 : vector<8x1xf32>
    %cst_25 = arith.constant dense<0.000000e+00> : vector<8xf32>
    %39 = vector.multi_reduction <add>, %35, %cst_25 [1] : vector<8x8xf32> to vector<8xf32>
    %40 = vector.shape_cast %39 : vector<8xf32> to vector<8x1xf32>
    %41 = arith.addf %38, %40 : vector<8x1xf32>
    %c0_26 = arith.constant 0 : index
    %c0_27 = arith.constant 0 : index
    %c0_28 = arith.constant 0 : index
    %42 = vector.load %arg9[%c0_26, %c0_27, %c0_28] : memref<4x8x1xf32, #tpu.memory_space<vmem>>, vector<1x8x1xf32>
    %43 = vector.shape_cast %42 : vector<1x8x1xf32> to vector<8x1xf32>
    %44 = vector.shape_cast %41 : vector<8x1xf32> to vector<1x8x1xf32>
    tpu.vector_store %arg9[%c0_26, %c0_27, %c0_28], %44 {strides = array<i32>} : memref<4x8x1xf32, #tpu.memory_space<vmem>>, vector<1x8x1xf32>,
    %c0_29 = arith.constant 0 : index
    %c0_30 = arith.constant 0 : index
    %c0_31 = arith.constant 0 : index
    %45 = vector.load %arg10[%c0_29, %c0_30, %c0_31] : memref<4x8x8xf32, #tpu.memory_space<vmem>>, vector<1x8x8xf32>
    %46 = vector.shape_cast %45 : vector<1x8x8xf32> to vector<8x8xf32>
    %47 = vector.broadcast %32 : vector<8x1xf32> to vector<8x8xf32>
    %48 = arith.mulf %47, %46 : vector<8x8xf32>
    %49 = arith.truncf %35 : vector<8x8xf32> to vector<8x8xbf16>
    %50 = vector.extract_strided_slice %18 {offsets = [0, 0, 0], sizes = [8, 1, 8], strides = [1, 1, 1]} : vector<8x4x8xbf16> to vector<8x1x8xbf16>
    %51 = vector.shape_cast %50 : vector<8x1x8xbf16> to vector<8x8xbf16>
    %cst_32 = arith.constant dense<0.000000e+00> : vector<8x8xf32>
    %52 = tpu.matmul %49, %51, %cst_32 {dimension_numbers = #tpu.dot_dimension_numbers<[1], [0], [0], [1], [0, 0, 1, 1], [], []>} : vector<8x8xbf16>, vector<8x8xbf16>, vector<8x8xf32> -> vector<8x8xf32>
    %53 = arith.addf %48, %52 : vector<8x8xf32>
    %c0_33 = arith.constant 0 : index
    %c0_34 = arith.constant 0 : index
    %c0_35 = arith.constant 0 : index
    %54 = vector.load %arg10[%c0_33, %c0_34, %c0_35] : memref<4x8x8xf32, #tpu.memory_space<vmem>>, vector<1x8x8xf32>
    %55 = vector.shape_cast %54 : vector<1x8x8xf32> to vector<8x8xf32>
    %56 = vector.shape_cast %53 : vector<8x8xf32> to vector<1x8x8xf32>
    tpu.vector_store %arg10[%c0_33, %c0_34, %c0_35], %56 {strides = array<i32>} : memref<4x8x8xf32, #tpu.memory_space<vmem>>, vector<1x8x8xf32>,
    %c0_36 = arith.constant 0 : index
    %c0_37 = arith.constant 0 : index
    %c0_38 = arith.constant 0 : index
    %57 = vector.load %arg8[%c0_36, %c0_37, %c0_38] : memref<4x8x1xf32, #tpu.memory_space<vmem>>, vector<1x8x1xf32>
    %58 = vector.shape_cast %57 : vector<1x8x1xf32> to vector<8x1xf32>
    %59 = vector.shape_cast %30 : vector<8x1xf32> to vector<1x8x1xf32>
    tpu.vector_store %arg8[%c0_36, %c0_37, %c0_38], %59 {strides = array<i32>} : memref<4x8x1xf32, #tpu.memory_space<vmem>>, vector<1x8x1xf32>,
    %60 = vector.extract_strided_slice %14 {offsets = [0, 1, 0], sizes = [8, 1, 8], strides = [1, 1, 1]} : vector<8x4x8xbf16> to vector<8x1x8xbf16>
    %61 = vector.shape_cast %60 : vector<8x1x8xbf16> to vector<8x8xbf16>
    %62 = vector.extract_strided_slice %16 {offsets = [0, 1, 0], sizes = [8, 1, 8], strides = [1, 1, 1]} : vector<8x4x8xbf16> to vector<8x1x8xbf16>
    %63 = vector.shape_cast %62 : vector<8x1x8xbf16> to vector<8x8xbf16>
    %cst_39 = arith.constant dense<0.000000e+00> : vector<8x8xf32>
    %64 = tpu.matmul %61, %63, %cst_39 {dimension_numbers = #tpu.dot_dimension_numbers<[1], [1], [0], [0], [0, 0, 1, 0], [], []>} : vector<8x8xbf16>, vector<8x8xbf16>, vector<8x8xf32> -> vector<8x8xf32>
    %cst_40 = arith.constant -1.000000e+30 : f32
    %65 = vector.broadcast %cst_40 : f32 to vector<8x8xf32>
    %66 = arith.select %8, %65, %64 : vector<8x8xi1>, vector<8x8xf32>
    %c1 = arith.constant 1 : index
    %c0_41 = arith.constant 0 : index
    %c0_42 = arith.constant 0 : index
    %67 = vector.load %arg8[%c1, %c0_41, %c0_42] : memref<4x8x1xf32, #tpu.memory_space<vmem>>, vector<1x8x1xf32>
    %68 = vector.shape_cast %67 : vector<1x8x1xf32> to vector<8x1xf32>
    %cst_43 = arith.constant dense<0xFF800000> : vector<8xf32>
    %69 = vector.multi_reduction <maximumf>, %66, %cst_43 [1] : vector<8x8xf32> to vector<8xf32>
    %70 = vector.shape_cast %69 : vector<8xf32> to vector<8x1xf32>
    %71 = arith.maximumf %68, %70 : vector<8x1xf32>
    %72 = arith.subf %68, %71 : vector<8x1xf32>
    %73 = math.exp %72 : vector<8x1xf32>
    %74 = vector.broadcast %71 : vector<8x1xf32> to vector<8x8xf32>
    %75 = arith.subf %66, %74 : vector<8x8xf32>
    %76 = math.exp %75 : vector<8x8xf32>
    %c1_44 = arith.constant 1 : index
    %c0_45 = arith.constant 0 : index
    %c0_46 = arith.constant 0 : index
    %77 = vector.load %arg9[%c1_44, %c0_45, %c0_46] : memref<4x8x1xf32, #tpu.memory_space<vmem>>, vector<1x8x1xf32>
    %78 = vector.shape_cast %77 : vector<1x8x1xf32> to vector<8x1xf32>
    %79 = arith.mulf %73, %78 : vector<8x1xf32>
    %cst_47 = arith.constant dense<0.000000e+00> : vector<8xf32>
    %80 = vector.multi_reduction <add>, %76, %cst_47 [1] : vector<8x8xf32> to vector<8xf32>
    %81 = vector.shape_cast %80 : vector<8xf32> to vector<8x1xf32>
    %82 = arith.addf %79, %81 : vector<8x1xf32>
    %c1_48 = arith.constant 1 : index
    %c0_49 = arith.constant 0 : index
    %c0_50 = arith.constant 0 : index
    %83 = vector.load %arg9[%c1_48, %c0_49, %c0_50] : memref<4x8x1xf32, #tpu.memory_space<vmem>>, vector<1x8x1xf32>
    %84 = vector.shape_cast %83 : vector<1x8x1xf32> to vector<8x1xf32>
    %85 = vector.shape_cast %82 : vector<8x1xf32> to vector<1x8x1xf32>
    tpu.vector_store %arg9[%c1_48, %c0_49, %c0_50], %85 {strides = array<i32>} : memref<4x8x1xf32, #tpu.memory_space<vmem>>, vector<1x8x1xf32>,
    %c1_51 = arith.constant 1 : index
    %c0_52 = arith.constant 0 : index
    %c0_53 = arith.constant 0 : index
    %86 = vector.load %arg10[%c1_51, %c0_52, %c0_53] : memref<4x8x8xf32, #tpu.memory_space<vmem>>, vector<1x8x8xf32>
    %87 = vector.shape_cast %86 : vector<1x8x8xf32> to vector<8x8xf32>
    %88 = vector.broadcast %73 : vector<8x1xf32> to vector<8x8xf32>
    %89 = arith.mulf %88, %87 : vector<8x8xf32>
    %90 = arith.truncf %76 : vector<8x8xf32> to vector<8x8xbf16>
    %91 = vector.extract_strided_slice %18 {offsets = [0, 1, 0], sizes = [8, 1, 8], strides = [1, 1, 1]} : vector<8x4x8xbf16> to vector<8x1x8xbf16>
    %92 = vector.shape_cast %91 : vector<8x1x8xbf16> to vector<8x8xbf16>
    %cst_54 = arith.constant dense<0.000000e+00> : vector<8x8xf32>
    %93 = tpu.matmul %90, %92, %cst_54 {dimension_numbers = #tpu.dot_dimension_numbers<[1], [0], [0], [1], [0, 0, 1, 1], [], []>} : vector<8x8xbf16>, vector<8x8xbf16>, vector<8x8xf32> -> vector<8x8xf32>
    %94 = arith.addf %89, %93 : vector<8x8xf32>
    %c1_55 = arith.constant 1 : index
    %c0_56 = arith.constant 0 : index
    %c0_57 = arith.constant 0 : index
    %95 = vector.load %arg10[%c1_55, %c0_56, %c0_57] : memref<4x8x8xf32, #tpu.memory_space<vmem>>, vector<1x8x8xf32>
    %96 = vector.shape_cast %95 : vector<1x8x8xf32> to vector<8x8xf32>
    %97 = vector.shape_cast %94 : vector<8x8xf32> to vector<1x8x8xf32>
    tpu.vector_store %arg10[%c1_55, %c0_56, %c0_57], %97 {strides = array<i32>} : memref<4x8x8xf32, #tpu.memory_space<vmem>>, vector<1x8x8xf32>,
    %c1_58 = arith.constant 1 : index
    %c0_59 = arith.constant 0 : index
    %c0_60 = arith.constant 0 : index
    %98 = vector.load %arg8[%c1_58, %c0_59, %c0_60] : memref<4x8x1xf32, #tpu.memory_space<vmem>>, vector<1x8x1xf32>
    %99 = vector.shape_cast %98 : vector<1x8x1xf32> to vector<8x1xf32>
    %100 = vector.shape_cast %71 : vector<8x1xf32> to vector<1x8x1xf32>
    tpu.vector_store %arg8[%c1_58, %c0_59, %c0_60], %100 {strides = array<i32>} : memref<4x8x1xf32, #tpu.memory_space<vmem>>, vector<1x8x1xf32>,
    %101 = vector.extract_strided_slice %14 {offsets = [0, 2, 0], sizes = [8, 1, 8], strides = [1, 1, 1]} : vector<8x4x8xbf16> to vector<8x1x8xbf16>
    %102 = vector.shape_cast %101 : vector<8x1x8xbf16> to vector<8x8xbf16>
    %103 = vector.extract_strided_slice %16 {offsets = [0, 2, 0], sizes = [8, 1, 8], strides = [1, 1, 1]} : vector<8x4x8xbf16> to vector<8x1x8xbf16>
    %104 = vector.shape_cast %103 : vector<8x1x8xbf16> to vector<8x8xbf16>
    %cst_61 = arith.constant dense<0.000000e+00> : vector<8x8xf32>
    %105 = tpu.matmul %102, %104, %cst_61 {dimension_numbers = #tpu.dot_dimension_numbers<[1], [1], [0], [0], [0, 0, 1, 0], [], []>} : vector<8x8xbf16>, vector<8x8xbf16>, vector<8x8xf32> -> vector<8x8xf32>
    %cst_62 = arith.constant -1.000000e+30 : f32
    %106 = vector.broadcast %cst_62 : f32 to vector<8x8xf32>
    %107 = arith.select %8, %106, %105 : vector<8x8xi1>, vector<8x8xf32>
    %c2 = arith.constant 2 : index
    %c0_63 = arith.constant 0 : index
    %c0_64 = arith.constant 0 : index
    %108 = vector.load %arg8[%c2, %c0_63, %c0_64] : memref<4x8x1xf32, #tpu.memory_space<vmem>>, vector<1x8x1xf32>
    %109 = vector.shape_cast %108 : vector<1x8x1xf32> to vector<8x1xf32>
    %cst_65 = arith.constant dense<0xFF800000> : vector<8xf32>
    %110 = vector.multi_reduction <maximumf>, %107, %cst_65 [1] : vector<8x8xf32> to vector<8xf32>
    %111 = vector.shape_cast %110 : vector<8xf32> to vector<8x1xf32>
    %112 = arith.maximumf %109, %111 : vector<8x1xf32>
    %113 = arith.subf %109, %112 : vector<8x1xf32>
    %114 = math.exp %113 : vector<8x1xf32>
    %115 = vector.broadcast %112 : vector<8x1xf32> to vector<8x8xf32>
    %116 = arith.subf %107, %115 : vector<8x8xf32>
    %117 = math.exp %116 : vector<8x8xf32>
    %c2_66 = arith.constant 2 : index
    %c0_67 = arith.constant 0 : index
    %c0_68 = arith.constant 0 : index
    %118 = vector.load %arg9[%c2_66, %c0_67, %c0_68] : memref<4x8x1xf32, #tpu.memory_space<vmem>>, vector<1x8x1xf32>
    %119 = vector.shape_cast %118 : vector<1x8x1xf32> to vector<8x1xf32>
    %120 = arith.mulf %114, %119 : vector<8x1xf32>
    %cst_69 = arith.constant dense<0.000000e+00> : vector<8xf32>
    %121 = vector.multi_reduction <add>, %117, %cst_69 [1] : vector<8x8xf32> to vector<8xf32>
    %122 = vector.shape_cast %121 : vector<8xf32> to vector<8x1xf32>
    %123 = arith.addf %120, %122 : vector<8x1xf32>
    %c2_70 = arith.constant 2 : index
    %c0_71 = arith.constant 0 : index
    %c0_72 = arith.constant 0 : index
    %124 = vector.load %arg9[%c2_70, %c0_71, %c0_72] : memref<4x8x1xf32, #tpu.memory_space<vmem>>, vector<1x8x1xf32>
    %125 = vector.shape_cast %124 : vector<1x8x1xf32> to vector<8x1xf32>
    %126 = vector.shape_cast %123 : vector<8x1xf32> to vector<1x8x1xf32>
    tpu.vector_store %arg9[%c2_70, %c0_71, %c0_72], %126 {strides = array<i32>} : memref<4x8x1xf32, #tpu.memory_space<vmem>>, vector<1x8x1xf32>,
    %c2_73 = arith.constant 2 : index
    %c0_74 = arith.constant 0 : index
    %c0_75 = arith.constant 0 : index
    %127 = vector.load %arg10[%c2_73, %c0_74, %c0_75] : memref<4x8x8xf32, #tpu.memory_space<vmem>>, vector<1x8x8xf32>
    %128 = vector.shape_cast %127 : vector<1x8x8xf32> to vector<8x8xf32>
    %129 = vector.broadcast %114 : vector<8x1xf32> to vector<8x8xf32>
    %130 = arith.mulf %129, %128 : vector<8x8xf32>
    %131 = arith.truncf %117 : vector<8x8xf32> to vector<8x8xbf16>
    %132 = vector.extract_strided_slice %18 {offsets = [0, 2, 0], sizes = [8, 1, 8], strides = [1, 1, 1]} : vector<8x4x8xbf16> to vector<8x1x8xbf16>
    %133 = vector.shape_cast %132 : vector<8x1x8xbf16> to vector<8x8xbf16>
    %cst_76 = arith.constant dense<0.000000e+00> : vector<8x8xf32>
    %134 = tpu.matmul %131, %133, %cst_76 {dimension_numbers = #tpu.dot_dimension_numbers<[1], [0], [0], [1], [0, 0, 1, 1], [], []>} : vector<8x8xbf16>, vector<8x8xbf16>, vector<8x8xf32> -> vector<8x8xf32>
    %135 = arith.addf %130, %134 : vector<8x8xf32>
    %c2_77 = arith.constant 2 : index
    %c0_78 = arith.constant 0 : index
    %c0_79 = arith.constant 0 : index
    %136 = vector.load %arg10[%c2_77, %c0_78, %c0_79] : memref<4x8x8xf32, #tpu.memory_space<vmem>>, vector<1x8x8xf32>
    %137 = vector.shape_cast %136 : vector<1x8x8xf32> to vector<8x8xf32>
    %138 = vector.shape_cast %135 : vector<8x8xf32> to vector<1x8x8xf32>
    tpu.vector_store %arg10[%c2_77, %c0_78, %c0_79], %138 {strides = array<i32>} : memref<4x8x8xf32, #tpu.memory_space<vmem>>, vector<1x8x8xf32>,
    %c2_80 = arith.constant 2 : index
    %c0_81 = arith.constant 0 : index
    %c0_82 = arith.constant 0 : index
    %139 = vector.load %arg8[%c2_80, %c0_81, %c0_82] : memref<4x8x1xf32, #tpu.memory_space<vmem>>, vector<1x8x1xf32>
    %140 = vector.shape_cast %139 : vector<1x8x1xf32> to vector<8x1xf32>
    %141 = vector.shape_cast %112 : vector<8x1xf32> to vector<1x8x1xf32>
    tpu.vector_store %arg8[%c2_80, %c0_81, %c0_82], %141 {strides = array<i32>} : memref<4x8x1xf32, #tpu.memory_space<vmem>>, vector<1x8x1xf32>,
    %142 = vector.extract_strided_slice %14 {offsets = [0, 3, 0], sizes = [8, 1, 8], strides = [1, 1, 1]} : vector<8x4x8xbf16> to vector<8x1x8xbf16>
    %143 = vector.shape_cast %142 : vector<8x1x8xbf16> to vector<8x8xbf16>
    %144 = vector.extract_strided_slice %16 {offsets = [0, 3, 0], sizes = [8, 1, 8], strides = [1, 1, 1]} : vector<8x4x8xbf16> to vector<8x1x8xbf16>
    %145 = vector.shape_cast %144 : vector<8x1x8xbf16> to vector<8x8xbf16>
    %cst_83 = arith.constant dense<0.000000e+00> : vector<8x8xf32>
    %146 = tpu.matmul %143, %145, %cst_83 {dimension_numbers = #tpu.dot_dimension_numbers<[1], [1], [0], [0], [0, 0, 1, 0], [], []>} : vector<8x8xbf16>, vector<8x8xbf16>, vector<8x8xf32> -> vector<8x8xf32>
    %cst_84 = arith.constant -1.000000e+30 : f32
    %147 = vector.broadcast %cst_84 : f32 to vector<8x8xf32>
    %148 = arith.select %8, %147, %146 : vector<8x8xi1>, vector<8x8xf32>
    %c3 = arith.constant 3 : index
    %c0_85 = arith.constant 0 : index
    %c0_86 = arith.constant 0 : index
    %149 = vector.load %arg8[%c3, %c0_85, %c0_86] : memref<4x8x1xf32, #tpu.memory_space<vmem>>, vector<1x8x1xf32>
    %150 = vector.shape_cast %149 : vector<1x8x1xf32> to vector<8x1xf32>
    %cst_87 = arith.constant dense<0xFF800000> : vector<8xf32>
    %151 = vector.multi_reduction <maximumf>, %148, %cst_87 [1] : vector<8x8xf32> to vector<8xf32>
    %152 = vector.shape_cast %151 : vector<8xf32> to vector<8x1xf32>
    %153 = arith.maximumf %150, %152 : vector<8x1xf32>
    %154 = arith.subf %150, %153 : vector<8x1xf32>
    %155 = math.exp %154 : vector<8x1xf32>
    %156 = vector.broadcast %153 : vector<8x1xf32> to vector<8x8xf32>
    %157 = arith.subf %148, %156 : vector<8x8xf32>
    %158 = math.exp %157 : vector<8x8xf32>
    %c3_88 = arith.constant 3 : index
    %c0_89 = arith.constant 0 : index
    %c0_90 = arith.constant 0 : index
    %159 = vector.load %arg9[%c3_88, %c0_89, %c0_90] : memref<4x8x1xf32, #tpu.memory_space<vmem>>, vector<1x8x1xf32>
    %160 = vector.shape_cast %159 : vector<1x8x1xf32> to vector<8x1xf32>
    %161 = arith.mulf %155, %160 : vector<8x1xf32>
    %cst_91 = arith.constant dense<0.000000e+00> : vector<8xf32>
    %162 = vector.multi_reduction <add>, %158, %cst_91 [1] : vector<8x8xf32> to vector<8xf32>
    %163 = vector.shape_cast %162 : vector<8xf32> to vector<8x1xf32>
    %164 = arith.addf %161, %163 : vector<8x1xf32>
    %c3_92 = arith.constant 3 : index
    %c0_93 = arith.constant 0 : index
    %c0_94 = arith.constant 0 : index
    %165 = vector.load %arg9[%c3_92, %c0_93, %c0_94] : memref<4x8x1xf32, #tpu.memory_space<vmem>>, vector<1x8x1xf32>
    %166 = vector.shape_cast %165 : vector<1x8x1xf32> to vector<8x1xf32>
    %167 = vector.shape_cast %164 : vector<8x1xf32> to vector<1x8x1xf32>
    tpu.vector_store %arg9[%c3_92, %c0_93, %c0_94], %167 {strides = array<i32>} : memref<4x8x1xf32, #tpu.memory_space<vmem>>, vector<1x8x1xf32>,
    %c3_95 = arith.constant 3 : index
    %c0_96 = arith.constant 0 : index
    %c0_97 = arith.constant 0 : index
    %168 = vector.load %arg10[%c3_95, %c0_96, %c0_97] : memref<4x8x8xf32, #tpu.memory_space<vmem>>, vector<1x8x8xf32>
    %169 = vector.shape_cast %168 : vector<1x8x8xf32> to vector<8x8xf32>
    %170 = vector.broadcast %155 : vector<8x1xf32> to vector<8x8xf32>
    %171 = arith.mulf %170, %169 : vector<8x8xf32>
    %172 = arith.truncf %158 : vector<8x8xf32> to vector<8x8xbf16>
    %173 = vector.extract_strided_slice %18 {offsets = [0, 3, 0], sizes = [8, 1, 8], strides = [1, 1, 1]} : vector<8x4x8xbf16> to vector<8x1x8xbf16>
    %174 = vector.shape_cast %173 : vector<8x1x8xbf16> to vector<8x8xbf16>
    %cst_98 = arith.constant dense<0.000000e+00> : vector<8x8xf32>
    %175 = tpu.matmul %172, %174, %cst_98 {dimension_numbers = #tpu.dot_dimension_numbers<[1], [0], [0], [1], [0, 0, 1, 1], [], []>} : vector<8x8xbf16>, vector<8x8xbf16>, vector<8x8xf32> -> vector<8x8xf32>
    %176 = arith.addf %171, %175 : vector<8x8xf32>
    %c3_99 = arith.constant 3 : index
    %c0_100 = arith.constant 0 : index
    %c0_101 = arith.constant 0 : index
    %177 = vector.load %arg10[%c3_99, %c0_100, %c0_101] : memref<4x8x8xf32, #tpu.memory_space<vmem>>, vector<1x8x8xf32>
    %178 = vector.shape_cast %177 : vector<1x8x8xf32> to vector<8x8xf32>
    %179 = vector.shape_cast %176 : vector<8x8xf32> to vector<1x8x8xf32>
    tpu.vector_store %arg10[%c3_99, %c0_100, %c0_101], %179 {strides = array<i32>} : memref<4x8x8xf32, #tpu.memory_space<vmem>>, vector<1x8x8xf32>,
    %c3_102 = arith.constant 3 : index
    %c0_103 = arith.constant 0 : index
    %c0_104 = arith.constant 0 : index
    %180 = vector.load %arg8[%c3_102, %c0_103, %c0_104] : memref<4x8x1xf32, #tpu.memory_space<vmem>>, vector<1x8x1xf32>
    %181 = vector.shape_cast %180 : vector<1x8x1xf32> to vector<8x1xf32>
    %182 = vector.shape_cast %153 : vector<8x1xf32> to vector<1x8x1xf32>
    tpu.vector_store %arg8[%c3_102, %c0_103, %c0_104], %182 {strides = array<i32>} : memref<4x8x1xf32, #tpu.memory_space<vmem>>, vector<1x8x1xf32>,
    %c0_i32_105 = arith.constant 0 : i32
    %183 = arith.cmpi eq, %arg2, %c0_i32_105 : i32
    %184 = arith.extui %183 : i1 to i32
    %c0_i32_106 = arith.constant 0 : i32
    %185 = arith.cmpi ne, %184, %c0_i32_106 : i32
    scf.if %185 {
      %c0_107 = arith.constant 0 : index
      %c0_108 = arith.constant 0 : index
      %c0_109 = arith.constant 0 : index
      %186 = vector.load %arg9[%c0_107, %c0_108, %c0_109] : memref<4x8x1xf32, #tpu.memory_space<vmem>>, vector<1x8x1xf32>
      %187 = vector.shape_cast %186 : vector<1x8x1xf32> to vector<8x1xf32>
      %188 = tpu.reciprocal %187 {approx = true} : vector<8x1xf32> -> vector<8x1xf32>
      %c0_110 = arith.constant 0 : index
      %c0_111 = arith.constant 0 : index
      %c0_112 = arith.constant 0 : index
      %189 = vector.load %arg10[%c0_110, %c0_111, %c0_112] : memref<4x8x8xf32, #tpu.memory_space<vmem>>, vector<1x8x8xf32>
      %190 = vector.shape_cast %189 : vector<1x8x8xf32> to vector<8x8xf32>
      %191 = vector.broadcast %188 : vector<8x1xf32> to vector<8x8xf32>
      %192 = arith.mulf %190, %191 : vector<8x8xf32>
      %193 = arith.truncf %192 : vector<8x8xf32> to vector<8x8xbf16>
      %c1_113 = arith.constant 1 : index
      %c0_114 = arith.constant 0 : index
      %c0_115 = arith.constant 0 : index
      %194 = vector.load %arg9[%c1_113, %c0_114, %c0_115] : memref<4x8x1xf32, #tpu.memory_space<vmem>>, vector<1x8x1xf32>
      %195 = vector.shape_cast %194 : vector<1x8x1xf32> to vector<8x1xf32>
      %196 = tpu.reciprocal %195 {approx = true} : vector<8x1xf32> -> vector<8x1xf32>
      %c1_116 = arith.constant 1 : index
      %c0_117 = arith.constant 0 : index
      %c0_118 = arith.constant 0 : index
      %197 = vector.load %arg10[%c1_116, %c0_117, %c0_118] : memref<4x8x8xf32, #tpu.memory_space<vmem>>, vector<1x8x8xf32>
      %198 = vector.shape_cast %197 : vector<1x8x8xf32> to vector<8x8xf32>
      %199 = vector.broadcast %196 : vector<8x1xf32> to vector<8x8xf32>
      %200 = arith.mulf %198, %199 : vector<8x8xf32>
      %201 = arith.truncf %200 : vector<8x8xf32> to vector<8x8xbf16>
      %c2_119 = arith.constant 2 : index
      %c0_120 = arith.constant 0 : index
      %c0_121 = arith.constant 0 : index
      %202 = vector.load %arg9[%c2_119, %c0_120, %c0_121] : memref<4x8x1xf32, #tpu.memory_space<vmem>>, vector<1x8x1xf32>
      %203 = vector.shape_cast %202 : vector<1x8x1xf32> to vector<8x1xf32>
      %204 = tpu.reciprocal %203 {approx = true} : vector<8x1xf32> -> vector<8x1xf32>
      %c2_122 = arith.constant 2 : index
      %c0_123 = arith.constant 0 : index
      %c0_124 = arith.constant 0 : index
      %205 = vector.load %arg10[%c2_122, %c0_123, %c0_124] : memref<4x8x8xf32, #tpu.memory_space<vmem>>, vector<1x8x8xf32>
      %206 = vector.shape_cast %205 : vector<1x8x8xf32> to vector<8x8xf32>
      %207 = vector.broadcast %204 : vector<8x1xf32> to vector<8x8xf32>
      %208 = arith.mulf %206, %207 : vector<8x8xf32>
      %209 = arith.truncf %208 : vector<8x8xf32> to vector<8x8xbf16>
      %c3_125 = arith.constant 3 : index
      %c0_126 = arith.constant 0 : index
      %c0_127 = arith.constant 0 : index
      %210 = vector.load %arg9[%c3_125, %c0_126, %c0_127] : memref<4x8x1xf32, #tpu.memory_space<vmem>>, vector<1x8x1xf32>
      %211 = vector.shape_cast %210 : vector<1x8x1xf32> to vector<8x1xf32>
      %212 = tpu.reciprocal %211 {approx = true} : vector<8x1xf32> -> vector<8x1xf32>
      %c3_128 = arith.constant 3 : index
      %c0_129 = arith.constant 0 : index
      %c0_130 = arith.constant 0 : index
      %213 = vector.load %arg10[%c3_128, %c0_129, %c0_130] : memref<4x8x8xf32, #tpu.memory_space<vmem>>, vector<1x8x8xf32>
      %214 = vector.shape_cast %213 : vector<1x8x8xf32> to vector<8x8xf32>
      %215 = vector.broadcast %212 : vector<8x1xf32> to vector<8x8xf32>
      %216 = arith.mulf %214, %215 : vector<8x8xf32>
      %217 = arith.truncf %216 : vector<8x8xf32> to vector<8x8xbf16>
      %218 = tpu.concatenate %193, %201, %209, %217 in 1 : vector<8x8xbf16>, vector<8x8xbf16>, vector<8x8xbf16>, vector<8x8xbf16> -> vector<8x32xbf16>
      %c0_131 = arith.constant 0 : index
      %c0_132 = arith.constant 0 : index
      %c0_133 = arith.constant 0 : index
      %219 = vector.load %arg7[%c0_131, %c0_132, %c0_133] : memref<1x8x32xbf16, #tpu.memory_space<vmem>>, vector<1x8x32xbf16>
      %220 = vector.shape_cast %219 : vector<1x8x32xbf16> to vector<8x32xbf16>
      %221 = vector.shape_cast %218 : vector<8x32xbf16> to vector<1x8x32xbf16>
      tpu.vector_store %arg7[%c0_131, %c0_132, %c0_133], %221 {strides = array<i32>} : memref<1x8x32xbf16, #tpu.memory_space<vmem>>, vector<1x8x32xbf16>,
    } else {
    }
    return
  }
  func.func @transform_0(%arg0: i32, %arg1: i32, %arg2: i32) -> (i32, i32, i32, i32) {
    %c0_i32 = arith.constant 0 : i32
    %c0_i32_0 = arith.constant 0 : i32
    %c0_i32_1 = arith.constant 0 : i32
    return %arg0, %arg1, %c0_i32, %c0_i32_0 : i32, i32, i32, i32
  }
  func.func @transform_1(%arg0: i32, %arg1: i32, %arg2: i32) -> (i32, i32, i32, i32) {
    %c0_i32 = arith.constant 0 : i32
    %c0_i32_0 = arith.constant 0 : i32
    %c0_i32_1 = arith.constant 0 : i32
    return %arg0, %arg2, %c0_i32, %c0_i32_0 : i32, i32, i32, i32
  }
  func.func @transform_2(%arg0: i32, %arg1: i32, %arg2: i32) -> (i32, i32, i32, i32) {
    %c0_i32 = arith.constant 0 : i32
    %c0_i32_0 = arith.constant 0 : i32
    %c0_i32_1 = arith.constant 0 : i32
    return %arg0, %arg2, %c0_i32, %c0_i32_0 : i32, i32, i32, i32
  }
  func.func @transform_3(%arg0: i32, %arg1: i32, %arg2: i32) -> (i32, i32, i32) {
    %c0_i32 = arith.constant 0 : i32
    %c0_i32_0 = arith.constant 0 : i32
    return %arg0, %c0_i32, %arg2 : i32, i32, i32
  }
  func.func @transform_4(%arg0: i32, %arg1: i32, %arg2: i32) -> (i32, i32, i32) {
    %c0_i32 = arith.constant 0 : i32
    %c0_i32_0 = arith.constant 0 : i32
    return %arg0, %arg1, %c0_i32 : i32, i32, i32
  }
}

module attributes {stable_mosaic.version = 11 : i64} {
  func.func @_ffn_kernel(%arg0: i32, %arg1: memref<16x32xbf16, #tpu.memory_space<vmem>>, %arg2: memref<32x64xbf16, #tpu.memory_space<vmem>>, %arg3: memref<1x64xf32, #tpu.memory_space<vmem>>, %arg4: memref<64x32xbf16, #tpu.memory_space<vmem>>, %arg5: memref<1x32xf32, #tpu.memory_space<vmem>>, %arg6: memref<16x32xbf16, #tpu.memory_space<vmem>>, %arg7: memref<1x32xf32, #tpu.memory_space<vmem>>, %arg8: memref<1x32xf32, #tpu.memory_space<vmem>>, %arg9: memref<16x32xbf16, #tpu.memory_space<vmem>>) attributes {dimension_semantics = [#tpu.dimension_semantics<parallel>], iteration_bounds = array<i64: 1>, scalar_prefetch = 0 : i64, scratch_operands = 0 : i64, tpu.core_type = #tpu.core_type<tc>, window_params = [{transform_indices = @transform_0, window_bounds = array<i64: 16, 32>}, {pipeline_mode = #tpu.pipeline_mode<synchronous>, transform_indices = @transform_1, window_bounds = array<i64: 32, 64>}, {pipeline_mode = #tpu.pipeline_mode<synchronous>, transform_indices = @transform_2, window_bounds = array<i64: 1, 64>}, {pipeline_mode = #tpu.pipeline_mode<synchronous>, transform_indices = @transform_3, window_bounds = array<i64: 64, 32>}, {pipeline_mode = #tpu.pipeline_mode<synchronous>, transform_indices = @transform_4, window_bounds = array<i64: 1, 32>}, {transform_indices = @transform_5, window_bounds = array<i64: 16, 32>}, {pipeline_mode = #tpu.pipeline_mode<synchronous>, transform_indices = @transform_6, window_bounds = array<i64: 1, 32>}, {pipeline_mode = #tpu.pipeline_mode<synchronous>, transform_indices = @transform_7, window_bounds = array<i64: 1, 32>}, {transform_indices = @transform_8, window_bounds = array<i64: 16, 32>}]} {
    %c0 = arith.constant 0 : index
    %c0_0 = arith.constant 0 : index
    %0 = vector.load %arg1[%c0, %c0_0] : memref<16x32xbf16, #tpu.memory_space<vmem>>, vector<16x32xbf16>
    %c0_1 = arith.constant 0 : index
    %c0_2 = arith.constant 0 : index
    %1 = vector.load %arg2[%c0_1, %c0_2] : memref<32x64xbf16, #tpu.memory_space<vmem>>, vector<32x64xbf16>
    %cst = arith.constant dense<0.000000e+00> : vector<16x64xf32>
    %2 = tpu.matmul %0, %1, %cst {dimension_numbers = #tpu.dot_dimension_numbers<[1], [0], [0], [1], [0, 0, 1, 1], [], []>} : vector<16x32xbf16>, vector<32x64xbf16>, vector<16x64xf32> -> vector<16x64xf32>
    %c0_3 = arith.constant 0 : index
    %c0_4 = arith.constant 0 : index
    %3 = vector.load %arg3[%c0_3, %c0_4] : memref<1x64xf32, #tpu.memory_space<vmem>>, vector<1x64xf32>
    %4 = vector.broadcast %3 : vector<1x64xf32> to vector<16x64xf32>
    %5 = arith.addf %2, %4 : vector<16x64xf32>
    %6 = arith.truncf %5 : vector<16x64xf32> to vector<16x64xbf16>
    %c0_5 = arith.constant 0 : index
    %c0_6 = arith.constant 0 : index
    %7 = vector.load %arg4[%c0_5, %c0_6] : memref<64x32xbf16, #tpu.memory_space<vmem>>, vector<64x32xbf16>
    %cst_7 = arith.constant dense<0.000000e+00> : vector<16x32xf32>
    %8 = tpu.matmul %6, %7, %cst_7 {dimension_numbers = #tpu.dot_dimension_numbers<[1], [0], [0], [1], [0, 0, 1, 1], [], []>} : vector<16x64xbf16>, vector<64x32xbf16>, vector<16x32xf32> -> vector<16x32xf32>
    %c0_8 = arith.constant 0 : index
    %c0_9 = arith.constant 0 : index
    %9 = vector.load %arg5[%c0_8, %c0_9] : memref<1x32xf32, #tpu.memory_space<vmem>>, vector<1x32xf32>
    %10 = vector.broadcast %9 : vector<1x32xf32> to vector<16x32xf32>
    %11 = arith.addf %8, %10 : vector<16x32xf32>
    %cst_10 = arith.constant 0.000000e+00 : f32
    %12 = vector.broadcast %cst_10 : f32 to vector<16x32xf32>
    %13 = arith.maximumf %11, %12 : vector<16x32xf32>
    %c0_11 = arith.constant 0 : index
    %c0_12 = arith.constant 0 : index
    %14 = vector.load %arg6[%c0_11, %c0_12] : memref<16x32xbf16, #tpu.memory_space<vmem>>, vector<16x32xbf16>
    %15 = arith.extf %14 : vector<16x32xbf16> to vector<16x32xf32>
    %16 = arith.addf %13, %15 : vector<16x32xf32>
    %cst_13 = arith.constant dense<0.000000e+00> : vector<16xf32>
    %17 = vector.multi_reduction <add>, %16, %cst_13 [1] : vector<16x32xf32> to vector<16xf32>
    %18 = vector.shape_cast %17 : vector<16xf32> to vector<16x1xf32>
    %cst_14 = arith.constant 3.200000e+01 : f32
    %19 = vector.broadcast %cst_14 : f32 to vector<16x1xf32>
    %20 = arith.divf %18, %19 : vector<16x1xf32>
    %21 = vector.broadcast %20 : vector<16x1xf32> to vector<16x32xf32>
    %22 = arith.subf %16, %21 : vector<16x32xf32>
    %23 = arith.mulf %22, %22 : vector<16x32xf32>
    %cst_15 = arith.constant dense<0.000000e+00> : vector<16xf32>
    %24 = vector.multi_reduction <add>, %23, %cst_15 [1] : vector<16x32xf32> to vector<16xf32>
    %25 = vector.shape_cast %24 : vector<16xf32> to vector<16x1xf32>
    %cst_16 = arith.constant 3.200000e+01 : f32
    %26 = vector.broadcast %cst_16 : f32 to vector<16x1xf32>
    %27 = arith.divf %25, %26 : vector<16x1xf32>
    %28 = vector.broadcast %20 : vector<16x1xf32> to vector<16x32xf32>
    %29 = arith.subf %16, %28 : vector<16x32xf32>
    %cst_17 = arith.constant 9.99999974E-6 : f32
    %30 = vector.broadcast %cst_17 : f32 to vector<16x1xf32>
    %31 = arith.addf %27, %30 : vector<16x1xf32>
    %32 = math.rsqrt %31 : vector<16x1xf32>
    %33 = vector.broadcast %32 : vector<16x1xf32> to vector<16x32xf32>
    %34 = arith.mulf %29, %33 : vector<16x32xf32>
    %c0_18 = arith.constant 0 : index
    %c0_19 = arith.constant 0 : index
    %35 = vector.load %arg7[%c0_18, %c0_19] : memref<1x32xf32, #tpu.memory_space<vmem>>, vector<1x32xf32>
    %36 = vector.broadcast %35 : vector<1x32xf32> to vector<16x32xf32>
    %37 = arith.mulf %34, %36 : vector<16x32xf32>
    %c0_20 = arith.constant 0 : index
    %c0_21 = arith.constant 0 : index
    %38 = vector.load %arg8[%c0_20, %c0_21] : memref<1x32xf32, #tpu.memory_space<vmem>>, vector<1x32xf32>
    %39 = vector.broadcast %38 : vector<1x32xf32> to vector<16x32xf32>
    %40 = arith.addf %37, %39 : vector<16x32xf32>
    %41 = arith.truncf %40 : vector<16x32xf32> to vector<16x32xbf16>
    %c0_22 = arith.constant 0 : index
    %c0_23 = arith.constant 0 : index
    %42 = vector.load %arg9[%c0_22, %c0_23] : memref<16x32xbf16, #tpu.memory_space<vmem>>, vector<16x32xbf16>
    tpu.vector_store %arg9[%c0_22, %c0_23], %41 {strides = array<i32>} : memref<16x32xbf16, #tpu.memory_space<vmem>>, vector<16x32xbf16>,
    return
  }
  func.func @transform_0(%arg0: i32) -> (i32, i32) {
    %c0_i32 = arith.constant 0 : i32
    %c0_i32_0 = arith.constant 0 : i32
    return %arg0, %c0_i32 : i32, i32
  }
  func.func @transform_1(%arg0: i32) -> (i32, i32) {
    %c0_i32 = arith.constant 0 : i32
    %c0_i32_0 = arith.constant 0 : i32
    %c0_i32_1 = arith.constant 0 : i32
    return %c0_i32, %c0_i32_0 : i32, i32
  }
  func.func @transform_2(%arg0: i32) -> (i32, i32) {
    %c0_i32 = arith.constant 0 : i32
    %c0_i32_0 = arith.constant 0 : i32
    %c0_i32_1 = arith.constant 0 : i32
    return %c0_i32, %c0_i32_0 : i32, i32
  }
  func.func @transform_3(%arg0: i32) -> (i32, i32) {
    %c0_i32 = arith.constant 0 : i32
    %c0_i32_0 = arith.constant 0 : i32
    %c0_i32_1 = arith.constant 0 : i32
    return %c0_i32, %c0_i32_0 : i32, i32
  }
  func.func @transform_4(%arg0: i32) -> (i32, i32) {
    %c0_i32 = arith.constant 0 : i32
    %c0_i32_0 = arith.constant 0 : i32
    %c0_i32_1 = arith.constant 0 : i32
    return %c0_i32, %c0_i32_0 : i32, i32
  }
  func.func @transform_5(%arg0: i32) -> (i32, i32) {
    %c0_i32 = arith.constant 0 : i32
    %c0_i32_0 = arith.constant 0 : i32
    return %arg0, %c0_i32 : i32, i32
  }
  func.func @transform_6(%arg0: i32) -> (i32, i32) {
    %c0_i32 = arith.constant 0 : i32
    %c0_i32_0 = arith.constant 0 : i32
    %c0_i32_1 = arith.constant 0 : i32
    return %c0_i32, %c0_i32_0 : i32, i32
  }
  func.func @transform_7(%arg0: i32) -> (i32, i32) {
    %c0_i32 = arith.constant 0 : i32
    %c0_i32_0 = arith.constant 0 : i32
    %c0_i32_1 = arith.constant 0 : i32
    return %c0_i32, %c0_i32_0 : i32, i32
  }
  func.func @transform_8(%arg0: i32) -> (i32, i32) {
    %c0_i32 = arith.constant 0 : i32
    %c0_i32_0 = arith.constant 0 : i32
    return %arg0, %c0_i32 : i32, i32
  }
}

module attributes {stable_mosaic.version = 11 : i64} {
  func.func @_linear_kernel(%arg0: i32, %arg1: i32, %arg2: i32, %arg3: memref<16x32xbf16, #tpu.memory_space<vmem>>, %arg4: memref<32x64xbf16, #tpu.memory_space<vmem>>, %arg5: memref<1x64xf32, #tpu.memory_space<vmem>>, %arg6: memref<16x64xbf16, #tpu.memory_space<vmem>>, %arg7: memref<16x64xf32, #tpu.memory_space<vmem>>) attributes {dimension_semantics = [#tpu.dimension_semantics<parallel>, #tpu.dimension_semantics<parallel>, #tpu.dimension_semantics<arbitrary>], iteration_bounds = array<i64: 1, 1, 1>, scalar_prefetch = 0 : i64, scratch_operands = 1 : i64, tpu.core_type = #tpu.core_type<tc>, window_params = [{transform_indices = @transform_0, window_bounds = array<i64: 16, 32>}, {transform_indices = @transform_1, window_bounds = array<i64: 32, 64>}, {transform_indices = @transform_2, window_bounds = array<i64: 1, 64>}, {transform_indices = @transform_3, window_bounds = array<i64: 16, 64>}]} {
    %c0_i32 = arith.constant 0 : i32
    %0 = arith.cmpi eq, %arg2, %c0_i32 : i32
    %1 = arith.extui %0 : i1 to i32
    %c0_i32_0 = arith.constant 0 : i32
    %2 = arith.cmpi ne, %1, %c0_i32_0 : i32
    scf.if %2 {
      %cst_10 = arith.constant 0.000000e+00 : f32
      %12 = vector.broadcast %cst_10 : f32 to vector<16x64xf32>
      %c0_11 = arith.constant 0 : index
      %c0_12 = arith.constant 0 : index
      %13 = vector.load %arg7[%c0_11, %c0_12] : memref<16x64xf32, #tpu.memory_space<vmem>>, vector<16x64xf32>
      tpu.vector_store %arg7[%c0_11, %c0_12], %12 {strides = array<i32>} : memref<16x64xf32, #tpu.memory_space<vmem>>, vector<16x64xf32>,
    } else {
    }
    %c0 = arith.constant 0 : index
    %c0_1 = arith.constant 0 : index
    %3 = vector.load %arg7[%c0, %c0_1] : memref<16x64xf32, #tpu.memory_space<vmem>>, vector<16x64xf32>
    %c0_2 = arith.constant 0 : index
    %c0_3 = arith.constant 0 : index
    %4 = vector.load %arg3[%c0_2, %c0_3] : memref<16x32xbf16, #tpu.memory_space<vmem>>, vector<16x32xbf16>
    %c0_4 = arith.constant 0 : index
    %c0_5 = arith.constant 0 : index
    %5 = vector.load %arg4[%c0_4, %c0_5] : memref<32x64xbf16, #tpu.memory_space<vmem>>, vector<32x64xbf16>
    %cst = arith.constant dense<0.000000e+00> : vector<16x64xf32>
    %6 = tpu.matmul %4, %5, %cst {dimension_numbers = #tpu.dot_dimension_numbers<[1], [0], [0], [1], [0, 0, 1, 1], [], []>} : vector<16x32xbf16>, vector<32x64xbf16>, vector<16x64xf32> -> vector<16x64xf32>
    %7 = arith.addf %3, %6 : vector<16x64xf32>
    %c0_6 = arith.constant 0 : index
    %c0_7 = arith.constant 0 : index
    %8 = vector.load %arg7[%c0_6, %c0_7] : memref<16x64xf32, #tpu.memory_space<vmem>>, vector<16x64xf32>
    tpu.vector_store %arg7[%c0_6, %c0_7], %7 {strides = array<i32>} : memref<16x64xf32, #tpu.memory_space<vmem>>, vector<16x64xf32>,
    %c0_i32_8 = arith.constant 0 : i32
    %9 = arith.cmpi eq, %arg2, %c0_i32_8 : i32
    %10 = arith.extui %9 : i1 to i32
    %c0_i32_9 = arith.constant 0 : i32
    %11 = arith.cmpi ne, %10, %c0_i32_9 : i32
    scf.if %11 {
      %c0_10 = arith.constant 0 : index
      %c0_11 = arith.constant 0 : index
      %12 = vector.load %arg7[%c0_10, %c0_11] : memref<16x64xf32, #tpu.memory_space<vmem>>, vector<16x64xf32>
      %c0_12 = arith.constant 0 : index
      %c0_13 = arith.constant 0 : index
      %13 = vector.load %arg5[%c0_12, %c0_13] : memref<1x64xf32, #tpu.memory_space<vmem>>, vector<1x64xf32>
      %14 = vector.broadcast %13 : vector<1x64xf32> to vector<16x64xf32>
      %15 = arith.addf %12, %14 : vector<16x64xf32>
      %16 = arith.truncf %15 : vector<16x64xf32> to vector<16x64xbf16>
      %c0_14 = arith.constant 0 : index
      %c0_15 = arith.constant 0 : index
      %17 = vector.load %arg6[%c0_14, %c0_15] : memref<16x64xbf16, #tpu.memory_space<vmem>>, vector<16x64xbf16>
      tpu.vector_store %arg6[%c0_14, %c0_15], %16 {strides = array<i32>} : memref<16x64xbf16, #tpu.memory_space<vmem>>, vector<16x64xbf16>,
    } else {
    }
    return
  }
  func.func @transform_0(%arg0: i32, %arg1: i32, %arg2: i32) -> (i32, i32) {
    %c0_i32 = arith.constant 0 : i32
    return %arg0, %arg2 : i32, i32
  }
  func.func @transform_1(%arg0: i32, %arg1: i32, %arg2: i32) -> (i32, i32) {
    %c0_i32 = arith.constant 0 : i32
    return %arg2, %arg1 : i32, i32
  }
  func.func @transform_2(%arg0: i32, %arg1: i32, %arg2: i32) -> (i32, i32) {
    %c0_i32 = arith.constant 0 : i32
    %c0_i32_0 = arith.constant 0 : i32
    return %c0_i32, %arg1 : i32, i32
  }
  func.func @transform_3(%arg0: i32, %arg1: i32, %arg2: i32) -> (i32, i32) {
    %c0_i32 = arith.constant 0 : i32
    return %arg0, %arg1 : i32, i32
  }
}

module attributes {stable_mosaic.version = 11 : i64} {
  func.func @_linear_kernel(%arg0: i32, %arg1: i32, %arg2: i32, %arg3: memref<16x32xbf16, #tpu.memory_space<vmem>>, %arg4: memref<32x24xbf16, #tpu.memory_space<vmem>>, %arg5: memref<1x24xf32, #tpu.memory_space<vmem>>, %arg6: memref<16x24xf32, #tpu.memory_space<vmem>>, %arg7: memref<16x24xf32, #tpu.memory_space<vmem>>) attributes {dimension_semantics = [#tpu.dimension_semantics<parallel>, #tpu.dimension_semantics<parallel>, #tpu.dimension_semantics<arbitrary>], iteration_bounds = array<i64: 1, 1, 1>, scalar_prefetch = 0 : i64, scratch_operands = 1 : i64, tpu.core_type = #tpu.core_type<tc>, window_params = [{transform_indices = @transform_0, window_bounds = array<i64: 16, 32>}, {transform_indices = @transform_1, window_bounds = array<i64: 32, 24>}, {transform_indices = @transform_2, window_bounds = array<i64: 1, 24>}, {transform_indices = @transform_3, window_bounds = array<i64: 16, 24>}]} {
    %c0_i32 = arith.constant 0 : i32
    %0 = arith.cmpi eq, %arg2, %c0_i32 : i32
    %1 = arith.extui %0 : i1 to i32
    %c0_i32_0 = arith.constant 0 : i32
    %2 = arith.cmpi ne, %1, %c0_i32_0 : i32
    scf.if %2 {
      %cst_10 = arith.constant 0.000000e+00 : f32
      %12 = vector.broadcast %cst_10 : f32 to vector<16x24xf32>
      %c0_11 = arith.constant 0 : index
      %c0_12 = arith.constant 0 : index
      %13 = vector.load %arg7[%c0_11, %c0_12] : memref<16x24xf32, #tpu.memory_space<vmem>>, vector<16x24xf32>
      tpu.vector_store %arg7[%c0_11, %c0_12], %12 {strides = array<i32>} : memref<16x24xf32, #tpu.memory_space<vmem>>, vector<16x24xf32>,
    } else {
    }
    %c0 = arith.constant 0 : index
    %c0_1 = arith.constant 0 : index
    %3 = vector.load %arg7[%c0, %c0_1] : memref<16x24xf32, #tpu.memory_space<vmem>>, vector<16x24xf32>
    %c0_2 = arith.constant 0 : index
    %c0_3 = arith.constant 0 : index
    %4 = vector.load %arg3[%c0_2, %c0_3] : memref<16x32xbf16, #tpu.memory_space<vmem>>, vector<16x32xbf16>
    %c0_4 = arith.constant 0 : index
    %c0_5 = arith.constant 0 : index
    %5 = vector.load %arg4[%c0_4, %c0_5] : memref<32x24xbf16, #tpu.memory_space<vmem>>, vector<32x24xbf16>
    %cst = arith.constant dense<0.000000e+00> : vector<16x24xf32>
    %6 = tpu.matmul %4, %5, %cst {dimension_numbers = #tpu.dot_dimension_numbers<[1], [0], [0], [1], [0, 0, 1, 1], [], []>} : vector<16x32xbf16>, vector<32x24xbf16>, vector<16x24xf32> -> vector<16x24xf32>
    %7 = arith.addf %3, %6 : vector<16x24xf32>
    %c0_6 = arith.constant 0 : index
    %c0_7 = arith.constant 0 : index
    %8 = vector.load %arg7[%c0_6, %c0_7] : memref<16x24xf32, #tpu.memory_space<vmem>>, vector<16x24xf32>
    tpu.vector_store %arg7[%c0_6, %c0_7], %7 {strides = array<i32>} : memref<16x24xf32, #tpu.memory_space<vmem>>, vector<16x24xf32>,
    %c0_i32_8 = arith.constant 0 : i32
    %9 = arith.cmpi eq, %arg2, %c0_i32_8 : i32
    %10 = arith.extui %9 : i1 to i32
    %c0_i32_9 = arith.constant 0 : i32
    %11 = arith.cmpi ne, %10, %c0_i32_9 : i32
    scf.if %11 {
      %c0_10 = arith.constant 0 : index
      %c0_11 = arith.constant 0 : index
      %12 = vector.load %arg7[%c0_10, %c0_11] : memref<16x24xf32, #tpu.memory_space<vmem>>, vector<16x24xf32>
      %c0_12 = arith.constant 0 : index
      %c0_13 = arith.constant 0 : index
      %13 = vector.load %arg5[%c0_12, %c0_13] : memref<1x24xf32, #tpu.memory_space<vmem>>, vector<1x24xf32>
      %14 = vector.broadcast %13 : vector<1x24xf32> to vector<16x24xf32>
      %15 = arith.addf %12, %14 : vector<16x24xf32>
      %c0_14 = arith.constant 0 : index
      %c0_15 = arith.constant 0 : index
      %16 = vector.load %arg6[%c0_14, %c0_15] : memref<16x24xf32, #tpu.memory_space<vmem>>, vector<16x24xf32>
      tpu.vector_store %arg6[%c0_14, %c0_15], %15 {strides = array<i32>} : memref<16x24xf32, #tpu.memory_space<vmem>>, vector<16x24xf32>,
    } else {
    }
    return
  }
  func.func @transform_0(%arg0: i32, %arg1: i32, %arg2: i32) -> (i32, i32) {
    %c0_i32 = arith.constant 0 : i32
    return %arg0, %arg2 : i32, i32
  }
  func.func @transform_1(%arg0: i32, %arg1: i32, %arg2: i32) -> (i32, i32) {
    %c0_i32 = arith.constant 0 : i32
    return %arg2, %arg1 : i32, i32
  }
  func.func @transform_2(%arg0: i32, %arg1: i32, %arg2: i32) -> (i32, i32) {
    %c0_i32 = arith.constant 0 : i32
    %c0_i32_0 = arith.constant 0 : i32
    return %c0_i32, %arg1 : i32, i32
  }
  func.func @transform_3(%arg0: i32, %arg1: i32, %arg2: i32) -> (i32, i32) {
    %c0_i32 = arith.constant 0 : i32
    return %arg0, %arg1 : i32, i32
  }
}

</mosaic_0001>

<bundles_post_ra>
// kernel: _lambda_.33
= control target key start
LH: loop header
LB: loop body
LE: loop exit
PB: predicated region body
PF: predicated region fallthrough
CT: control target
= control target key end

     0   :  { %vm19_vm0 = vcmask 785408   ;;  %v108_v1 = vmov 0.0   ;;  %vm47_vm1 = vcmask 261120   ;;  %vm83_vm2 = vcmask 781312   ;;  %s151_s1 = inlined_call_operand.vmem [shape: bf16[32,96], index: 1, kind: input, shape index: {}]   ;;  %s152_s2 = inlined_call_operand.vmem [shape: f32[1,96], index: 2, kind: input, shape index: {}]   ;;  %s153_s0 = inlined_call_operand.vmem [shape: bf16[16,32], index: 0, kind: input, shape index: {}]   ;;  %s154_s3 = inlined_call_operand.vmem [shape: bf16[16,96], index: 3, kind: output, shape index: {}]  }
   0x1   :  { %v105_v0 = vld [vmem:[%s151_s1 + $0x8] sm:$0xff]  ;;  %20 = vst.msk [vmem:[#allocation2] sm:$0xff] %vm19_vm0, %v108_v1  ;;  %v104_v2 = vld [vmem:[%s151_s1] sm:$0xff] }
   0x2   :  { %21 = vst.msk [vmem:[#allocation2 + $0x8] sm:$0xff] %vm19_vm0, %v108_v1  ;;  %57 = vmatpush.bf16.msra.mxu0 %v105_v0  ;;  %v103_v3 = vld [vmem:[%s153_s0] sm:$0xff] }
   0x3   :  { %v107_v8 = vld [vmem:[%s152_s2] ss:$0 sm:$0xff] }
   0x6   :  { %58 = vmatpush.bf16.msra.mxu0 %v104_v2 }
   0x8   :  { %v22_v4 = vld [vmem:[#allocation2] sm:$0xff] }
   0x9   :  { %102 = vmatmul.msk.bf16.vlgmr.msra.gmra.mxu0 %vm47_vm1, %v103_v3  ;;  %v23_v7 = vld [vmem:[#allocation2 + $0x8] sm:$0xff] }
  0x86   :  { %v60_v5 = vpop.f32.mrf.mxu0 }
  0x87   :  { %v65_v6 = vadd.f32 %v60_v5, %v22_v4 }
  0x89   :  { %68 = vst.msk [vmem:[#allocation2] sm:$0xff] %vm19_vm0, %v65_v6 }
  0x8e   :  { %v62_v9 = vpop.f32.mrf.mxu0 }
  0x8f   :  { %v66_v10 = vadd.f32 %v62_v9, %v23_v7 }
  0x90   :  { %v73_v11 = vld [vmem:[#allocation2] sm:$0xff] }
  0x91   :  { %v79_v12 = vadd.f32 %v107_v8, %v73_v11  ;;  %69 = vst.msk [vmem:[#allocation2 + $0x8] sm:$0xff] %vm19_vm0, %v66_v10 }
  0x93   :  { %v81_v13 = vpack.c.bf16 %v79_v12, %v79_v12 }
  0x95   :  { %84 = vst.msk [vmem:[%s154_s3] sm:$0xf] %vm83_vm2, %v81_v13 }
  0x98   :  { %v74_v14 = vld [vmem:[#allocation2 + $0x8] sm:$0xff] }
  0x99   :  { %v80_v15 = vadd.f32 %v107_v8, %v74_v14 }
  0x9b   :  { %v82_v16 = vpack.c.bf16 %v80_v15, %v80_v15 }
  0x9d   :  { %85 = vst.msk [vmem:[%s154_s3 + $0x4] sm:$0xf] %vm83_vm2, %v82_v16 }

// kernel: _lambda_.36
= control target key start
LH: loop header
LB: loop body
LE: loop exit
PB: predicated region body
PF: predicated region fallthrough
CT: control target
= control target key end

     0   :  { %vm19_vm0 = vcmask 261120   ;;  %v107_v1 = vmov 0.0   ;;  %vm82_vm1 = vcmask 257024   ;;  %s151_s1 = inlined_call_operand.vmem [shape: bf16[32,32], index: 1, kind: input, shape index: {}]   ;;  %s152_s2 = inlined_call_operand.vmem [shape: f32[1,32], index: 2, kind: input, shape index: {}]   ;;  %s153_s0 = inlined_call_operand.vmem [shape: bf16[16,32], index: 0, kind: input, shape index: {}]   ;;  %s154_s3 = inlined_call_operand.vmem [shape: bf16[16,32], index: 3, kind: output, shape index: {}]  }
   0x1   :  { %v104_v0 = vld [vmem:[%s151_s1 + $0x8] sm:$0xff]  ;;  %20 = vst.msk [vmem:[#allocation2] sm:$0xff] %vm19_vm0, %v107_v1  ;;  %v103_v2 = vld [vmem:[%s151_s1] sm:$0xff] }
   0x2   :  { %21 = vst.msk [vmem:[#allocation2 + $0x8] sm:$0xff] %vm19_vm0, %v107_v1  ;;  %57 = vmatpush.bf16.msra.mxu0 %v104_v0  ;;  %v102_v3 = vld [vmem:[%s153_s0] sm:$0xff] }
   0x3   :  { %v106_v8 = vld [vmem:[%s152_s2] ss:$0 sm:$0xff] }
   0x6   :  { %58 = vmatpush.bf16.msra.mxu0 %v103_v2 }
   0x8   :  { %v22_v4 = vld [vmem:[#allocation2] sm:$0xff] }
   0x9   :  { %101 = vmatmul.msk.bf16.vlgmr.msra.gmra.mxu0 %vm19_vm0, %v102_v3  ;;  %v23_v7 = vld [vmem:[#allocation2 + $0x8] sm:$0xff] }
  0x86   :  { %v60_v5 = vpop.f32.mrf.mxu0 }
  0x87   :  { %v65_v6 = vadd.f32 %v60_v5, %v22_v4 }
  0x89   :  { %67 = vst.msk [vmem:[#allocation2] sm:$0xff] %vm19_vm0, %v65_v6 }
  0x8e   :  { %v62_v9 = vpop.f32.mrf.mxu0 }
  0x8f   :  { %v66_v10 = vadd.f32 %v62_v9, %v23_v7 }
  0x90   :  { %v72_v11 = vld [vmem:[#allocation2] sm:$0xff] }
  0x91   :  { %v78_v12 = vadd.f32 %v106_v8, %v72_v11  ;;  %68 = vst.msk [vmem:[#allocation2 + $0x8] sm:$0xff] %vm19_vm0, %v66_v10 }
  0x93   :  { %v80_v13 = vpack.c.bf16 %v78_v12, %v78_v12 }
  0x95   :  { %83 = vst.msk [vmem:[%s154_s3] sm:$0xf] %vm82_vm1, %v80_v13 }
  0x98   :  { %v73_v14 = vld [vmem:[#allocation2 + $0x8] sm:$0xff] }
  0x99   :  { %v79_v15 = vadd.f32 %v106_v8, %v73_v14 }
  0x9b   :  { %v81_v16 = vpack.c.bf16 %v79_v15, %v79_v15 }
  0x9d   :  { %84 = vst.msk [vmem:[%s154_s3 + $0x4] sm:$0xf] %vm82_vm1, %v81_v16 }

// kernel: _lambda_.35
= control target key start
LH: loop header
LB: loop body
LE: loop exit
PB: predicated region body
PF: predicated region fallthrough
CT: control target
= control target key end

     0   :  { %vm28_vm0 = vcmask 261120   ;;  %v198_v1 = vmov 0.0   ;;  %v199_v22 = vmov 32.0   ;;  %vm160_vm6 = vcmask 257024   ;;  %s271_s1 = inlined_call_operand.vmem [shape: bf16[32,32], index: 1, kind: input, shape index: {}]   ;;  %s272_s0 = inlined_call_operand.vmem [shape: bf16[16,32], index: 0, kind: input, shape index: {}]   ;;  %s273_s2 = inlined_call_operand.vmem [shape: f32[1,32], index: 2, kind: input, shape index: {}]   ;;  %s274_s3 = inlined_call_operand.vmem [shape: bf16[16,32], index: 3, kind: input, shape index: {}]   ;;  %s275_s4 = inlined_call_operand.vmem [shape: f32[1,32], index: 4, kind: input, shape index: {}]   ;;  %s276_s5 = inlined_call_operand.vmem [shape: f32[1,32], index: 5, kind: input, shape index: {}]   ;;  %s277_s6 = inlined_call_operand.vmem [shape: bf16[16,32], index: 6, kind: output, shape index: {}]  }
   0x1   :  { %v182_v0 = vld [vmem:[%s271_s1 + $0x8] sm:$0xff]  ;;  %29 = vst.msk [vmem:[#allocation2] sm:$0xff] %vm28_vm0, %v198_v1  ;;  %v181_v2 = vld [vmem:[%s271_s1] sm:$0xff]  ;;  %192 = vrcp.f32 %v199_v22 }
   0x2   :  { %30 = vst.msk [vmem:[#allocation2 + $0x8] sm:$0xff] %vm28_vm0, %v198_v1  ;;  %66 = vmatpush.bf16.msra.mxu0 %v182_v0  ;;  %v180_v3 = vld [vmem:[%s272_s0] sm:$0xff] }
   0x3   :  { %v184_v8 = vld [vmem:[%s274_s3] sm:$0xff]  }
   0x4   :  { %v189_v9 = vld [vmem:[%s273_s2] ss:$0 sm:$0xff]  ;;  %v185_v12 = vunpack.c.l.bf16 %v184_v8  ;;  %v186_v17 = vunpack.c.h.bf16 %v184_v8 }
   0x5   :  { %v190_v53 = vld [vmem:[%s275_s4] ss:$0 sm:$0xff] }
   0x6   :  { %67 = vmatpush.bf16.msra.mxu0 %v181_v2  ;;  %v191_v56 = vld [vmem:[%s276_s5] ss:$0 sm:$0xff] }
   0x7   :  { %v193_v23 = vpop.eup %192 }
   0x8   :  { %v31_v4 = vld [vmem:[#allocation2] sm:$0xff]  ;;  %v102_v24 = vmul.f32 32.0, %v193_v23  ;;  %vm106_vm1 = vweird.f32 %v193_v23 }
   0x9   :  { %179 = vmatmul.msk.bf16.vlgmr.msra.gmra.mxu0 %vm28_vm0, %v180_v3  ;;  %v32_v7 = vld [vmem:[#allocation2 + $0x8] sm:$0xff] }
   0xa   :  { %v103_v25 = vsub.f32 1.0, %v102_v24 }
   0xc   :  { %v104_v26 = vmul.f32 %v193_v23, %v103_v25 }
   0xe   :  { %v105_v27 = vadd.f32 %v193_v23, %v104_v26 }
  0x10   :  { %v107_v28 = vsel %vm106_vm1, %v193_v23, %v105_v27 }
  0x86   :  { %v69_v5 = vpop.f32.mrf.mxu0 }
  0x87   :  { %v74_v6 = vadd.f32 %v69_v5, %v31_v4 }
  0x89   :  { %76 = vst.msk [vmem:[#allocation2] sm:$0xff] %vm28_vm0, %v74_v6 }
  0x8e   :  { %v71_v10 = vpop.f32.mrf.mxu0 }
  0x8f   :  { %v75_v11 = vadd.f32 %v71_v10, %v32_v7 }
  0x90   :  { %v81_v13 = vld [vmem:[#allocation2] sm:$0xff] }
  0x91   :  { %77 = vst.msk [vmem:[#allocation2 + $0x8] sm:$0xff] %vm28_vm0, %v75_v11  ;;  %v87_v14 = vadd.f32 %v189_v9, %v81_v13 }
  0x93   :  { %v93_v15 = vadd.f32 %v185_v12, %v87_v14 }
  0x95   :  { %v95_v16 = vsel %vm28_vm0, %v93_v15, 0.0 }
  0x96   :  { %96 = vadd.xlane.f32.xlu0 %v95_v16 }
  0x98   :  { %v82_v18 = vld [vmem:[#allocation2 + $0x8] sm:$0xff] }
  0x99   :  { %v88_v19 = vadd.f32 %v189_v9, %v82_v18 }
  0x9b   :  { %v94_v20 = vadd.f32 %v186_v17, %v88_v19 }
  0x9d   :  { %v98_v21 = vsel %vm28_vm0, %v94_v20, 0.0 }
  0x9e   :  { %99 = vadd.xlane.f32.xlu0 %v98_v21 }
 0x109   :  { %v97_v29 = vpop.xlane.xlu0 %96 }
 0x10a   :  { %v108_v30 = vmul.f32 %v107_v28, %v97_v29 }
 0x10c   :  { %v110_v31 = vsub.f32 %v93_v15, %v108_v30 }
 0x10e   :  { %v112_v32 = vmul.f32 %v110_v31, %v110_v31 }
 0x110   :  { %v114_v33 = vsel %vm28_vm0, %v112_v32, 0.0 }
 0x111   :  { %115 = vadd.xlane.f32.xlu1 %v114_v33  ;;  %v100_v34 = vpop.xlane.xlu0 %99 }
 0x112   :  { %v109_v35 = vmul.f32 %v107_v28, %v100_v34 }
 0x114   :  { %v111_v36 = vsub.f32 %v94_v20, %v109_v35 }
 0x116   :  { %v113_v37 = vmul.f32 %v111_v36, %v111_v36 }
 0x118   :  { %v117_v38 = vsel %vm28_vm0, %v113_v37, 0.0 }
 0x119   :  { %118 = vadd.xlane.f32.xlu1 %v117_v38 }
 0x184   :  { %v116_v39 = vpop.xlane.xlu1 %115 }
 0x185   :  { %v120_v40 = vmul.f32 %v116_v39, %v107_v28 }
 0x187   :  { %v122_v41 = vadd.f32 1e-05, %v120_v40 }
 0x189   :  { %194 = vrsqrt.f32 %v122_v41  ;;  %vm130_vm3 = vweird.f32 %v122_v41 }
 0x18c   :  { %v119_v42 = vpop.xlane.xlu1 %118 }
 0x18d   :  { %v121_v43 = vmul.f32 %v119_v42, %v107_v28 }
 0x18f   :  { %v195_v44 = vpop.eup %194  ;;  %v123_v45 = vadd.f32 1e-05, %v121_v43 }
 0x190   :  { %v125_v46 = vmul.f32 %v195_v44, %v122_v41  ;;  %vm131_vm2 = vweird.f32 %v195_v44 }
 0x191   :  { %196 = vrsqrt.f32 %v123_v45  ;;  %vm132_vm4 = vmor %vm130_vm3, %vm131_vm2  ;;  %vm140_vm7 = vweird.f32 %v123_v45 }
 0x192   :  { %v126_v47 = vmul.f32 %v195_v44, %v125_v46 }
 0x194   :  { %v127_v48 = vmul.f32 0.5, %v126_v47 }
 0x196   :  { %v128_v49 = vsub.f32 1.5, %v127_v48 }
 0x197   :  { %v197_v50 = vpop.eup %196 }
 0x198   :  { %v129_v51 = vmul.f32 %v195_v44, %v128_v49  ;;  %v135_v52 = vmul.f32 %v197_v50, %v123_v45  ;;  %vm141_vm5 = vweird.f32 %v197_v50 }
 0x199   :  { %vm142_vm8 = vmor %vm140_vm7, %vm141_vm5 }
 0x19a   :  { %v133_v54 = vsel %vm132_vm4, %v195_v44, %v129_v51  ;;  %v136_v55 = vmul.f32 %v197_v50, %v135_v52 }
 0x19b   :  { %v144_v57 = vmul.f32 %v133_v54, %v110_v31 }
 0x19c   :  { %v137_v58 = vmul.f32 0.5, %v136_v55 }
 0x19d   :  { %v150_v59 = vmul.f32 %v190_v53, %v144_v57 }
 0x19e   :  { %v138_v60 = vsub.f32 1.5, %v137_v58 }
 0x19f   :  { %v156_v61 = vadd.f32 %v191_v56, %v150_v59 }
 0x1a0   :  { %v139_v62 = vmul.f32 %v197_v50, %v138_v60 }
 0x1a1   :  { %v158_v63 = vpack.c.bf16 %v156_v61, %v156_v61 }
 0x1a2   :  { %v143_v0 = vsel %vm142_vm8, %v197_v50, %v139_v62 }
 0x1a3   :  { %161 = vst.msk [vmem:[%s277_s6] sm:$0xf] %vm160_vm6, %v158_v63  ;;  %v145_v1 = vmul.f32 %v143_v0, %v111_v36 }
 0x1a5   :  { %v151_v2 = vmul.f32 %v190_v53, %v145_v1 }
 0x1a7   :  { %v157_v3 = vadd.f32 %v191_v56, %v151_v2 }
 0x1a9   :  { %v159_v4 = vpack.c.bf16 %v157_v3, %v157_v3 }
 0x1ab   :  { %162 = vst.msk [vmem:[%s277_s6 + $0x4] sm:$0xf] %vm160_vm6, %v159_v4 }

// kernel: _lambda_.37
= control target key start
LH: loop header
LB: loop body
LE: loop exit
PB: predicated region body
PF: predicated region fallthrough
CT: control target
= control target key end

     0   :  { %vm19_vm0 = vcmask 523264   ;;  %v108_v1 = vmov 0.0   ;;  %vm47_vm1 = vcmask 261120   ;;  %vm83_vm2 = vcmask 519168   ;;  %s151_s1 = inlined_call_operand.vmem [shape: bf16[32,64], index: 1, kind: input, shape index: {}]   ;;  %s152_s2 = inlined_call_operand.vmem [shape: f32[1,64], index: 2, kind: input, shape index: {}]   ;;  %s153_s0 = inlined_call_operand.vmem [shape: bf16[16,32], index: 0, kind: input, shape index: {}]   ;;  %s154_s3 = inlined_call_operand.vmem [shape: bf16[16,64], index: 3, kind: output, shape index: {}]  }
   0x1   :  { %v105_v0 = vld [vmem:[%s151_s1 + $0x8] sm:$0xff]  ;;  %20 = vst.msk [vmem:[#allocation2] sm:$0xff] %vm19_vm0, %v108_v1  ;;  %v104_v2 = vld [vmem:[%s151_s1] sm:$0xff] }
   0x2   :  { %21 = vst.msk [vmem:[#allocation2 + $0x8] sm:$0xff] %vm19_vm0, %v108_v1  ;;  %57 = vmatpush.bf16.msra.mxu0 %v105_v0  ;;  %v103_v3 = vld [vmem:[%s153_s0] sm:$0xff] }
   0x3   :  { %v107_v8 = vld [vmem:[%s152_s2] ss:$0 sm:$0xff] }
   0x6   :  { %58 = vmatpush.bf16.msra.mxu0 %v104_v2 }
   0x8   :  { %v22_v4 = vld [vmem:[#allocation2] sm:$0xff] }
   0x9   :  { %102 = vmatmul.msk.bf16.vlgmr.msra.gmra.mxu0 %vm47_vm1, %v103_v3  ;;  %v23_v7 = vld [vmem:[#allocation2 + $0x8] sm:$0xff] }
  0x86   :  { %v60_v5 = vpop.f32.mrf.mxu0 }
  0x87   :  { %v65_v6 = vadd.f32 %v60_v5, %v22_v4 }
  0x89   :  { %68 = vst.msk [vmem:[#allocation2] sm:$0xff] %vm19_vm0, %v65_v6 }
  0x8e   :  { %v62_v9 = vpop.f32.mrf.mxu0 }
  0x8f   :  { %v66_v10 = vadd.f32 %v62_v9, %v23_v7 }
  0x90   :  { %v73_v11 = vld [vmem:[#allocation2] sm:$0xff] }
  0x91   :  { %v79_v12 = vadd.f32 %v107_v8, %v73_v11  ;;  %69 = vst.msk [vmem:[#allocation2 + $0x8] sm:$0xff] %vm19_vm0, %v66_v10 }
  0x93   :  { %v81_v13 = vpack.c.bf16 %v79_v12, %v79_v12 }
  0x95   :  { %84 = vst.msk [vmem:[%s154_s3] sm:$0xf] %vm83_vm2, %v81_v13 }
  0x98   :  { %v74_v14 = vld [vmem:[#allocation2 + $0x8] sm:$0xff] }
  0x99   :  { %v80_v15 = vadd.f32 %v107_v8, %v74_v14 }
  0x9b   :  { %v82_v16 = vpack.c.bf16 %v80_v15, %v80_v15 }
  0x9d   :  { %85 = vst.msk [vmem:[%s154_s3 + $0x4] sm:$0xf] %vm83_vm2, %v82_v16 }

// kernel: _lambda_.34
= control target key start
LH: loop header
LB: loop body
LE: loop exit
PB: predicated region body
PF: predicated region fallthrough
CT: control target
= control target key end

     0   :  { %s1566_s15 = smov 0   ;;  %s1568_s16 = smov 0   ;;  %s2099_s0 = inlined_call_operand.vmem [shape: bf16[2,8,4,8], index: 0, kind: input, shape index: {}]   ;;  %s2100_s1 = inlined_call_operand.vmem [shape: bf16[2,8,4,8], index: 1, kind: input, shape index: {}]   ;;  %s2101_s2 = inlined_call_operand.vmem [shape: bf16[2,8,4,8], index: 2, kind: input, shape index: {}]   ;;  %s2102_s3 = inlined_call_operand.vmem [shape: f32[2,1,8], index: 3, kind: input, shape index: {}]   ;;  %s2103_s4 = inlined_call_operand.vmem [shape: bf16[2,8,32], index: 4, kind: output, shape index: {}]  }
   0x1   :  { %s1570_s17 = smov 0  }
   0x2 LB: > { %s33_s18 = sadd.s32 1, %s1529_s16  ;;  %p1425_p0 = scmp.ge.s32.totalorder %s1533_s17, 1  ;;  %s1533_s17 = sphi %s1570_s17, %s14_s17   ;;  %s1529_s16 = sphi %s1568_s16, %s2119_s16   ;;  %s1525_s15 = sphi %s1566_s15, %s2118_s15  }
   0x3   : > { %p35_p1 = scmp.ge.s32.totalorder %s33_s18, 2  ;;  %p237_p2 = scmp.lt.s32.totalorder %s1533_s17, 3 }
   0x5   : > { %s2121_s18 = smov (%p35_p1, %s33_s18), 0  ;;  %p238_p3 = pnand %p1425_p0, %p237_p2 }
   0x7   : > { %241 = sbr.rel (%p238_p3) target bundleno = 1203 (0x4b3), region = 36 }
   0xc   : > { %p294_p4 = scmp.lt.s32.totalorder %s1525_s15, 1  ;;  %vm453_vm0 = vcmask 1041409   ;;  %vm456_vm1 = vcmask 1042434   ;;  %vm459_vm2 = vcmask 1043459   ;;  %vm462_vm3 = vcmask 1044484   ;;  %s1538_s6 = smov 8  }
   0xd   : > { %vm465_vm4 = vcmask 1045509   ;;  %vm468_vm5 = vcmask 1046534   ;;  %vm471_vm6 = vcmask 1047559   ;;  %vm350_vm7 = vcmask 64512   ;;  %s1539_s7 = smov 24   ;;  %s1540_s8 = smov 16  }
   0xe   : > { %s2123_s15 = smov (!%p294_p4, %s1525_s15), 1  ;;  %vm341_vm12 = vcmask 7168   ;;  %vm642_vm13 = vcmask 1043456   ;;  %vm1284_vm14 = vcmask 130048   ;;  %vm1287_vm15 = vcmask 195584  }
   0xf   : > { %s1587_s19 = sshll.u32 %s2123_s15, 4  ;;  %s328_s5 = scalar_lea.vmem %s2102_s3, %s2123_s15 }
  0x10   : > { %s1593_s22 = scalar_lea.vmem %s2100_s1, %s1587_s19  ;;  %s1605_s25 = scalar_lea.vmem %s2099_s0, %s1587_s19 }
  0x11   : > { %v1596_v0 = vld [vmem:[%s1593_s22] sm:$0x3]  ;;  %v1599_v1 = vld [vmem:[%s1593_s22 + $0x2] sm:$0x3]  ;;  %v374_v4 = vld [vmem:[%s1605_s25 + $0x4] sm:$0x3]  ;;  %s1663_s28 = scalar_lea.vmem %s2101_s2, %s1587_s19 }
  0x12   : > { %475 = vst [vmem:[#allocation1] ss:$4 sm:$0xff] %v1596_v0  ;;  %v372_v2 = vld [vmem:[%s1605_s25] sm:$0x3]  ;;  %v373_v3 = vld [vmem:[%s1605_s25 + $0x2] sm:$0x3]  ;;  %v382_v8 = vunpack.c.l.bf16 %v374_v4 }
  0x13   : > { %480 = vst [vmem:[#allocation1 + $0x20] ss:$4 sm:$0xff] %v1599_v1  ;;  %v375_v5 = vld [vmem:[%s1605_s25 + $0x6] sm:$0x3]  ;;  %v381_v6 = vunpack.c.l.bf16 %v373_v3  ;;  %v380_v7 = vunpack.c.l.bf16 %v372_v2  ;;  %v1614_v9 = vld [vmem:[%s1593_s22 + $0x4] sm:$0x3] }
  0x14   : > { %v376_v10 = vld [vmem:[%s1605_s25 + $0x8] sm:$0x3]  ;;  %v383_v11 = vunpack.c.l.bf16 %v375_v5  ;;  %v1618_v13 = vld [vmem:[%s1593_s22 + $0x6] sm:$0x3]  ;;  %v377_v14 = vld [vmem:[%s1605_s25 + $0xa] sm:$0x3] }
  0x15   : > { %v389_v12 = vmul.f32 0.35355338, %v381_v6  ;;  %v390_v15 = vmul.f32 0.35355338, %v382_v8  ;;  %v388_v17 = vmul.f32 0.35355338, %v380_v7  ;;  %v384_v20 = vunpack.c.l.bf16 %v376_v10 }
  0x16   : > { %v391_v21 = vmul.f32 0.35355338, %v383_v11  ;;  %v378_v23 = vld [vmem:[%s1605_s25 + $0xc] sm:$0x3]  ;;  %v385_v24 = vunpack.c.l.bf16 %v377_v14  ;;  %v1625_v28 = vld [vmem:[%s1593_s22 + $0x8] sm:$0x3] }
  0x17   : > { %v397_v18 = vpack.c.bf16 %v389_v12, %v389_v12  ;;  %v398_v22 = vpack.c.bf16 %v390_v15, %v390_v15  ;;  %v396_v25 = vpack.c.bf16 %v388_v17, %v388_v17  ;;  %v392_v27 = vmul.f32 0.35355338, %v384_v20  ;;  %v1628_v31 = vld [vmem:[%s1593_s22 + $0xa] sm:$0x3]  ;;  %v379_v32 = vld [vmem:[%s1605_s25 + $0xe] sm:$0x3] }
  0x18   : > { %v399_v30 = vpack.c.bf16 %v391_v21, %v391_v21  ;;  %v386_v33 = vunpack.c.l.bf16 %v378_v23  ;;  %v393_v36 = vmul.f32 0.35355338, %v385_v24  ;;  %v387_v44 = vunpack.c.l.bf16 %v379_v32  ;;  %v1641_v54 = vld [vmem:[%s1593_s22 + $0xc] sm:$0x3]  ;;  %v1647_v58 = vld [vmem:[%s1593_s22 + $0xe] sm:$0x3] }
  0x19   : > { %v476_v16 = vld.sshfl [vmem:[#allocation1] sm:$0xff pattern:$0x73625140]  ;;  %v429_v26 = vunpack.c.l.b16 %v397_v18  ;;  %v430_v34 = vunpack.c.l.b16 %v398_v22  ;;  %v428_v37 = vunpack.c.l.b16 %v396_v25  ;;  %v400_v41 = vpack.c.bf16 %v392_v27, %v392_v27  ;;  %s1432_s9 = sshll.u32 %s2123_s15, 2 }
  0x1a   : > { %v481_v19 = vld.sshfl [vmem:[#allocation1 + $0x20] sm:$0xff pattern:$0x73625140]  ;;  %484 = vst [vmem:[#allocation1] ss:$4 sm:$0xff] %v1614_v9  ;;  %v507_v42 = vunpack.c.l.b16 %v476_v16  ;;  %v431_v45 = vunpack.c.l.b16 %v399_v30  ;;  %v401_v49 = vpack.c.bf16 %v393_v36, %v393_v36  ;;  %s335_s12 = scalar_lea.vmem %s2103_s4, %s1432_s9 }
  0x1b   : > { %488 = vst [vmem:[#allocation1 + $0x20] ss:$4 sm:$0xff] %v1618_v13  ;;  %v508_v29 = vunpack.c.l.b16 %v481_v19  ;;  %v1631_v38 = vunpack.i.l.s16 %v429_v26  ;;  %v394_v46 = vmul.f32 0.35355338, %v386_v33  ;;  %v1635_v47 = vunpack.i.l.s16 %v430_v34  ;;  %v1671_v21 = vld [vmem:[%s1663_s28] sm:$0x3] }
  0x1c   : > { %v1637_v50 = vunpack.i.l.s16 %v428_v37  ;;  %v432_v53 = vunpack.c.l.b16 %v400_v41  ;;  %v395_v56 = vmul.f32 0.35355338, %v387_v44  ;;  %v1644_v57 = vunpack.i.l.s16 %v431_v45  ;;  %v1677_v24 = vld [vmem:[%s1663_s28 + $0x2] sm:$0x3] }
  0x1d   : > { %v515_v43 = vrot.slane %v508_v29, 7  ;;  %v452_v51 = vrot.slane %v1631_v38, 7  ;;  %v402_v59 = vpack.c.bf16 %v394_v46, %v394_v46  ;;  %v455_v60 = vrot.slane %v1635_v47, 6  ;;  %v1696_v46 = vld [vmem:[%s1663_s28 + $0x6] sm:$0x3] }
  0x1e   : > { %v433_v63 = vunpack.c.l.b16 %v401_v49  ;;  %v1654_v6 = vunpack.i.l.s16 %v432_v53  ;;  %v403_v8 = vpack.c.bf16 %v395_v56, %v395_v56  ;;  %v458_v10 = vrot.slane %v1644_v57, 5  ;;  %v1710_v56 = vld [vmem:[%s1663_s28 + $0xa] sm:$0x3] }
  0x1f   : > { %v516_v55 = vsel %vm453_vm0, %v515_v43, %v507_v42  ;;  %v454_v2 = vsel %vm453_vm0, %v452_v51, %v1637_v50  ;;  %v434_v12 = vunpack.c.l.b16 %v402_v59  ;;  %v1692_v43 = vld [vmem:[%s1663_s28 + $0x4] sm:$0x3] }
  0x20   : > { %v457_v14 = vsel %vm456_vm1, %v455_v60, %v454_v2  ;;  %v1666_v16 = vunpack.i.l.s16 %v433_v63  ;;  %v461_v17 = vrot.slane %v1654_v6, 4  ;;  %v435_v19 = vunpack.c.l.b16 %v403_v8 }
  0x21   : > { %v485_v35 = vld.sshfl [vmem:[#allocation1] sm:$0xff pattern:$0x73625140]  ;;  %v460_v20 = vsel %vm459_vm2, %v458_v10, %v457_v14  ;;  %v1674_v23 = vunpack.i.l.s16 %v434_v12 }
  0x22   : > { %v489_v39 = vld.sshfl [vmem:[#allocation1 + $0x20] sm:$0xff pattern:$0x73625140]  ;;  %492 = vst [vmem:[#allocation1] ss:$4 sm:$0xff] %v1625_v28  ;;  %v509_v40 = vunpack.c.l.b16 %v485_v35  ;;  %v464_v26 = vrot.slane %v1666_v16, 3  ;;  %v463_v30 = vsel %vm462_vm3, %v461_v17, %v460_v20  ;;  %v1683_v34 = vunpack.i.l.s16 %v435_v19 }
  0x23   : > { %496 = vst [vmem:[#allocation1 + $0x20] ss:$4 sm:$0xff] %v1628_v31  ;;  %v510_v48 = vunpack.c.l.b16 %v489_v39  ;;  %v467_v36 = vrot.slane %v1674_v23, 2 }
  0x24   : > { %v517_v52 = vrot.slane %v509_v40, 6  ;;  %v466_v39 = vsel %vm465_vm4, %v464_v26, %v463_v30  ;;  %v470_v42 = vrot.slane %v1683_v34, 1 }
  0x25   : > { %v519_v62 = vrot.slane %v510_v48, 5  ;;  %v469_v45 = vsel %vm468_vm5, %v467_v36, %v466_v39 }
  0x26   : > { %v518_v5 = vsel %vm456_vm1, %v517_v52, %v516_v55  ;;  %v472_v52 = vsel %vm471_vm6, %v470_v42, %v469_v45  ;;  %v1707_v55 = vld [vmem:[%s1663_s28 + $0x8] sm:$0x3] }
  0x27   : > { %v520_v15 = vsel %vm459_vm2, %v519_v62, %v518_v5  ;;  %v473_v53 = vpack.c.b16 %v472_v52, %v472_v52  ;;  %v1723_v62 = vld [vmem:[%s1663_s28 + $0xe] sm:$0x3] }
  0x29   : > { %v493_v61 = vld.sshfl [vmem:[#allocation1] sm:$0xff pattern:$0x73625140] }
  0x2a   : > { %v497_v3 = vld.sshfl [vmem:[#allocation1 + $0x20] sm:$0xff pattern:$0x73625140]  ;;  %500 = vst [vmem:[#allocation1] ss:$4 sm:$0xff] %v1641_v54  ;;  %v511_v4 = vunpack.c.l.b16 %v493_v61 }
  0x2b   : > { %504 = vst [vmem:[#allocation1 + $0x20] ss:$4 sm:$0xff] %v1647_v58  ;;  %v512_v7 = vunpack.c.l.b16 %v497_v3  ;;  %v1720_v61 = vld [vmem:[%s1663_s28 + $0xc] sm:$0x3] }
  0x2c   : > { %v521_v11 = vrot.slane %v511_v4, 4 }
  0x2d   : > { %v523_v18 = vrot.slane %v512_v7, 3 }
  0x2e   : > { %v522_v22 = vsel %vm462_vm3, %v521_v11, %v520_v15 }
  0x2f   : > { %v524_v33 = vsel %vm465_vm4, %v523_v18, %v522_v22 }
  0x31   : > { %v501_v25 = vld.sshfl [vmem:[#allocation1] sm:$0xff pattern:$0x73625140] }
  0x32   : > { %v505_v27 = vld.sshfl [vmem:[#allocation1 + $0x20] sm:$0xff pattern:$0x73625140]  ;;  %v513_v29 = vunpack.c.l.b16 %v501_v25  ;;  %584 = vst [vmem:[#allocation1] ss:$4 sm:$0xff] %v1671_v21 }
  0x33   : > { %v514_v32 = vunpack.c.l.b16 %v505_v27  ;;  %589 = vst [vmem:[#allocation1 + $0x20] ss:$4 sm:$0xff] %v1677_v24 }
  0x34   : > { %v525_v35 = vrot.slane %v513_v29, 2 }
  0x35   : > { %v527_v37 = vrot.slane %v514_v32, 1 }
  0x36   : > { %v526_v40 = vsel %vm468_vm5, %v525_v35, %v524_v33 }
  0x37   : > { %v528_v41 = vsel %vm471_vm6, %v527_v37, %v526_v40 }
  0x38   : > { %v529_v44 = vpack.c.b16 %v528_v41, %v528_v41 }
  0x39   : > { %v1698_v48 = vld.sshfl [vmem:[#allocation1] sm:$0xff pattern:$0x73625140] }
  0x3a   : > { %v535_v49 = vsel %vm350_vm7, %v529_v44, 0  ;;  %v1701_v51 = vld.sshfl [vmem:[#allocation1 + $0x20] sm:$0xff pattern:$0x73625140]  ;;  %593 = vst [vmem:[#allocation1] ss:$4 sm:$0xff] %v1692_v43 }
  0x3b   : > { %544 = vmatpush.bf16.xpose.msra.mxu0 %v535_v49  ;;  %597 = vst [vmem:[#allocation1 + $0x20] ss:$4 sm:$0xff] %v1696_v46 }
  0x41   : > { %v1712_v59 = vld.sshfl [vmem:[#allocation1] sm:$0xff pattern:$0x73625140] }
  0x42   : > { %1441 = vmatmul.msk.bf16.vlgmr.msra.gmra.mxu0 %vm350_vm7, %v473_v53  ;;  %v1715_v60 = vld.sshfl [vmem:[#allocation1 + $0x20] sm:$0xff pattern:$0x73625140]  ;;  %601 = vst [vmem:[#allocation1] ss:$4 sm:$0xff] %v1707_v55 }
  0x43   : > { %605 = vst [vmem:[#allocation1 + $0x20] ss:$4 sm:$0xff] %v1710_v56 }
  0x49   : > { %v1725_v63 = vld.sshfl [vmem:[#allocation1] sm:$0xff pattern:$0x73625140] }
  0x4a   : > { %v1727_v2 = vld.sshfl [vmem:[#allocation1 + $0x20] sm:$0xff pattern:$0x73625140]  ;;  %609 = vst [vmem:[#allocation1] ss:$4 sm:$0xff] %v1720_v61 }
  0x4b   : > { %613 = vst [vmem:[#allocation1 + $0x20] ss:$4 sm:$0xff] %v1723_v62 }
  0x51   : > { %v1731_v3 = vld.sshfl [vmem:[#allocation1] sm:$0xff pattern:$0x73625140] }
  0x52   : > { %v1733_v4 = vld.sshfl [vmem:[#allocation1 + $0x20] sm:$0xff pattern:$0x73625140]  ;;  %677 = vst [vmem:[#allocation1] ss:$4 sm:$0xff] %v1596_v0 }
  0x53   : > { %681 = vst [vmem:[#allocation1 + $0x20] ss:$4 sm:$0xff] %v1599_v1 }
  0x59   : > { %v678_v5 = vld.sshfl [vmem:[#allocation1] sm:$0xff pattern:$0x73625140] }
  0x5a   : > { %v682_v7 = vld.sshfl [vmem:[#allocation1 + $0x20] sm:$0xff pattern:$0x73625140]  ;;  %684 = vst [vmem:[#allocation1] ss:$4 sm:$0xff] %v1614_v9  ;;  %v702_v8 = vunpack.c.l.b16 %v678_v5 }
  0x5b   : > { %687 = vst [vmem:[#allocation1 + $0x20] ss:$4 sm:$0xff] %v1618_v13  ;;  %v703_v14 = vunpack.c.l.b16 %v682_v7 }
  0x5c   : > { %v710_v15 = vrot.slane %v702_v8, 1  ;;  %v662_v8 = vrot.slane %v1637_v50, 1 }
  0x5e   : > { %v711_v19 = vsel %vm453_vm0, %v703_v14, %v710_v15  ;;  %v668_v15 = vrot.slane %v1654_v6, 5 }
  0x61   : > { %v685_v10 = vld.sshfl [vmem:[#allocation1] sm:$0xff pattern:$0x73625140] }
  0x62   : > { %v688_v11 = vld.sshfl [vmem:[#allocation1 + $0x20] sm:$0xff pattern:$0x73625140]  ;;  %690 = vst [vmem:[#allocation1] ss:$4 sm:$0xff] %v1625_v28  ;;  %v704_v12 = vunpack.c.l.b16 %v685_v10  ;;  %v664_v10 = vrot.slane %v1635_v47, 7 }
  0x63   : > { %693 = vst [vmem:[#allocation1 + $0x20] ss:$4 sm:$0xff] %v1628_v31  ;;  %v705_v17 = vunpack.c.l.b16 %v688_v11  ;;  %v663_v11 = vsel %vm453_vm0, %v1631_v38, %v662_v8 }
  0x64   : > { %v712_v18 = vrot.slane %v704_v12, 7  ;;  %v666_v12 = vrot.slane %v1644_v57, 6  ;;  %v665_v14 = vsel %vm456_vm1, %v664_v10, %v663_v11  ;;  %v361_v10 = vlaneseq }
  0x65   : > { %v714_v22 = vrot.slane %v705_v17, 6 }
  0x66   : > { %v713_v27 = vsel %vm456_vm1, %v712_v18, %v711_v19  ;;  %v667_v17 = vsel %vm459_vm2, %v666_v12, %v665_v14  ;;  %v670_v18 = vrot.slane %v1666_v16, 4  ;;  %v362_v14 = vshrl.u32 %v361_v10, 7 }
  0x67   : > { %v715_v32 = vsel %vm459_vm2, %v714_v22, %v713_v27  ;;  %v672_v22 = vrot.slane %v1674_v23, 3  ;;  %v674_v27 = vrot.slane %v1683_v34, 2 }
  0x69   : > { %v691_v20 = vld.sshfl [vmem:[#allocation1] sm:$0xff pattern:$0x73625140] }
  0x6a   : > { %v694_v25 = vld.sshfl [vmem:[#allocation1 + $0x20] sm:$0xff pattern:$0x73625140]  ;;  %696 = vst [vmem:[#allocation1] ss:$4 sm:$0xff] %v1641_v54  ;;  %v706_v26 = vunpack.c.l.b16 %v691_v20  ;;  %v669_v20 = vsel %vm462_vm3, %v668_v15, %v667_v17  ;;  %v367_v15 = vand.u32 127, %v361_v10 }
  0x6b   : > { %699 = vst [vmem:[#allocation1 + $0x20] ss:$4 sm:$0xff] %v1647_v58  ;;  %v707_v29 = vunpack.c.l.b16 %v694_v25 }
  0x6c   : > { %v716_v30 = vrot.slane %v706_v26, 5  ;;  %v671_v26 = vsel %vm465_vm4, %v670_v18, %v669_v20  ;;  %vm370_vm10 = vcmp.gt.s32.totalorder %v367_v15, %v362_v14 }
  0x6d   : > { %v718_v33 = vrot.slane %v707_v29, 4  ;;  %v673_v29 = vsel %vm468_vm5, %v672_v22, %v671_v26 }
  0x6e   : > { %v717_v35 = vsel %vm462_vm3, %v716_v30, %v715_v32  ;;  %v675_v30 = vsel %vm471_vm6, %v674_v27, %v673_v29 }
  0x6f   : > { %v719_v41 = vsel %vm465_vm4, %v718_v33, %v717_v35  ;;  %v676_v32 = vpack.c.b16 %v675_v30, %v675_v30 }
  0x71   : > { %v697_v36 = vld.sshfl [vmem:[#allocation1] sm:$0xff pattern:$0x73625140] }
  0x72   : > { %v700_v37 = vld.sshfl [vmem:[#allocation1 + $0x20] sm:$0xff pattern:$0x73625140]  ;;  %v708_v39 = vunpack.c.l.b16 %v697_v36  ;;  %779 = vst [vmem:[#allocation1] ss:$4 sm:$0xff] %v1671_v21 }
  0x73   : > { %v709_v40 = vunpack.c.l.b16 %v700_v37  ;;  %783 = vst [vmem:[#allocation1 + $0x20] ss:$4 sm:$0xff] %v1677_v24 }
  0x74   : > { %v720_v42 = vrot.slane %v708_v39, 3  ;;  %v1535_v39 = vmov 0  }
  0x75   : > { %v722_v44 = vrot.slane %v709_v40, 2  ;;  %1484 = vset.pattern.permute.xlu0 %v1535_v39  ;;  %1485 = vset.pattern.permute.xlu2 %v1535_v39 }
  0x76   : > { %v721_v45 = vsel %vm468_vm5, %v720_v42, %v719_v41  ;;  %1486 = vset.pattern.permute.xlu1 %v1535_v39 }
  0x77   : > { %v723_v49 = vsel %vm471_vm6, %v722_v44, %v721_v45 }
  0x78   : > { %v724_v52 = vpack.c.b16 %v723_v49, %v723_v49 }
  0x79   : > { %v1752_v53 = vld.sshfl [vmem:[#allocation1] sm:$0xff pattern:$0x73625140] }
  0x7a   : > { %v729_v5 = vsel %vm350_vm7, %v724_v52, 0  ;;  %v1755_v7 = vld.sshfl [vmem:[#allocation1 + $0x20] sm:$0xff pattern:$0x73625140]  ;;  %786 = vst [vmem:[#allocation1] ss:$4 sm:$0xff] %v1692_v43 }
  0x7b   : > { %738 = vmatpush.bf16.xpose.msra.mxu2 %v729_v5  ;;  %789 = vst [vmem:[#allocation1 + $0x20] ss:$4 sm:$0xff] %v1696_v46  ;;  %v355_v52 = vld [vmem:[%s328_s5] sm:$0x1] }
  0x7c   : > { %vm356_vm8 = vcmp.gt.f32.partialorder %v355_v52, 0.5 }
  0x7d   : > { %v357_v11 = vsel %vm356_vm8, 1, %v1535_v39 }
  0x7e   : > { %v358_v12 = vperm.slane %v357_v11, 0 }
  0x80   : > { %vm359_vm9 = vcmp.eq.s32.totalorder %v358_v12, 1 }
  0x81   : > { %v1768_v19 = vld.sshfl [vmem:[#allocation1] sm:$0xff pattern:$0x73625140]  ;;  %vm1827_vm11 = vmor %vm359_vm9, %vm370_vm10 }
  0x82   : > { %v1772_v25 = vld.sshfl [vmem:[#allocation1 + $0x20] sm:$0xff pattern:$0x73625140]  ;;  %792 = vst [vmem:[#allocation1] ss:$4 sm:$0xff] %v1707_v55  ;;  %1443 = vmatmul.msk.bf16.vlgmr.msra.gmra.mxu2 %vm350_vm7, %v676_v32 }
  0x83   : > { %795 = vst [vmem:[#allocation1 + $0x20] ss:$4 sm:$0xff] %v1710_v56 }
  0x89   : > { %v1781_v33 = vld.sshfl [vmem:[#allocation1] sm:$0xff pattern:$0x73625140] }
  0x8a   : > { %v1783_v35 = vld.sshfl [vmem:[#allocation1 + $0x20] sm:$0xff pattern:$0x73625140]  ;;  %798 = vst [vmem:[#allocation1] ss:$4 sm:$0xff] %v1720_v61 }
  0x8b   : > { %801 = vst [vmem:[#allocation1 + $0x20] ss:$4 sm:$0xff] %v1723_v62 }
  0x91   : > { %v1787_v36 = vld.sshfl [vmem:[#allocation1] sm:$0xff pattern:$0x73625140] }
  0x92   : > { %v1789_v37 = vld.sshfl [vmem:[#allocation1 + $0x20] sm:$0xff pattern:$0x73625140]  ;;  %864 = vst [vmem:[#allocation1] ss:$4 sm:$0xff] %v1596_v0 }
  0x93   : > { %868 = vst [vmem:[#allocation1 + $0x20] ss:$4 sm:$0xff] %v1599_v1 }
  0x99   : > { %v1793_v40 = vld.sshfl [vmem:[#allocation1] sm:$0xff pattern:$0x73625140] }
  0x9a   : > { %v1795_v41 = vld.sshfl [vmem:[#allocation1 + $0x20] sm:$0xff pattern:$0x73625140]  ;;  %871 = vst [vmem:[#allocation1] ss:$4 sm:$0xff] %v1614_v9 }
  0x9b   : > { %874 = vst [vmem:[#allocation1 + $0x20] ss:$4 sm:$0xff] %v1618_v13 }
  0xa1   : > { %v1799_v42 = vld.sshfl [vmem:[#allocation1] sm:$0xff pattern:$0x73625140] }
  0xa2   : > { %v1801_v44 = vld.sshfl [vmem:[#allocation1 + $0x20] sm:$0xff pattern:$0x73625140]  ;;  %877 = vst [vmem:[#allocation1] ss:$4 sm:$0xff] %v1625_v28 }
  0xa3   : > { %880 = vst [vmem:[#allocation1 + $0x20] ss:$4 sm:$0xff] %v1628_v31 }
  0xa9   : > { %v1805_v45 = vld.sshfl [vmem:[#allocation1] sm:$0xff pattern:$0x73625140] }
  0xaa   : > { %v1807_v49 = vld.sshfl [vmem:[#allocation1 + $0x20] sm:$0xff pattern:$0x73625140]  ;;  %883 = vst [vmem:[#allocation1] ss:$4 sm:$0xff] %v1641_v54 }
  0xab   : > { %886 = vst [vmem:[#allocation1 + $0x20] ss:$4 sm:$0xff] %v1647_v58 }
  0xb1   : > { %v1815_v5 = vld.sshfl [vmem:[#allocation1] sm:$0xff pattern:$0x73625140] }
  0xb2   : > { %v1817_v8 = vld.sshfl [vmem:[#allocation1 + $0x20] sm:$0xff pattern:$0x73625140]  ;;  %966 = vst [vmem:[#allocation1] ss:$4 sm:$0xff] %v1671_v21 }
  0xb3   : > { %970 = vst [vmem:[#allocation1 + $0x20] ss:$4 sm:$0xff] %v1677_v24 }
  0xb9   : > { %v1821_v17 = vld.sshfl [vmem:[#allocation1] sm:$0xff pattern:$0x73625140] }
  0xba   : > { %v1823_v18 = vld.sshfl [vmem:[#allocation1 + $0x20] sm:$0xff pattern:$0x73625140]  ;;  %973 = vst [vmem:[#allocation1] ss:$4 sm:$0xff] %v1692_v43 }
  0xbb   : > { %976 = vst [vmem:[#allocation1 + $0x20] ss:$4 sm:$0xff] %v1696_v46 }
  0xbf   : > { %v546_v22 = vpop.f32.mrf.mxu0 }
  0xc0   : > { %v1833_v26 = vsel %vm1827_vm11, -1e+30, %v546_v22 }
  0xc1   : > { %v552_v27 = vsel %vm350_vm7, %v1833_v26, -inf  ;;  %v1837_v29 = vld.sshfl [vmem:[#allocation1] sm:$0xff pattern:$0x73625140] }
  0xc2   : > { %2106 = vst [vmem:[#allocation5_spill] sm:$0xff] %v1837_v29  ;;  %553 = vmax.xlane.f32.xlu0 %v552_v27  ;;  %v1839_v30 = vld.sshfl [vmem:[#allocation1 + $0x20] sm:$0xff pattern:$0x73625140] }
  0xc3   : > { %2107 = vst [vmem:[#allocation6_spill] sm:$0xff] %v1839_v30 }
  0xc4   : > { %979 = vst [vmem:[#allocation1] ss:$4 sm:$0xff] %v1707_v55 }
  0xc5   : > { %982 = vst [vmem:[#allocation1 + $0x20] ss:$4 sm:$0xff] %v1710_v56 }
  0xc7   : > { %v548_v32 = vpop.f32.mrf.mxu0 }
  0xcb   : > { %v1843_v39 = vld.sshfl [vmem:[#allocation1] sm:$0xff pattern:$0x73625140] }
  0xcc   : > { %2108 = vst [vmem:[#allocation7_spill] sm:$0xff] %v1843_v39  ;;  %v1845_v52 = vld.sshfl [vmem:[#allocation1 + $0x20] sm:$0xff pattern:$0x73625140] }
  0xcd   : > { %2109 = vst [vmem:[#allocation8_spill] sm:$0xff] %v1845_v52 }
  0xce   : > { %985 = vst [vmem:[#allocation1] ss:$4 sm:$0xff] %v1720_v61 }
  0xcf   : > { %988 = vst [vmem:[#allocation1 + $0x20] ss:$4 sm:$0xff] %v1723_v62 }
  0xd5   : > { %v1849_v10 = vld.sshfl [vmem:[#allocation1] sm:$0xff pattern:$0x73625140] }
  0xd6   : > { %2110 = vst [vmem:[#allocation9_spill] sm:$0xff] %v1849_v10  ;;  %v1851_v11 = vld.sshfl [vmem:[#allocation1 + $0x20] sm:$0xff pattern:$0x73625140] }
  0xd7   : > { %2111 = vst [vmem:[#allocation10_spill] sm:$0xff] %v1851_v11 }
  0xd8   : > { %1051 = vst [vmem:[#allocation1] ss:$4 sm:$0xff] %v1596_v0  ;;  %v1036_v0 = vrot.slane %v1637_v50, 3 }
  0xd9   : > { %1055 = vst [vmem:[#allocation1 + $0x20] ss:$4 sm:$0xff] %v1599_v1  ;;  %v1037_v1 = vrot.slane %v1631_v38, 2 }
  0xdb   : > { %v1038_v29 = vsel %vm453_vm0, %v1037_v1, %v1036_v0 }
  0xdf   : > { %v1052_v12 = vld.sshfl [vmem:[#allocation1] sm:$0xff pattern:$0x73625140] }
  0xe0   : > { %v1056_v14 = vld.sshfl [vmem:[#allocation1 + $0x20] sm:$0xff pattern:$0x73625140]  ;;  %1058 = vst [vmem:[#allocation1] ss:$4 sm:$0xff] %v1614_v9  ;;  %v1076_v15 = vunpack.c.l.b16 %v1052_v12 }
  0xe1   : > { %1061 = vst [vmem:[#allocation1 + $0x20] ss:$4 sm:$0xff] %v1618_v13  ;;  %v1077_v22 = vunpack.c.l.b16 %v1056_v14  ;;  %v1039_v13 = vrot.slane %v1635_v47, 1 }
  0xe2   : > { %v1084_v11 = vrot.slane %v1076_v15, 3 }
  0xe3   : > { %v1085_v10 = vrot.slane %v1077_v22, 2 }
  0xe5   : > { %v1086_v9 = vsel %vm453_vm0, %v1085_v10, %v1084_v11  ;;  %v1042_v11 = vrot.slane %v1654_v6, 7 }
  0xe7   : > { %v1059_v27 = vld.sshfl [vmem:[#allocation1] sm:$0xff pattern:$0x73625140] }
  0xe8   : > { %v1062_v32 = vld.sshfl [vmem:[#allocation1 + $0x20] sm:$0xff pattern:$0x73625140]  ;;  %1064 = vst [vmem:[#allocation1] ss:$4 sm:$0xff] %v1625_v28  ;;  %v1078_v52 = vunpack.c.l.b16 %v1059_v27 }
  0xe9   : > { %1067 = vst [vmem:[#allocation1 + $0x20] ss:$4 sm:$0xff] %v1628_v31  ;;  %v1079_v14 = vunpack.c.l.b16 %v1062_v32  ;;  %v1536_v27 = vmov -1e+30  }
  0xea   : > { %v1087_v39 = vrot.slane %v1078_v52, 1  ;;  %v1040_v52 = vsel %vm456_vm1, %v1039_v13, %v1038_v29  ;;  %342 = vst.msk [vmem:[#allocation2] sm:$0xff] %vm341_vm12, %v1536_v27  ;;  %v1044_v29 = vrot.slane %v1666_v16, 6 }
  0xeb   : > { %343 = vst.msk [vmem:[#allocation2 + $0x8] sm:$0xff] %vm341_vm12, %v1536_v27 }
  0xec   : > { %v1088_v31 = vsel %vm456_vm1, %v1087_v39, %v1086_v9  ;;  %344 = vst.msk [vmem:[#allocation2 + $0x10] sm:$0xff] %vm341_vm12, %v1536_v27 }
  0xed   : > { %v1089_v10 = vsel %vm459_vm2, %v1079_v14, %v1088_v31  ;;  %345 = vst.msk [vmem:[#allocation2 + $0x18] sm:$0xff] %vm341_vm12, %v1536_v27  ;;  %v1046_v14 = vrot.slane %v1674_v23, 5 }
  0xef   : > { %v1065_v12 = vld.sshfl [vmem:[#allocation1] sm:$0xff pattern:$0x73625140] }
  0xf0   : > { %v1068_v30 = vld.sshfl [vmem:[#allocation1 + $0x20] sm:$0xff pattern:$0x73625140]  ;;  %1070 = vst [vmem:[#allocation1] ss:$4 sm:$0xff] %v1641_v54  ;;  %v1080_v28 = vunpack.c.l.b16 %v1065_v12  ;;  %v1041_v54 = vsel %vm459_vm2, %v1644_v57, %v1040_v52  ;;  %v1048_v52 = vrot.slane %v1683_v34, 4 }
  0xf1   : > { %1073 = vst [vmem:[#allocation1 + $0x20] ss:$4 sm:$0xff] %v1647_v58  ;;  %v1081_v15 = vunpack.c.l.b16 %v1068_v30  ;;  %v1043_v1 = vsel %vm462_vm3, %v1042_v11, %v1041_v54 }
  0xf2   : > { %v1090_v22 = vrot.slane %v1080_v28, 7  ;;  %v1045_v31 = vsel %vm465_vm4, %v1044_v29, %v1043_v1  ;;  %v1537_v29 = vmov 0.0  }
  0xf3   : > { %v1092_v32 = vrot.slane %v1081_v15, 6  ;;  %347 = vst.msk [vmem:[#allocation3 + $0x8] sm:$0xff] %vm341_vm12, %v1537_v29 }
  0xf4   : > { %v1091_v58 = vsel %vm462_vm3, %v1090_v22, %v1089_v10  ;;  %v1047_v10 = vsel %vm468_vm5, %v1046_v14, %v1045_v31  ;;  %346 = vst.msk [vmem:[#allocation3] sm:$0xff] %vm341_vm12, %v1537_v29 }
  0xf5   : > { %v1093_v13 = vsel %vm465_vm4, %v1092_v32, %v1091_v58  ;;  %348 = vst.msk [vmem:[#allocation3 + $0x10] sm:$0xff] %vm341_vm12, %v1537_v29 }
  0xf6   : > { %349 = vst.msk [vmem:[#allocation3 + $0x18] sm:$0xff] %vm341_vm12, %v1537_v29 }
  0xf7   : > { %v1071_v30 = vld.sshfl [vmem:[#allocation1] sm:$0xff pattern:$0x73625140]  ;;  %351 = vst.msk [vmem:[#allocation4] sm:$0xff] %vm350_vm7, %v1537_v29 }
  0xf8   : > { %v1074_v39 = vld.sshfl [vmem:[#allocation1 + $0x20] sm:$0xff pattern:$0x73625140]  ;;  %v1082_v0 = vunpack.c.l.b16 %v1071_v30  ;;  %1153 = vst [vmem:[#allocation1] ss:$4 sm:$0xff] %v1671_v21 }
  0xf9   : > { %v1083_v9 = vunpack.c.l.b16 %v1074_v39  ;;  %1157 = vst [vmem:[#allocation1 + $0x20] ss:$4 sm:$0xff] %v1677_v24  ;;  %v1049_v24 = vsel %vm471_vm6, %v1048_v52, %v1047_v10  ;;  %v1905_v39 = vld [vmem:[#allocation2] sm:$0xff]  ;;  %v617_v52 = vunpack.c.l.b16 %v1701_v51  ;;  %v618_v10 = vunpack.c.l.b16 %v1712_v59 }
  0xfa   : > { %v1094_v12 = vrot.slane %v1082_v0, 5  ;;  %v1050_v27 = vpack.c.b16 %v1049_v24, %v1049_v24  ;;  %352 = vst.msk [vmem:[#allocation4 + $0x8] sm:$0xff] %vm350_vm7, %v1537_v29  ;;  %v619_v24 = vunpack.c.l.b16 %v1715_v60  ;;  %v623_v59 = vunpack.c.l.b16 %v1733_v4 }
  0xfb   : > { %v1096_v28 = vrot.slane %v1083_v9, 4  ;;  %353 = vst.msk [vmem:[#allocation4 + $0x10] sm:$0xff] %vm350_vm7, %v1537_v29 }
  0xfc   : > { %v1095_v15 = vsel %vm468_vm5, %v1094_v12, %v1093_v13  ;;  %354 = vst.msk [vmem:[#allocation4 + $0x18] sm:$0xff] %vm350_vm7, %v1537_v29  ;;  %v1915_v13 = vld [vmem:[#allocation2 + $0x8] sm:$0xff] }
  0xfd   : > { %v1097_v22 = vsel %vm471_vm6, %v1096_v28, %v1095_v15 }
  0xfe   : > { %v1098_v21 = vpack.c.b16 %v1097_v22, %v1097_v22 }
 0x100   : > { %v1103_v11 = vsel %vm350_vm7, %v1098_v21, 0 }
 0x101   : > { %1112 = vmatpush.bf16.xpose.msrb.mxu0 %v1103_v11  ;;  %v616_v11 = vunpack.c.l.b16 %v1698_v48 }
 0x105   : > { %v740_v32 = vpop.f32.mrf.mxu2 }
 0x106   : > { %v1893_v54 = vsel %vm1827_vm11, -1e+30, %v740_v32  ;;  %v620_v32 = vunpack.c.l.b16 %v1725_v63 }
 0x107   : > { %v747_v58 = vsel %vm350_vm7, %v1893_v54, -inf }
 0x108   : > { %1447 = vmatmul.msk.bf16.vlgmr.msrb.gmra.mxu0 %vm350_vm7, %v1050_v27  ;;  %748 = vmax.xlane.f32.xlu1 %v747_v58  ;;  %v624_v27 = vrot.slane %v617_v52, 7  ;;  %v626_v58 = vrot.slane %v618_v10, 6 }
 0x10a   : > { %v625_v29 = vsel %vm453_vm0, %v624_v27, %v616_v11  ;;  %v889_v11 = vunpack.c.l.b16 %v1793_v40  ;;  %v892_v27 = vunpack.c.l.b16 %v1801_v44  ;;  %v895_v40 = vunpack.c.l.b16 %v1815_v5 }
 0x10b   : > { %v627_v51 = vsel %vm456_vm1, %v626_v58, %v625_v29  ;;  %v893_v29 = vunpack.c.l.b16 %v1805_v45 }
 0x10c   : > { %v907_v45 = vrot.slane %v895_v40, 4 }
 0x10d   : > { %v742_v30 = vpop.f32.mrf.mxu2 }
 0x10e   : > { %v621_v30 = vunpack.c.l.b16 %v1727_v2 }
 0x135   : > { %v554_v0 = vpop.xlane.xlu0 %553 }
 0x136   : > { %v1908_v1 = vmax.f32 %v1905_v39, %v554_v0  ;;  %v628_v0 = vrot.slane %v619_v24, 5  ;;  %v890_v24 = vunpack.c.l.b16 %v1795_v41  ;;  %v896_v41 = vunpack.c.l.b16 %v1817_v8 }
 0x138   : > { %v556_v9 = vsub.f32 %v1905_v39, %v1908_v1  ;;  %661 = vst.msk [vmem:[#allocation2] sm:$0xff] %vm341_vm12, %v1908_v1  ;;  %561 = vperm.xlu0 %1484, %v1908_v1   ;;  %v629_v48 = vsel %vm459_vm2, %v628_v0, %v627_v51  ;;  %v898_v58 = vrot.slane %v890_v24, 1  ;;  %v894_v0 = vunpack.c.l.b16 %v1807_v49 }
 0x139   : > { %v901_v51 = vrot.slane %v892_v27, 7  ;;  %v853_v24 = vrot.slane %v1644_v57, 7  ;;  %v855_v27 = vrot.slane %v1654_v6, 6  ;;  %v861_v57 = vrot.slane %v1683_v34, 3 }
 0x17b   : > { %v749_v28 = vpop.xlane.xlu1 %748 }
 0x17c   : > { %v1924_v15 = vmax.f32 %v1915_v13, %v749_v28  ;;  %v630_v28 = vrot.slane %v620_v32, 4  ;;  %v897_v32 = vrot.slane %v889_v11, 2 }
 0x17e   : > { %v751_v22 = vsub.f32 %v1915_v13, %v1924_v15  ;;  %848 = vst.msk [vmem:[#allocation2 + $0x8] sm:$0xff] %vm341_vm12, %v1924_v15  ;;  %v631_v60 = vsel %vm462_vm3, %v630_v28, %v629_v48  ;;  %v905_v48 = vrot.slane %v894_v0, 5 }
 0x180   : > { %v752_v20 = vmul.f32 1.442695, %v751_v22 }
 0x185   : > { %v1114_v12 = vpop.f32.mrf.mxu0 }
 0x186   : > { %v1919_v14 = vsel %vm1827_vm11, -1e+30, %v1114_v12  ;;  %v622_v12 = vunpack.c.l.b16 %v1731_v3 }
 0x187   : > { %v1121_v31 = vsel %vm350_vm7, %v1919_v14, -inf }
 0x188   : > { %1122 = vmax.xlane.f32.xlu2 %v1121_v31  ;;  %v632_v31 = vrot.slane %v621_v30, 3  ;;  %v634_v52 = vrot.slane %v622_v12, 2  ;;  %v891_v30 = vunpack.c.l.b16 %v1799_v42  ;;  %v899_v12 = vsel %vm453_vm0, %v898_v58, %v897_v32 }
 0x18a   : > { %v633_v63 = vsel %vm465_vm4, %v632_v31, %v631_v60  ;;  %v900_v28 = vsel %vm456_vm1, %v891_v30, %v899_v12  ;;  %v909_v31 = vrot.slane %v896_v41, 3  ;;  %v1981_v12 = vld [vmem:[#allocation2 + $0x18] sm:$0xff] }
 0x18b   : > { %v635_v2 = vsel %vm468_vm5, %v634_v52, %v633_v63  ;;  %v902_v44 = vsel %vm459_vm2, %v901_v51, %v900_v28 }
 0x18d   : > { %v1116_v21 = vpop.f32.mrf.mxu0 }
 0x18e   : > { %v636_v21 = vrot.slane %v623_v59, 1  ;;  %v903_v59 = vrot.slane %v893_v29, 6 }
 0x190   : > { %v637_v10 = vsel %vm471_vm6, %v636_v21, %v635_v2  ;;  %v904_v42 = vsel %vm462_vm3, %v903_v59, %v902_v44  ;;  %v849_v2 = vrot.slane %v1637_v50, 2  ;;  %v859_v50 = vrot.slane %v1674_v23, 4 }
 0x191   : > { %v638_v3 = vpack.c.b16 %v637_v10, %v637_v10  ;;  %v906_v49 = vsel %vm465_vm4, %v905_v48, %v904_v42  ;;  %v850_v10 = vrot.slane %v1631_v38, 1  ;;  %v804_v44 = vunpack.c.l.b16 %v1752_v53 }
 0x192   : > { %v908_v60 = vsel %vm468_vm5, %v907_v45, %v906_v49  ;;  %v806_v48 = vunpack.c.l.b16 %v1768_v19  ;;  %v805_v42 = vunpack.c.l.b16 %v1755_v7  ;;  %v807_v45 = vunpack.c.l.b16 %v1772_v25 }
 0x193   : > { %v644_v4 = vsel %vm642_vm13, %v638_v3, 0  ;;  %v910_v5 = vsel %vm471_vm6, %v909_v31, %v908_v60  ;;  %v851_v11 = vsel %vm453_vm0, %v850_v10, %v849_v2  ;;  %v812_v31 = vrot.slane %v804_v44, 1 }
 0x194   : > { %653 = vmatpush.bf16.msra.mxu1 %v644_v4  ;;  %v911_v52 = vpack.c.b16 %v910_v5, %v910_v5  ;;  %v852_v4 = vsel %vm456_vm1, %v1635_v47, %v851_v11  ;;  %v808_v49 = vunpack.c.l.b16 %v1781_v33  ;;  %v814_v60 = vrot.slane %v806_v48, 7 }
 0x195   : > { %v854_v58 = vsel %vm459_vm2, %v853_v24, %v852_v4  ;;  %v813_v5 = vsel %vm453_vm0, %v805_v42, %v812_v31  ;;  %v811_v19 = vunpack.c.l.b16 %v1789_v37  ;;  %v1154_v37 = vld.sshfl [vmem:[#allocation1] sm:$0xff pattern:$0x73625140] }
 0x196   : > { %v916_v8 = vsel %vm350_vm7, %v911_v52, 0  ;;  %v856_v38 = vsel %vm462_vm3, %v855_v27, %v854_v58  ;;  %v816_v52 = vrot.slane %v807_v45, 6  ;;  %v818_v53 = vrot.slane %v808_v49, 5  ;;  %v1158_v27 = vld.sshfl [vmem:[#allocation1 + $0x20] sm:$0xff pattern:$0x73625140] }
 0x197   : > { %v824_v10 = vrot.slane %v811_v19, 2  ;;  %1160 = vst [vmem:[#allocation1] ss:$4 sm:$0xff] %v1692_v43 }
 0x198   : > { %925 = vmatpush.bf16.xpose.msrb.mxu1 %v916_v8  ;;  %v810_v8 = vunpack.c.l.b16 %v1787_v36  ;;  %1163 = vst [vmem:[#allocation1 + $0x20] ss:$4 sm:$0xff] %v1696_v46 }
 0x19a   : > { %v822_v2 = vrot.slane %v810_v8, 3 }
 0x19e   : > { %v1161_v58 = vld.sshfl [vmem:[#allocation1] sm:$0xff pattern:$0x73625140] }
 0x19f   : > { %1166 = vst [vmem:[#allocation1] ss:$4 sm:$0xff] %v1707_v55  ;;  %v1180_v43 = vunpack.c.l.b16 %v1161_v58 }
 0x1a0   : > { %756 = vperm.xlu2 %1485, %v1924_v15   ;;  %v567_v15 = vld [vmem:[#allocation3] sm:$0xff] }
 0x1aa   : > { %v562_v63 = vpop.permute.xlu0 %561 }
 0x1ab   : > { %v564_v21 = vsub.f32 %v1833_v26, %v562_v63  ;;  %v857_v26 = vrot.slane %v1666_v16, 5  ;;  %v815_v63 = vsel %vm456_vm1, %v814_v60, %v813_v5 }
 0x1ac   : > { %v817_v7 = vsel %vm459_vm2, %v816_v52, %v815_v63 }
 0x1ad   : > { %v565_v3 = vmul.f32 1.442695, %v564_v21  ;;  %v858_v29 = vsel %vm465_vm4, %v857_v26, %v856_v38  ;;  %v819_v25 = vsel %vm462_vm3, %v818_v53, %v817_v7  ;;  %v1178_v38 = vunpack.c.l.b16 %v1154_v37 }
 0x1ae   : > { %v860_v47 = vsel %vm468_vm5, %v859_v50, %v858_v29  ;;  %v1179_v50 = vunpack.c.l.b16 %v1158_v27 }
 0x1af   : > { %1487 = vpow2.f32 %v565_v3  ;;  %v862_v6 = vsel %vm471_vm6, %v861_v57, %v860_v47  ;;  %v1186_v46 = vrot.slane %v1178_v38, 3 }
 0x1b0   : > { %v863_v0 = vpack.c.b16 %v862_v6, %v862_v6  ;;  %v1187_v57 = vrot.slane %v1179_v50, 2  ;;  %v1189_v6 = vrot.slane %v1180_v43, 1 }
 0x1b5   : > { %v1488_v32 = vpop.eup %1487 }
 0x1b6   : > { %v582_v30 = vpack.c.bf16 %v1488_v32, %v1488_v32  ;;  %v569_v36 = vsel %vm350_vm7, %v1488_v32, 0.0  ;;  %v1167_v32 = vld.sshfl [vmem:[#allocation1] sm:$0xff pattern:$0x73625140] }
 0x1b7   : > { %1172 = vst [vmem:[#allocation1] ss:$4 sm:$0xff] %v1720_v61  ;;  %v1182_v47 = vunpack.c.l.b16 %v1167_v32  ;;  %v933_v32 = vld [vmem:[#allocation2 + $0x10] sm:$0xff] }
 0x1b8   : > { %1442 = vmatmul.msk.bf16.vlgmr.msra.gmra.mxu1 %vm350_vm7, %v582_v30  ;;  %v1164_v30 = vld.sshfl [vmem:[#allocation1 + $0x20] sm:$0xff pattern:$0x73625140] }
 0x1b9   : > { %1169 = vst [vmem:[#allocation1 + $0x20] ss:$4 sm:$0xff] %v1710_v56  ;;  %v1188_v56 = vsel %vm453_vm0, %v1187_v57, %v1186_v46  ;;  %v1137_v57 = vld [vmem:[#allocation3 + $0x18] sm:$0xff] }
 0x1ba   : > { %v1190_v61 = vsel %vm456_vm1, %v1189_v6, %v1188_v56 }
 0x1c0   : > { %v1170_v26 = vld.sshfl [vmem:[#allocation1 + $0x20] sm:$0xff pattern:$0x73625140] }
 0x1c1   : > { %1175 = vst [vmem:[#allocation1 + $0x20] ss:$4 sm:$0xff] %v1723_v62  ;;  %v1183_v55 = vunpack.c.l.b16 %v1170_v26 }
 0x1c8   : > { %1445 = vmatmul.msk.bf16.vlgmr.msrb.gmra.mxu1 %vm350_vm7, %v863_v0  ;;  %v1173_v0 = vld.sshfl [vmem:[#allocation1] sm:$0xff pattern:$0x73625140] }
 0x1fb   : > { %v1123_v16 = vpop.xlane.xlu2 %1122 }
 0x1fc   : > { %v1984_v51 = vmax.f32 %v1981_v12, %v1123_v16  ;;  %v1181_v16 = vunpack.c.l.b16 %v1164_v30 }
 0x1fe   : > { %v1125_v23 = vsub.f32 %v1981_v12, %v1984_v51  ;;  %1222 = vst.msk [vmem:[#allocation2 + $0x18] sm:$0xff] %vm341_vm12, %v1984_v51  ;;  %1130 = vperm.xlu2 %1485, %v1984_v51  }
 0x200   : > { %v1126_v38 = vmul.f32 1.442695, %v1125_v23 }
 0x203   : > { %v757_v34 = vpop.permute.xlu2 %756 }
 0x204   : > { %v759_v40 = vsub.f32 %v1893_v54, %v757_v34  ;;  %v809_v54 = vunpack.c.l.b16 %v1783_v35  ;;  %v1176_v34 = vld.sshfl [vmem:[#allocation1 + $0x20] sm:$0xff pattern:$0x73625140] }
 0x205   : > { %v1185_v62 = vunpack.c.l.b16 %v1176_v34 }
 0x206   : > { %v760_v41 = vmul.f32 1.442695, %v759_v40  ;;  %v820_v21 = vrot.slane %v809_v54, 4  ;;  %v1184_v40 = vunpack.c.l.b16 %v1173_v0 }
 0x207   : > { %v1198_v45 = vrot.slane %v1185_v62, 4 }
 0x208   : > { %1489 = vpow2.f32 %v760_v41  ;;  %v821_v33 = vsel %vm465_vm4, %v820_v21, %v819_v25  ;;  %v1192_v41 = vrot.slane %v1182_v47, 7  ;;  %v1196_v48 = vrot.slane %v1184_v40, 5 }
 0x209   : > { %v823_v35 = vsel %vm468_vm5, %v822_v2, %v821_v33 }
 0x20a   : > { %v825_v3 = vsel %vm471_vm6, %v824_v10, %v823_v35  ;;  %v763_v35 = vld [vmem:[#allocation3 + $0x8] sm:$0xff] }
 0x20b   : > { %v826_v11 = vpack.c.b16 %v825_v3, %v825_v3 }
 0x20d   : > { %v831_v24 = vsel %vm642_vm13, %v826_v11, 0 }
 0x20e   : > { %v1490_v28 = vpop.eup %1489  ;;  %840 = vmatpush.bf16.msra.mxu3 %v831_v24 }
 0x20f   : > { %v765_v59 = vsel %vm350_vm7, %v1490_v28, 0.0  ;;  %v778_v4 = vpack.c.bf16 %v1490_v28, %v1490_v28  ;;  %v1191_v28 = vsel %vm459_vm2, %v1181_v16, %v1190_v61 }
 0x210   : > { %766 = vadd.xlane.f32.xlu0 %v765_v59  ;;  %v1194_v59 = vrot.slane %v1183_v55, 6  ;;  %v1193_v44 = vsel %vm462_vm3, %v1192_v41, %v1191_v28  ;;  %v771_v55 = vld [vmem:[#allocation4 + $0x8] sm:$0xff] }
 0x211   : > { %1444 = vmatmul.msk.bf16.vlgmr.msra.gmra.mxu3 %vm350_vm7, %v778_v4 }
 0x212   : > { %v1195_v42 = vsel %vm465_vm4, %v1194_v59, %v1193_v44 }
 0x213   : > { %v1197_v49 = vsel %vm468_vm5, %v1196_v48, %v1195_v42  ;;  %v991_v42 = vunpack.c.l.b16 %v1821_v17 }
 0x214   : > { %v1199_v60 = vsel %vm471_vm6, %v1198_v45, %v1197_v49  ;;  %v992_v45 = vunpack.c.l.b16 %v1823_v18 }
 0x215   : > { %v1200_v54 = vpack.c.b16 %v1199_v60, %v1199_v60  ;;  %v999_v60 = vrot.slane %v991_v42, 2 }
 0x217   : > { %v1205_v5 = vsel %vm642_vm13, %v1200_v54, 0  ;;  %v1000_v54 = vrot.slane %v992_v45, 1 }
 0x218   : > { %1214 = vmatpush.bf16.msrb.mxu2 %v1205_v5  ;;  %v2113_v5 = vld [vmem:[#allocation5_spill] sm:$0xff] }
 0x227   : > { %570 = vadd.xlane.f32.xlu2 %v569_v36  ;;  %v557_v36 = vmul.f32 1.442695, %v556_v9 }
 0x235   : > { %v2017_v29 = vpop.f32.mrf.mxu1 }
 0x23d   : > { %v657_v31 = vpop.f32.mrf.mxu1 }
 0x23e   : > { %v2112_v31 = vld [vmem:[#allocation6_spill] sm:$0xff] }
 0x23f   : > { %v994_v49 = vunpack.c.l.b16 %v2112_v31 }
 0x245   : > { %v927_v52 = vpop.f32.mrf.mxu1 }
 0x246   : > { %v2029_v8 = vsel %vm1827_vm11, -1e+30, %v927_v52  ;;  %v993_v52 = vunpack.c.l.b16 %v2113_v5 }
 0x247   : > { %v934_v63 = vsel %vm350_vm7, %v2029_v8, -inf }
 0x248   : > { %935 = vmax.xlane.f32.xlu1 %v934_v63  ;;  %v2114_v63 = vld [vmem:[#allocation7_spill] sm:$0xff] }
 0x24d   : > { %v929_v53 = vpop.f32.mrf.mxu1 }
 0x24e   : > { %v995_v53 = vunpack.c.l.b16 %v2114_v63 }
 0x250   : > { %v1005_v17 = vrot.slane %v995_v53, 6 }
 0x258   : > { %v1131_v19 = vpop.permute.xlu2 %1130 }
 0x259   : > { %v1133_v7 = vsub.f32 %v1919_v14, %v1131_v19  ;;  %v2115_v19 = vld [vmem:[#allocation8_spill] sm:$0xff] }
 0x25b   : > { %v1134_v21 = vmul.f32 1.442695, %v1133_v7  ;;  %v996_v7 = vunpack.c.l.b16 %v2115_v19 }
 0x25d   : > { %1491 = vpow2.f32 %v1134_v21  ;;  %v1001_v21 = vsel %vm453_vm0, %v1000_v54, %v999_v60  ;;  %vm1291_vm0 = vcmask 257024  }
 0x25e   : > { %1493 = vpow2.f32 %v752_v20  ;;  %v1002_v20 = vsel %vm456_vm1, %v993_v52, %v1001_v21 }
 0x263   : > { %v1492_v25 = vpop.eup %1491 }
 0x264   : > { %v1139_v2 = vsel %vm350_vm7, %v1492_v25, 0.0  ;;  %v1152_v33 = vpack.c.bf16 %v1492_v25, %v1492_v25  ;;  %v1494_v10 = vpop.eup %1493  ;;  %v1003_v25 = vrot.slane %v994_v49, 7 }
 0x265   : > { %1140 = vadd.xlane.f32.xlu2 %v1139_v2  ;;  %v764_v3 = vmul.f32 %v1494_v10, %v763_v35  ;;  %v2116_v2 = vld [vmem:[#allocation9_spill] sm:$0xff] }
 0x266   : > { %1448 = vmatmul.msk.bf16.vlgmr.msrb.gmra.mxu2 %vm350_vm7, %v1152_v33  ;;  %v997_v33 = vunpack.c.l.b16 %v2116_v2  ;;  %v1004_v35 = vsel %vm459_vm2, %v1003_v25, %v1002_v20 }
 0x27d   : > { %774 = vperm.xlu2 %1485, %v1494_v10   ;;  %v2117_v10 = vld [vmem:[#allocation10_spill] sm:$0xff] }
 0x27e   : > { %v998_v18 = vunpack.c.l.b16 %v2117_v10 }
 0x283   : > { %v767_v11 = vpop.xlane.xlu0 %766 }
 0x284   : > { %v768_v14 = vadd.f32 %v767_v11, %v764_v3  ;;  %v1007_v3 = vrot.slane %v996_v7, 5  ;;  %v1006_v11 = vsel %vm462_vm3, %v1005_v17, %v1004_v35 }
 0x286   : > { %769 = vst.msk [vmem:[#allocation3 + $0x8] sm:$0xff] %vm341_vm12, %v768_v14  ;;  %v1009_v14 = vrot.slane %v997_v33, 4 }
 0x28d   : > { %v1236_v24 = vld [vmem:[#allocation3 + $0x8] sm:$0xff] }
 0x28e   : > { %1495 = vrcp.f32 %v1236_v24  ;;  %v1011_v24 = vrot.slane %v998_v18, 3 }
 0x28f   : > { %1497 = vpow2.f32 %v557_v36  ;;  %v1008_v36 = vsel %vm465_vm4, %v1007_v3, %v1006_v11 }
 0x294   : > { %v1496_v4 = vpop.eup %1495  ;;  %v842_v58 = vpop.f32.mrf.mxu3 }
 0x295   : > { %1241 = vperm.xlu2 %1485, %v1496_v4   ;;  %v2043_v13 = vpop.eup %1497  ;;  %v1010_v4 = vsel %vm468_vm5, %v1009_v14, %v1008_v36 }
 0x296   : > { %v568_v22 = vmul.f32 %v2043_v13, %v567_v15  ;;  %v1012_v15 = vsel %vm471_vm6, %v1011_v24, %v1010_v4 }
 0x29a   : > { %v571_v37 = vpop.xlane.xlu2 %570 }
 0x29b   : > { %v572_v27 = vadd.f32 %v571_v37, %v568_v22  ;;  %v1013_v22 = vpack.c.b16 %v1012_v15, %v1012_v15 }
 0x29c   : > { %v844_v30 = vpop.f32.mrf.mxu3 }
 0x29d   : > { %574 = vst.msk [vmem:[#allocation3] sm:$0xff] %vm341_vm12, %v572_v27  ;;  %v1018_v37 = vsel %vm642_vm13, %v1013_v22, 0 }
 0x29e   : > { %1027 = vmatpush.bf16.msrb.mxu3 %v1018_v37 }
 0x2a4   : > { %v1226_v50 = vld [vmem:[#allocation3] sm:$0xff] }
 0x2bb   : > { %v936_v26 = vpop.xlane.xlu1 %935 }
 0x2bc   : > { %v937_v39 = vmax.f32 %v933_v32, %v936_v26 }
 0x2be   : > { %v938_v1 = vsub.f32 %v933_v32, %v937_v39  ;;  %1035 = vst.msk [vmem:[#allocation2 + $0x10] sm:$0xff] %vm341_vm12, %v937_v39  ;;  %943 = vperm.xlu1 %1486, %v937_v39  }
 0x2c0   : > { %v939_v9 = vmul.f32 1.442695, %v938_v1  ;;  %v950_v1 = vld [vmem:[#allocation3 + $0x10] sm:$0xff] }
 0x2c2   : > { %1499 = vpow2.f32 %v939_v9 }
 0x2c3   : > { %1501 = vpow2.f32 %v1126_v38 }
 0x2c4   : > { %1503 = vrcp.f32 %v1226_v50 }
 0x2c8   : > { %v2051_v43 = vpop.eup %1499 }
 0x2c9   : > { %961 = vperm.xlu0 %1484, %v2051_v43   ;;  %v1502_v46 = vpop.eup %1501  ;;  %v951_v9 = vmul.f32 %v2051_v43, %v950_v1 }
 0x2ca   : > { %v1138_v47 = vmul.f32 %v1502_v46, %v1137_v57  ;;  %v1504_v6 = vpop.eup %1503  ;;  %v958_v57 = vld [vmem:[#allocation4 + $0x10] sm:$0xff] }
 0x2d1   : > { %1231 = vperm.xlu0 %1484, %v1504_v6  }
 0x2d8   : > { %v1141_v0 = vpop.xlane.xlu2 %1140 }
 0x2d9   : > { %v1142_v16 = vadd.f32 %v1141_v0, %v1138_v47 }
 0x2db   : > { %1143 = vst.msk [vmem:[#allocation3 + $0x18] sm:$0xff] %vm341_vm12, %v1142_v16 }
 0x2e0   : > { %v775_v12 = vpop.permute.xlu2 %774 }
 0x2e1   : > { %v777_v51 = vmul.f32 %v775_v12, %v771_v55 }
 0x2e2   : > { %v1256_v23 = vld [vmem:[#allocation3 + $0x18] sm:$0xff] }
 0x2e3   : > { %v846_v56 = vadd.f32 %v842_v58, %v777_v51  ;;  %1505 = vrcp.f32 %v1256_v23  ;;  %v1145_v23 = vld [vmem:[#allocation4 + $0x18] sm:$0xff] }
 0x2e5   : > { %847 = vst.msk [vmem:[#allocation4 + $0x8] sm:$0xff] %vm350_vm7, %v846_v56 }
 0x2e9   : > { %v1506_v34 = vpop.eup %1505  ;;  %v2056_v40 = vpop.f32.mrf.mxu2 }
 0x2ea   : > { %1261 = vperm.xlu0 %1484, %v1506_v34  }
 0x2ec   : > { %v1238_v61 = vld [vmem:[#allocation4 + $0x8] sm:$0xff] }
 0x2ef   : > { %v1242_v41 = vpop.permute.xlu2 %1241 }
 0x2f0   : > { %v1244_v62 = vmul.f32 %v1242_v41, %v1238_v61 }
 0x2f1   : > { %v1218_v28 = vpop.f32.mrf.mxu2 }
 0x2f2   : > { %v1245_v59 = vpack.c.bf16 %v1244_v62, %v1244_v62 }
 0x2f4   : > { %v1267_v44 = vunpack.c.l.b16 %v1245_v59 }
 0x2f6   : > { %v1268_v48 = vpack.c.b16 %v1267_v44, %v1267_v44 }
 0x2f8   : > { %1269 = vrot.lane.b32.xlu2 %v1268_v48, %s1538_s6 }
 0x330   : > { %v944_v27 = vpop.permute.xlu1 %943 }
 0x331   : > { %v946_v58 = vsub.f32 %v2029_v8, %v944_v27 }
 0x333   : > { %v947_v30 = vmul.f32 1.442695, %v946_v58 }
 0x335   : > { %1507 = vpow2.f32 %v947_v30 }
 0x33b   : > { %v1508_v32 = vpop.eup %1507  ;;  %v962_v47 = vpop.permute.xlu0 %961 }
 0x33c   : > { %v952_v26 = vsel %vm350_vm7, %v1508_v32, 0.0  ;;  %v965_v39 = vpack.c.bf16 %v1508_v32, %v1508_v32  ;;  %v964_v6 = vmul.f32 %v962_v47, %v958_v57 }
 0x33d   : > { %953 = vadd.xlane.f32.xlu1 %v952_v26 }
 0x33e   : > { %1446 = vmatmul.msk.bf16.vlgmr.msrb.gmra.mxu3 %vm350_vm7, %v965_v39 }
 0x343   : > { %v1232_v41 = vpop.permute.xlu0 %1231 }
 0x352   : > { %v1270_v63 = vpop.permute.xlu2 %1269 }
 0x356   : > { %578 = vperm.xlu1 %1486, %v2043_v13   ;;  %v575_v13 = vld [vmem:[#allocation4] sm:$0xff] }
 0x35c   : > { %v1262_v62 = vpop.permute.xlu0 %1261 }
 0x35e   : > { %1148 = vperm.xlu1 %1486, %v1502_v46  }
 0x3b0   : > { %v954_v38 = vpop.xlane.xlu1 %953 }
 0x3b1   : > { %v955_v50 = vadd.f32 %v954_v38, %v951_v9 }
 0x3b3   : > { %956 = vst.msk [vmem:[#allocation3 + $0x10] sm:$0xff] %vm341_vm12, %v955_v50 }
 0x3ba   : > { %v1246_v8 = vld [vmem:[#allocation3 + $0x10] sm:$0xff] }
 0x3bb   : > { %1509 = vrcp.f32 %v1246_v8 }
 0x3c1   : > { %v1510_v0 = vpop.eup %1509  ;;  %v1029_v16 = vpop.f32.mrf.mxu3 }
 0x3c2   : > { %v1033_v55 = vadd.f32 %v1029_v16, %v964_v6  ;;  %1251 = vperm.xlu1 %1486, %v1510_v0  }
 0x3c4   : > { %1034 = vst.msk [vmem:[#allocation4 + $0x10] sm:$0xff] %vm350_vm7, %v1033_v55 }
 0x3c8   : > { %v579_v46 = vpop.permute.xlu1 %578 }
 0x3c9   : > { %v581_v12 = vmul.f32 %v579_v46, %v575_v13  ;;  %v1031_v51 = vpop.f32.mrf.mxu3 }
 0x3cb   : > { %v659_v43 = vadd.f32 %v2017_v29, %v581_v12  ;;  %v1248_v45 = vld [vmem:[#allocation4 + $0x10] sm:$0xff] }
 0x3cd   : > { %660 = vst.msk [vmem:[#allocation4] sm:$0xff] %vm350_vm7, %v659_v43 }
 0x3d0   : > { %v1149_v56 = vpop.permute.xlu1 %1148 }
 0x3d1   : > { %v1151_v34 = vmul.f32 %v1149_v56, %v1145_v23 }
 0x3d3   : > { %v1220_v61 = vadd.f32 %v2056_v40, %v1151_v34 }
 0x3d4   : > { %v1228_v40 = vld [vmem:[#allocation4] sm:$0xff] }
 0x3d5   : > { %1221 = vst.msk [vmem:[#allocation4 + $0x18] sm:$0xff] %vm350_vm7, %v1220_v61  ;;  %v1234_v5 = vmul.f32 %v1232_v41, %v1228_v40 }
 0x3d7   : > { %v1235_v52 = vpack.c.bf16 %v1234_v5, %v1234_v5 }
 0x3d9   : > { %v1283_v19 = vsel %vm350_vm7, %v1235_v52, %v1270_v63 }
 0x3dc   : > { %v1258_v28 = vld [vmem:[#allocation4 + $0x18] sm:$0xff] }
 0x3dd   : > { %v1264_v59 = vmul.f32 %v1262_v62, %v1258_v28 }
 0x3df   : > { %v1265_v44 = vpack.c.bf16 %v1264_v59, %v1264_v59 }
 0x3e1   : > { %v1277_v48 = vunpack.c.l.b16 %v1265_v44 }
 0x3e3   : > { %v1278_v42 = vpack.c.b16 %v1277_v48, %v1277_v48 }
 0x3e5   : > { %1279 = vrot.lane.b32.xlu0 %v1278_v42, %s1539_s7 }
 0x434   : > { %v1252_v29 = vpop.permute.xlu1 %1251 }
 0x435   : > { %v1254_v31 = vmul.f32 %v1252_v29, %v1248_v45 }
 0x437   : > { %v1255_v49 = vpack.c.bf16 %v1254_v31, %v1254_v31 }
 0x439   : > { %v1272_v60 = vunpack.c.l.b16 %v1255_v49 }
 0x43b   : > { %v1273_v54 = vpack.c.b16 %v1272_v60, %v1272_v60 }
 0x43d   : > { %1274 = vrot.lane.b32.xlu1 %v1273_v54, %s1540_s8 }
 0x457   : > { %v1280_v7 = vpop.permute.xlu0 %1279 }
 0x4af   : > { %v1275_v53 = vpop.permute.xlu1 %1274 }
 0x4b0   : > { %v1286_v21 = vsel %vm1284_vm14, %v1283_v19, %v1275_v53 }
 0x4b1   : > { %v1289_v25 = vsel %vm1287_vm15, %v1286_v21, %v1280_v7 }
 0x4b2   : > { %1292 = vst.msk [vmem:[%s335_s12] sm:$0xf] %vm1291_vm0, %v1289_v25 }
 0x4b3 PF: > { %s14_s17 = sadd.s32 1, %s1533_s17   ;;  %s2118_s15 = smov %s1529_s16 }
 0x4b4   : > { %p11_p5 = scmp.ge.s32.totalorder %s14_s17, 4   ;;  %s2119_s16 = smov %s2121_s18 }
 0x4b6   :  { %13 = sbr.rel (!%p11_p5) target bundleno = 2 (0x2), region = 100 }

// kernel: _lambda_.28
= control target key start
LH: loop header
LB: loop body
LE: loop exit
PB: predicated region body
PF: predicated region fallthrough
CT: control target
= control target key end

     0   :  { %vm57_vm0 = vcmask 261120   ;;  %vm112_vm1 = vcmask 523264   ;;  %v262_v27 = vmov 32.0   ;;  %vm203_vm7 = vcmask 257024   ;;  %s355_s1 = inlined_call_operand.vmem [shape: bf16[32,64], index: 1, kind: input, shape index: {}]   ;;  %s356_s3 = inlined_call_operand.vmem [shape: bf16[64,32], index: 3, kind: input, shape index: {}]   ;;  %s357_s2 = inlined_call_operand.vmem [shape: f32[1,64], index: 2, kind: input, shape index: {}]   ;;  %s358_s0 = inlined_call_operand.vmem [shape: bf16[16,32], index: 0, kind: input, shape index: {}, may-alias: {0,5}]   ;;  %s359_s4 = inlined_call_operand.vmem [shape: f32[1,32], index: 4, kind: input, shape index: {}]   ;;  %s360_s5 = inlined_call_operand.vmem [shape: bf16[16,32], index: 5, kind: input, shape index: {}, may-alias: {0,5}]   ;;  %s361_s6 = inlined_call_operand.vmem [shape: f32[1,32], index: 6, kind: input, shape index: {}]   ;;  %s362_s7 = inlined_call_operand.vmem [shape: f32[1,32], index: 7, kind: input, shape index: {}]   ;;  %s363_s8 = inlined_call_operand.vmem [shape: bf16[16,32], index: 8, kind: output, shape index: {}]  }
   0x1   :  { %v242_v0 = vld [vmem:[%s355_s1 + $0x8] sm:$0xff]  ;;  %v246_v1 = vld [vmem:[%s356_s3 + $0x18] sm:$0xff]  ;;  %v241_v2 = vld [vmem:[%s355_s1] sm:$0xff]  ;;  %256 = vrcp.f32 %v262_v27 }
   0x2   :  { %67 = vmatpush.bf16.msra.mxu0 %v242_v0  ;;  %120 = vmatpush.bf16.msra.mxu1 %v246_v1  ;;  %v240_v3 = vld [vmem:[%s358_s0] sm:$0xff]  ;;  %v245_v4 = vld [vmem:[%s356_s3 + $0x10] sm:$0xff]  ;;  %v244_v5 = vld [vmem:[%s356_s3 + $0x8] sm:$0xff] }
   0x3   :  { %v243_v6 = vld [vmem:[%s356_s3] sm:$0xff] }
   0x4   :  { %v252_v8 = vld [vmem:[%s357_s2] ss:$0 sm:$0xff] }
   0x5   :  { %v253_v13 = vld [vmem:[%s359_s4] ss:$0 sm:$0xff] }
   0x6   :  { %68 = vmatpush.bf16.msra.mxu0 %v241_v2  ;;  %121 = vmatpush.bf16.msra.mxu1 %v245_v4  ;;  %v248_v14 = vld [vmem:[%s360_s5] sm:$0xff]  }
   0x7   :  { %v249_v17 = vunpack.c.l.bf16 %v248_v14  ;;  %v250_v23 = vunpack.c.h.bf16 %v248_v14  ;;  %v257_v28 = vpop.eup %256  ;;  %v254_v58 = vld [vmem:[%s361_s6] ss:$0 sm:$0xff] }
   0x8   :  { %v145_v29 = vmul.f32 32.0, %v257_v28  ;;  %vm149_vm2 = vweird.f32 %v257_v28  ;;  %v255_v61 = vld [vmem:[%s362_s7] ss:$0 sm:$0xff] }
   0x9   :  { %222 = vmatmul.msk.bf16.vlgmr.msra.gmra.mxu0 %vm57_vm0, %v240_v3 }
   0xa   :  { %122 = vmatpush.bf16.msra.mxu1 %v244_v5  ;;  %v146_v30 = vsub.f32 1.0, %v145_v29 }
   0xc   :  { %v147_v31 = vmul.f32 %v257_v28, %v146_v30 }
   0xe   :  { %123 = vmatpush.bf16.msra.mxu1 %v243_v6  ;;  %v148_v32 = vadd.f32 %v257_v28, %v147_v31 }
  0x10   :  { %v150_v33 = vsel %vm149_vm2, %v257_v28, %v148_v32 }
  0x86   :  { %v70_v7 = vpop.f32.mrf.mxu0 }
  0x87   :  { %v71_v10 = vadd.f32 %v252_v8, %v70_v7 }
  0x8e   :  { %v72_v9 = vpop.f32.mrf.mxu0 }
  0x8f   :  { %v73_v11 = vadd.f32 %v252_v8, %v72_v9 }
  0x91   :  { %v75_v12 = vpack.c.bf16 %v73_v11, %v71_v10 }
  0x93   :  { %239 = vmatmul.msk.bf16.vlgmr.msra.gmra.mxu1 %vm112_vm1, %v75_v12 }
 0x110   :  { %v125_v15 = vpop.f32.mrf.mxu1 }
 0x111   :  { %v126_v16 = vadd.f32 %v253_v13, %v125_v15 }
 0x113   :  { %v130_v18 = vmax.f32 %v126_v16, 0.0 }
 0x115   :  { %v136_v19 = vadd.f32 %v249_v17, %v130_v18 }
 0x117   :  { %v138_v20 = vsel %vm57_vm0, %v136_v19, 0.0 }
 0x118   :  { %v127_v21 = vpop.f32.mrf.mxu1  ;;  %139 = vadd.xlane.f32.xlu0 %v138_v20 }
 0x119   :  { %v128_v22 = vadd.f32 %v253_v13, %v127_v21 }
 0x11b   :  { %v131_v24 = vmax.f32 %v128_v22, 0.0 }
 0x11d   :  { %v137_v25 = vadd.f32 %v250_v23, %v131_v24 }
 0x11f   :  { %v141_v26 = vsel %vm57_vm0, %v137_v25, 0.0 }
 0x120   :  { %142 = vadd.xlane.f32.xlu0 %v141_v26 }
 0x18b   :  { %v140_v34 = vpop.xlane.xlu0 %139 }
 0x18c   :  { %v151_v35 = vmul.f32 %v150_v33, %v140_v34 }
 0x18e   :  { %v153_v36 = vsub.f32 %v136_v19, %v151_v35 }
 0x190   :  { %v155_v37 = vmul.f32 %v153_v36, %v153_v36 }
 0x192   :  { %v157_v38 = vsel %vm57_vm0, %v155_v37, 0.0 }
 0x193   :  { %158 = vadd.xlane.f32.xlu1 %v157_v38  ;;  %v143_v39 = vpop.xlane.xlu0 %142 }
 0x194   :  { %v152_v40 = vmul.f32 %v150_v33, %v143_v39 }
 0x196   :  { %v154_v41 = vsub.f32 %v137_v25, %v152_v40 }
 0x198   :  { %v156_v42 = vmul.f32 %v154_v41, %v154_v41 }
 0x19a   :  { %v160_v43 = vsel %vm57_vm0, %v156_v42, 0.0 }
 0x19b   :  { %161 = vadd.xlane.f32.xlu1 %v160_v43 }
 0x206   :  { %v159_v44 = vpop.xlane.xlu1 %158 }
 0x207   :  { %v163_v45 = vmul.f32 %v159_v44, %v150_v33 }
 0x209   :  { %v165_v46 = vadd.f32 1e-05, %v163_v45 }
 0x20b   :  { %258 = vrsqrt.f32 %v165_v46  ;;  %vm173_vm4 = vweird.f32 %v165_v46 }
 0x20e   :  { %v162_v47 = vpop.xlane.xlu1 %161 }
 0x20f   :  { %v164_v48 = vmul.f32 %v162_v47, %v150_v33 }
 0x211   :  { %v259_v49 = vpop.eup %258  ;;  %v166_v50 = vadd.f32 1e-05, %v164_v48 }
 0x212   :  { %v168_v51 = vmul.f32 %v259_v49, %v165_v46  ;;  %vm174_vm3 = vweird.f32 %v259_v49 }
 0x213   :  { %260 = vrsqrt.f32 %v166_v50  ;;  %vm175_vm5 = vmor %vm173_vm4, %vm174_vm3  ;;  %vm183_vm8 = vweird.f32 %v166_v50 }
 0x214   :  { %v169_v52 = vmul.f32 %v259_v49, %v168_v51 }
 0x216   :  { %v170_v53 = vmul.f32 0.5, %v169_v52 }
 0x218   :  { %v171_v54 = vsub.f32 1.5, %v170_v53 }
 0x219   :  { %v261_v55 = vpop.eup %260 }
 0x21a   :  { %v172_v56 = vmul.f32 %v259_v49, %v171_v54  ;;  %v178_v57 = vmul.f32 %v261_v55, %v166_v50  ;;  %vm184_vm6 = vweird.f32 %v261_v55 }
 0x21b   :  { %vm185_vm9 = vmor %vm183_vm8, %vm184_vm6 }
 0x21c   :  { %v176_v59 = vsel %vm175_vm5, %v259_v49, %v172_v56  ;;  %v179_v60 = vmul.f32 %v261_v55, %v178_v57 }
 0x21d   :  { %v187_v62 = vmul.f32 %v176_v59, %v153_v36 }
 0x21e   :  { %v180_v63 = vmul.f32 0.5, %v179_v60 }
 0x21f   :  { %v193_v0 = vmul.f32 %v254_v58, %v187_v62 }
 0x220   :  { %v181_v1 = vsub.f32 1.5, %v180_v63 }
 0x221   :  { %v199_v2 = vadd.f32 %v255_v61, %v193_v0 }
 0x222   :  { %v182_v3 = vmul.f32 %v261_v55, %v181_v1 }
 0x223   :  { %v201_v4 = vpack.c.bf16 %v199_v2, %v199_v2 }
 0x224   :  { %v186_v5 = vsel %vm185_vm9, %v261_v55, %v182_v3 }
 0x225   :  { %204 = vst.msk [vmem:[%s363_s8] sm:$0xf] %vm203_vm7, %v201_v4  ;;  %v188_v6 = vmul.f32 %v186_v5, %v154_v41 }
 0x227   :  { %v194_v7 = vmul.f32 %v254_v58, %v188_v6 }
 0x229   :  { %v200_v8 = vadd.f32 %v255_v61, %v194_v7 }
 0x22b   :  { %v202_v9 = vpack.c.bf16 %v200_v8, %v200_v8 }
 0x22d   :  { %205 = vst.msk [vmem:[%s363_s8 + $0x4] sm:$0xf] %vm203_vm7, %v202_v9 }

// kernel: _lambda_.49
= control target key start
LH: loop header
LB: loop body
LE: loop exit
PB: predicated region body
PF: predicated region fallthrough
CT: control target
= control target key end

     0   :  { %vm20_vm0 = vcmask 195584   ;;  %v149_v1 = vmov 0.0   ;;  %s194_s0 = inlined_call_operand.vmem [shape: bf16[16,32], index: 0, kind: input, shape index: {}]   ;;  %s195_s1 = inlined_call_operand.vmem [shape: bf16[32,24], index: 1, kind: input, shape index: {}]   ;;  %s196_s2 = inlined_call_operand.vmem [shape: f32[1,24], index: 2, kind: input, shape index: {}]   ;;  %s197_s3 = inlined_call_operand.hbm [shape: f32[16,24], index: 3, kind: output, shape index: {}]  }
   0x1   :  { %v117_v0 = vld [vmem:[%s195_s1 + $0x8] sm:$0xff]  ;;  %21 = vst.msk [vmem:[#allocation2] sm:$0xff] %vm20_vm0, %v149_v1 }
   0x2   :  { %8 = vsyncpa [#allocation4], 0  ;;  %58 = vmatpush.bf16.msra.mxu0 %v117_v0  ;;  %v116_v2 = vld [vmem:[%s195_s1] sm:$0xff]  ;;  %22 = vst.msk [vmem:[#allocation2 + $0x8] sm:$0xff] %vm20_vm0, %v149_v1  ;;  %vm48_vm1 = vcmask 261120   ;;  %s90_s22 = sshll.u32 %s197_s3, 4  ;;  %s91_s22 = int_to_ptr.hbm [resolvable:$true] %s90_s22 }
   0x3   :  { %v115_v3 = vld [vmem:[%s194_s0] sm:$0xff]  ;;  %s150_s0 = smov [#allocation3]   ;;  %s152_s23 = smov 8  }
   0x4   :  { %v122_v8 = vld [vmem:[%s196_s2] ss:$0 sm:$0xff]  ;;  %s88_s1 = sshll.u32 %s150_s0, 4  ;;  %s151_s2 = smov 128   ;;  %s89_s1 = int_to_ptr.vmem [resolvable:$true] %s88_s1 }
   0x6   :  { %59 = vmatpush.bf16.msra.mxu0 %v116_v2 }
   0x8   :  { %v23_v4 = vld [vmem:[#allocation2] sm:$0xff] }
   0x9   :  { %114 = vmatmul.msk.bf16.vlgmr.msra.gmra.mxu0 %vm48_vm1, %v115_v3  ;;  %v24_v7 = vld [vmem:[#allocation2 + $0x8] sm:$0xff] }
  0x86   :  { %v61_v5 = vpop.f32.mrf.mxu0 }
  0x87   :  { %v66_v6 = vadd.f32 %v61_v5, %v23_v4 }
  0x89   :  { %69 = vst.msk [vmem:[#allocation2] sm:$0xff] %vm20_vm0, %v66_v6 }
  0x8e   :  { %v63_v9 = vpop.f32.mrf.mxu0 }
  0x8f   :  { %v67_v10 = vadd.f32 %v63_v9, %v24_v7 }
  0x90   :  { %v74_v11 = vld [vmem:[#allocation2] sm:$0xff] }
  0x91   :  { %70 = vst.msk [vmem:[#allocation2 + $0x8] sm:$0xff] %vm20_vm0, %v67_v10  ;;  %v80_v12 = vadd.f32 %v122_v8, %v74_v11 }
  0x93   :  { %82 = vst.msk [vmem:[#allocation3] sm:$0xff] %vm20_vm0, %v80_v12 }
  0x98   :  { %v75_v13 = vld [vmem:[#allocation2 + $0x8] sm:$0xff] }
  0x99   :  { %v81_v14 = vadd.f32 %v122_v8, %v75_v13 }
  0x9b   :  { %83 = vst.msk [vmem:[#allocation3 + $0x8] sm:$0xff] %vm20_vm0, %v81_v14 }
  0x9c   :  { %96 = dma.vmem_to_hbm [thread:$0]  %s89_s1, 256, %s91_s22, [#allocation4], %s151_s2, %s151_s2, %s152_s23  }
  0x9d   :  { %147 = dma.done.wait [#allocation4], 256  }
  0x9e   :  { %148 = vsyncadd [#allocation4], 4294967040 }
  0x9f   :  { %101 = vsyncpa [#allocation4], 1 }

// kernel: _lambda_.26
= control target key start
LH: loop header
LB: loop body
LE: loop exit
PB: predicated region body
PF: predicated region fallthrough
CT: control target
= control target key end

     0   :  { %s1554_s15 = smov 0   ;;  %s1556_s16 = smov 0   ;;  %s2087_s0 = inlined_call_operand.vmem [shape: bf16[2,8,4,8], index: 0, kind: input, shape index: {}]   ;;  %s2088_s1 = inlined_call_operand.vmem [shape: bf16[2,8,4,8], index: 1, kind: input, shape index: {}]   ;;  %s2089_s2 = inlined_call_operand.vmem [shape: bf16[2,8,4,8], index: 2, kind: input, shape index: {}]   ;;  %s2090_s3 = inlined_call_operand.vmem [shape: f32[2,1,8], index: 3, kind: input, shape index: {}]   ;;  %s2091_s4 = inlined_call_operand.vmem [shape: bf16[2,8,32], index: 4, kind: output, shape index: {}]  }
   0x1   :  { %s1558_s17 = smov 0  }
   0x2 LB: > { %s33_s18 = sadd.s32 1, %s1517_s16  ;;  %p1413_p0 = scmp.ge.s32.totalorder %s1521_s17, 1  ;;  %s1521_s17 = sphi %s1558_s17, %s14_s17   ;;  %s1517_s16 = sphi %s1556_s16, %s2107_s16   ;;  %s1513_s15 = sphi %s1554_s15, %s2106_s15  }
   0x3   : > { %p35_p1 = scmp.ge.s32.totalorder %s33_s18, 2  ;;  %p237_p2 = scmp.lt.s32.totalorder %s1521_s17, 3 }
   0x5   : > { %s2109_s18 = smov (%p35_p1, %s33_s18), 0  ;;  %p238_p3 = pnand %p1413_p0, %p237_p2 }
   0x7   : > { %241 = sbr.rel (%p238_p3) target bundleno = 1203 (0x4b3), region = 36 }
   0xc   : > { %p294_p4 = scmp.lt.s32.totalorder %s1513_s15, 1  ;;  %vm441_vm0 = vcmask 1041409   ;;  %vm444_vm1 = vcmask 1042434   ;;  %vm447_vm2 = vcmask 1043459   ;;  %vm450_vm3 = vcmask 1044484   ;;  %s1526_s6 = smov 8  }
   0xd   : > { %vm453_vm4 = vcmask 1045509   ;;  %vm456_vm5 = vcmask 1046534   ;;  %vm459_vm6 = vcmask 1047559   ;;  %vm350_vm7 = vcmask 64512   ;;  %s1527_s7 = smov 24   ;;  %s1528_s8 = smov 16  }
   0xe   : > { %s2111_s15 = smov (!%p294_p4, %s1513_s15), 1  ;;  %vm341_vm10 = vcmask 7168   ;;  %vm630_vm11 = vcmask 1043456   ;;  %vm1272_vm12 = vcmask 130048   ;;  %vm1275_vm13 = vcmask 195584  }
   0xf   : > { %s1575_s19 = sshll.u32 %s2111_s15, 4  ;;  %s328_s5 = scalar_lea.vmem %s2090_s3, %s2111_s15  ;;  %vm1279_vm14 = vcmask 257024  }
  0x10   : > { %s1581_s22 = scalar_lea.vmem %s2088_s1, %s1575_s19  ;;  %s1593_s25 = scalar_lea.vmem %s2087_s0, %s1575_s19 }
  0x11   : > { %v1584_v0 = vld [vmem:[%s1581_s22] sm:$0x3]  ;;  %v1587_v1 = vld [vmem:[%s1581_s22 + $0x2] sm:$0x3]  ;;  %v362_v4 = vld [vmem:[%s1593_s25 + $0x4] sm:$0x3]  ;;  %s1651_s28 = scalar_lea.vmem %s2089_s2, %s1575_s19 }
  0x12   : > { %463 = vst [vmem:[#allocation1] ss:$4 sm:$0xff] %v1584_v0  ;;  %v360_v2 = vld [vmem:[%s1593_s25] sm:$0x3]  ;;  %v361_v3 = vld [vmem:[%s1593_s25 + $0x2] sm:$0x3]  ;;  %v370_v8 = vunpack.c.l.bf16 %v362_v4 }
  0x13   : > { %468 = vst [vmem:[#allocation1 + $0x20] ss:$4 sm:$0xff] %v1587_v1  ;;  %v363_v5 = vld [vmem:[%s1593_s25 + $0x6] sm:$0x3]  ;;  %v369_v6 = vunpack.c.l.bf16 %v361_v3  ;;  %v368_v7 = vunpack.c.l.bf16 %v360_v2  ;;  %v1602_v9 = vld [vmem:[%s1581_s22 + $0x4] sm:$0x3] }
  0x14   : > { %v364_v10 = vld [vmem:[%s1593_s25 + $0x8] sm:$0x3]  ;;  %v371_v11 = vunpack.c.l.bf16 %v363_v5  ;;  %v1606_v13 = vld [vmem:[%s1581_s22 + $0x6] sm:$0x3]  ;;  %v365_v14 = vld [vmem:[%s1593_s25 + $0xa] sm:$0x3] }
  0x15   : > { %v377_v12 = vmul.f32 0.35355338, %v369_v6  ;;  %v378_v15 = vmul.f32 0.35355338, %v370_v8  ;;  %v376_v17 = vmul.f32 0.35355338, %v368_v7  ;;  %v372_v20 = vunpack.c.l.bf16 %v364_v10 }
  0x16   : > { %v379_v21 = vmul.f32 0.35355338, %v371_v11  ;;  %v366_v23 = vld [vmem:[%s1593_s25 + $0xc] sm:$0x3]  ;;  %v373_v24 = vunpack.c.l.bf16 %v365_v14  ;;  %v1613_v28 = vld [vmem:[%s1581_s22 + $0x8] sm:$0x3] }
  0x17   : > { %v385_v18 = vpack.c.bf16 %v377_v12, %v377_v12  ;;  %v386_v22 = vpack.c.bf16 %v378_v15, %v378_v15  ;;  %v384_v25 = vpack.c.bf16 %v376_v17, %v376_v17  ;;  %v380_v27 = vmul.f32 0.35355338, %v372_v20  ;;  %v1616_v31 = vld [vmem:[%s1581_s22 + $0xa] sm:$0x3]  ;;  %v367_v32 = vld [vmem:[%s1593_s25 + $0xe] sm:$0x3] }
  0x18   : > { %v387_v30 = vpack.c.bf16 %v379_v21, %v379_v21  ;;  %v374_v33 = vunpack.c.l.bf16 %v366_v23  ;;  %v381_v36 = vmul.f32 0.35355338, %v373_v24  ;;  %v375_v44 = vunpack.c.l.bf16 %v367_v32  ;;  %v1629_v54 = vld [vmem:[%s1581_s22 + $0xc] sm:$0x3]  ;;  %v1635_v58 = vld [vmem:[%s1581_s22 + $0xe] sm:$0x3] }
  0x19   : > { %v464_v16 = vld.sshfl [vmem:[#allocation1] sm:$0xff pattern:$0x73625140]  ;;  %v417_v26 = vunpack.c.l.b16 %v385_v18  ;;  %v418_v34 = vunpack.c.l.b16 %v386_v22  ;;  %v416_v37 = vunpack.c.l.b16 %v384_v25  ;;  %v388_v41 = vpack.c.bf16 %v380_v27, %v380_v27  ;;  %s1420_s9 = sshll.u32 %s2111_s15, 2 }
  0x1a   : > { %v469_v19 = vld.sshfl [vmem:[#allocation1 + $0x20] sm:$0xff pattern:$0x73625140]  ;;  %472 = vst [vmem:[#allocation1] ss:$4 sm:$0xff] %v1602_v9  ;;  %v495_v42 = vunpack.c.l.b16 %v464_v16  ;;  %v419_v45 = vunpack.c.l.b16 %v387_v30  ;;  %v389_v49 = vpack.c.bf16 %v381_v36, %v381_v36  ;;  %s335_s12 = scalar_lea.vmem %s2091_s4, %s1420_s9 }
  0x1b   : > { %476 = vst [vmem:[#allocation1 + $0x20] ss:$4 sm:$0xff] %v1606_v13  ;;  %v496_v29 = vunpack.c.l.b16 %v469_v19  ;;  %v1619_v38 = vunpack.i.l.s16 %v417_v26  ;;  %v382_v46 = vmul.f32 0.35355338, %v374_v33  ;;  %v1623_v47 = vunpack.i.l.s16 %v418_v34  ;;  %v1659_v21 = vld [vmem:[%s1651_s28] sm:$0x3] }
  0x1c   : > { %v1625_v50 = vunpack.i.l.s16 %v416_v37  ;;  %v420_v53 = vunpack.c.l.b16 %v388_v41  ;;  %v383_v56 = vmul.f32 0.35355338, %v375_v44  ;;  %v1632_v57 = vunpack.i.l.s16 %v419_v45  ;;  %v1665_v24 = vld [vmem:[%s1651_s28 + $0x2] sm:$0x3] }
  0x1d   : > { %v503_v43 = vrot.slane %v496_v29, 7  ;;  %v440_v51 = vrot.slane %v1619_v38, 7  ;;  %v390_v59 = vpack.c.bf16 %v382_v46, %v382_v46  ;;  %v443_v60 = vrot.slane %v1623_v47, 6  ;;  %v1684_v46 = vld [vmem:[%s1651_s28 + $0x6] sm:$0x3] }
  0x1e   : > { %v421_v63 = vunpack.c.l.b16 %v389_v49  ;;  %v1642_v6 = vunpack.i.l.s16 %v420_v53  ;;  %v391_v8 = vpack.c.bf16 %v383_v56, %v383_v56  ;;  %v446_v10 = vrot.slane %v1632_v57, 5  ;;  %v1698_v56 = vld [vmem:[%s1651_s28 + $0xa] sm:$0x3] }
  0x1f   : > { %v504_v55 = vsel %vm441_vm0, %v503_v43, %v495_v42  ;;  %v442_v2 = vsel %vm441_vm0, %v440_v51, %v1625_v50  ;;  %v422_v12 = vunpack.c.l.b16 %v390_v59  ;;  %v1680_v43 = vld [vmem:[%s1651_s28 + $0x4] sm:$0x3] }
  0x20   : > { %v445_v14 = vsel %vm444_vm1, %v443_v60, %v442_v2  ;;  %v1654_v16 = vunpack.i.l.s16 %v421_v63  ;;  %v449_v17 = vrot.slane %v1642_v6, 4  ;;  %v423_v19 = vunpack.c.l.b16 %v391_v8 }
  0x21   : > { %v473_v35 = vld.sshfl [vmem:[#allocation1] sm:$0xff pattern:$0x73625140]  ;;  %v448_v20 = vsel %vm447_vm2, %v446_v10, %v445_v14  ;;  %v1662_v23 = vunpack.i.l.s16 %v422_v12 }
  0x22   : > { %v477_v39 = vld.sshfl [vmem:[#allocation1 + $0x20] sm:$0xff pattern:$0x73625140]  ;;  %480 = vst [vmem:[#allocation1] ss:$4 sm:$0xff] %v1613_v28  ;;  %v497_v40 = vunpack.c.l.b16 %v473_v35  ;;  %v452_v26 = vrot.slane %v1654_v16, 3  ;;  %v451_v30 = vsel %vm450_vm3, %v449_v17, %v448_v20  ;;  %v1671_v34 = vunpack.i.l.s16 %v423_v19 }
  0x23   : > { %484 = vst [vmem:[#allocation1 + $0x20] ss:$4 sm:$0xff] %v1616_v31  ;;  %v498_v48 = vunpack.c.l.b16 %v477_v39  ;;  %v455_v36 = vrot.slane %v1662_v23, 2 }
  0x24   : > { %v505_v52 = vrot.slane %v497_v40, 6  ;;  %v454_v39 = vsel %vm453_vm4, %v452_v26, %v451_v30  ;;  %v458_v42 = vrot.slane %v1671_v34, 1 }
  0x25   : > { %v507_v62 = vrot.slane %v498_v48, 5  ;;  %v457_v45 = vsel %vm456_vm5, %v455_v36, %v454_v39 }
  0x26   : > { %v506_v5 = vsel %vm444_vm1, %v505_v52, %v504_v55  ;;  %v460_v52 = vsel %vm459_vm6, %v458_v42, %v457_v45  ;;  %v1695_v55 = vld [vmem:[%s1651_s28 + $0x8] sm:$0x3] }
  0x27   : > { %v508_v15 = vsel %vm447_vm2, %v507_v62, %v506_v5  ;;  %v461_v53 = vpack.c.b16 %v460_v52, %v460_v52  ;;  %v1711_v62 = vld [vmem:[%s1651_s28 + $0xe] sm:$0x3] }
  0x29   : > { %v481_v61 = vld.sshfl [vmem:[#allocation1] sm:$0xff pattern:$0x73625140] }
  0x2a   : > { %v485_v3 = vld.sshfl [vmem:[#allocation1 + $0x20] sm:$0xff pattern:$0x73625140]  ;;  %488 = vst [vmem:[#allocation1] ss:$4 sm:$0xff] %v1629_v54  ;;  %v499_v4 = vunpack.c.l.b16 %v481_v61 }
  0x2b   : > { %492 = vst [vmem:[#allocation1 + $0x20] ss:$4 sm:$0xff] %v1635_v58  ;;  %v500_v7 = vunpack.c.l.b16 %v485_v3  ;;  %v1708_v61 = vld [vmem:[%s1651_s28 + $0xc] sm:$0x3] }
  0x2c   : > { %v509_v11 = vrot.slane %v499_v4, 4 }
  0x2d   : > { %v511_v18 = vrot.slane %v500_v7, 3 }
  0x2e   : > { %v510_v22 = vsel %vm450_vm3, %v509_v11, %v508_v15 }
  0x2f   : > { %v512_v33 = vsel %vm453_vm4, %v511_v18, %v510_v22 }
  0x31   : > { %v489_v25 = vld.sshfl [vmem:[#allocation1] sm:$0xff pattern:$0x73625140] }
  0x32   : > { %v493_v27 = vld.sshfl [vmem:[#allocation1 + $0x20] sm:$0xff pattern:$0x73625140]  ;;  %v501_v29 = vunpack.c.l.b16 %v489_v25  ;;  %572 = vst [vmem:[#allocation1] ss:$4 sm:$0xff] %v1659_v21 }
  0x33   : > { %v502_v32 = vunpack.c.l.b16 %v493_v27  ;;  %577 = vst [vmem:[#allocation1 + $0x20] ss:$4 sm:$0xff] %v1665_v24 }
  0x34   : > { %v513_v35 = vrot.slane %v501_v29, 2 }
  0x35   : > { %v515_v37 = vrot.slane %v502_v32, 1 }
  0x36   : > { %v514_v40 = vsel %vm456_vm5, %v513_v35, %v512_v33 }
  0x37   : > { %v516_v41 = vsel %vm459_vm6, %v515_v37, %v514_v40 }
  0x38   : > { %v517_v44 = vpack.c.b16 %v516_v41, %v516_v41 }
  0x39   : > { %v1686_v48 = vld.sshfl [vmem:[#allocation1] sm:$0xff pattern:$0x73625140] }
  0x3a   : > { %v523_v49 = vsel %vm350_vm7, %v517_v44, 0  ;;  %v1689_v51 = vld.sshfl [vmem:[#allocation1 + $0x20] sm:$0xff pattern:$0x73625140]  ;;  %581 = vst [vmem:[#allocation1] ss:$4 sm:$0xff] %v1680_v43 }
  0x3b   : > { %532 = vmatpush.bf16.xpose.msra.mxu0 %v523_v49  ;;  %585 = vst [vmem:[#allocation1 + $0x20] ss:$4 sm:$0xff] %v1684_v46 }
  0x41   : > { %v1700_v59 = vld.sshfl [vmem:[#allocation1] sm:$0xff pattern:$0x73625140] }
  0x42   : > { %1429 = vmatmul.msk.bf16.vlgmr.msra.gmra.mxu0 %vm350_vm7, %v461_v53  ;;  %v1703_v60 = vld.sshfl [vmem:[#allocation1 + $0x20] sm:$0xff pattern:$0x73625140]  ;;  %589 = vst [vmem:[#allocation1] ss:$4 sm:$0xff] %v1695_v55 }
  0x43   : > { %593 = vst [vmem:[#allocation1 + $0x20] ss:$4 sm:$0xff] %v1698_v56 }
  0x49   : > { %v1713_v63 = vld.sshfl [vmem:[#allocation1] sm:$0xff pattern:$0x73625140] }
  0x4a   : > { %v1715_v2 = vld.sshfl [vmem:[#allocation1 + $0x20] sm:$0xff pattern:$0x73625140]  ;;  %597 = vst [vmem:[#allocation1] ss:$4 sm:$0xff] %v1708_v61 }
  0x4b   : > { %601 = vst [vmem:[#allocation1 + $0x20] ss:$4 sm:$0xff] %v1711_v62 }
  0x51   : > { %v1719_v3 = vld.sshfl [vmem:[#allocation1] sm:$0xff pattern:$0x73625140] }
  0x52   : > { %v1721_v4 = vld.sshfl [vmem:[#allocation1 + $0x20] sm:$0xff pattern:$0x73625140]  ;;  %665 = vst [vmem:[#allocation1] ss:$4 sm:$0xff] %v1584_v0 }
  0x53   : > { %669 = vst [vmem:[#allocation1 + $0x20] ss:$4 sm:$0xff] %v1587_v1 }
  0x59   : > { %v666_v5 = vld.sshfl [vmem:[#allocation1] sm:$0xff pattern:$0x73625140] }
  0x5a   : > { %v670_v7 = vld.sshfl [vmem:[#allocation1 + $0x20] sm:$0xff pattern:$0x73625140]  ;;  %672 = vst [vmem:[#allocation1] ss:$4 sm:$0xff] %v1602_v9  ;;  %v690_v8 = vunpack.c.l.b16 %v666_v5 }
  0x5b   : > { %675 = vst [vmem:[#allocation1 + $0x20] ss:$4 sm:$0xff] %v1606_v13  ;;  %v691_v14 = vunpack.c.l.b16 %v670_v7 }
  0x5c   : > { %v698_v15 = vrot.slane %v690_v8, 1  ;;  %v650_v8 = vrot.slane %v1625_v50, 1 }
  0x5e   : > { %v699_v19 = vsel %vm441_vm0, %v691_v14, %v698_v15  ;;  %v656_v15 = vrot.slane %v1642_v6, 5 }
  0x61   : > { %v673_v10 = vld.sshfl [vmem:[#allocation1] sm:$0xff pattern:$0x73625140] }
  0x62   : > { %v676_v11 = vld.sshfl [vmem:[#allocation1 + $0x20] sm:$0xff pattern:$0x73625140]  ;;  %678 = vst [vmem:[#allocation1] ss:$4 sm:$0xff] %v1613_v28  ;;  %v692_v12 = vunpack.c.l.b16 %v673_v10  ;;  %v652_v10 = vrot.slane %v1623_v47, 7 }
  0x63   : > { %681 = vst [vmem:[#allocation1 + $0x20] ss:$4 sm:$0xff] %v1616_v31  ;;  %v693_v17 = vunpack.c.l.b16 %v676_v11  ;;  %v651_v11 = vsel %vm441_vm0, %v1619_v38, %v650_v8 }
  0x64   : > { %v700_v18 = vrot.slane %v692_v12, 7  ;;  %v654_v12 = vrot.slane %v1632_v57, 6  ;;  %v653_v14 = vsel %vm444_vm1, %v652_v10, %v651_v11 }
  0x65   : > { %v702_v22 = vrot.slane %v693_v17, 6 }
  0x66   : > { %v701_v27 = vsel %vm444_vm1, %v700_v18, %v699_v19  ;;  %v655_v17 = vsel %vm447_vm2, %v654_v12, %v653_v14  ;;  %v658_v18 = vrot.slane %v1654_v16, 4 }
  0x67   : > { %v703_v32 = vsel %vm447_vm2, %v702_v22, %v701_v27  ;;  %v660_v22 = vrot.slane %v1662_v23, 3  ;;  %v662_v27 = vrot.slane %v1671_v34, 2 }
  0x69   : > { %v679_v20 = vld.sshfl [vmem:[#allocation1] sm:$0xff pattern:$0x73625140] }
  0x6a   : > { %v682_v25 = vld.sshfl [vmem:[#allocation1 + $0x20] sm:$0xff pattern:$0x73625140]  ;;  %684 = vst [vmem:[#allocation1] ss:$4 sm:$0xff] %v1629_v54  ;;  %v694_v26 = vunpack.c.l.b16 %v679_v20  ;;  %v657_v20 = vsel %vm450_vm3, %v656_v15, %v655_v17 }
  0x6b   : > { %687 = vst [vmem:[#allocation1 + $0x20] ss:$4 sm:$0xff] %v1635_v58  ;;  %v695_v29 = vunpack.c.l.b16 %v682_v25 }
  0x6c   : > { %v704_v30 = vrot.slane %v694_v26, 5  ;;  %v659_v26 = vsel %vm453_vm4, %v658_v18, %v657_v20 }
  0x6d   : > { %v706_v33 = vrot.slane %v695_v29, 4  ;;  %v661_v29 = vsel %vm456_vm5, %v660_v22, %v659_v26 }
  0x6e   : > { %v705_v35 = vsel %vm450_vm3, %v704_v30, %v703_v32  ;;  %v663_v30 = vsel %vm459_vm6, %v662_v27, %v661_v29 }
  0x6f   : > { %v707_v41 = vsel %vm453_vm4, %v706_v33, %v705_v35  ;;  %v664_v32 = vpack.c.b16 %v663_v30, %v663_v30 }
  0x71   : > { %v685_v36 = vld.sshfl [vmem:[#allocation1] sm:$0xff pattern:$0x73625140] }
  0x72   : > { %v688_v37 = vld.sshfl [vmem:[#allocation1 + $0x20] sm:$0xff pattern:$0x73625140]  ;;  %v696_v39 = vunpack.c.l.b16 %v685_v36  ;;  %767 = vst [vmem:[#allocation1] ss:$4 sm:$0xff] %v1659_v21 }
  0x73   : > { %v697_v40 = vunpack.c.l.b16 %v688_v37  ;;  %771 = vst [vmem:[#allocation1 + $0x20] ss:$4 sm:$0xff] %v1665_v24 }
  0x74   : > { %v708_v42 = vrot.slane %v696_v39, 3  ;;  %v1523_v39 = vmov 0  }
  0x75   : > { %v710_v44 = vrot.slane %v697_v40, 2  ;;  %1472 = vset.pattern.permute.xlu0 %v1523_v39  ;;  %1473 = vset.pattern.permute.xlu2 %v1523_v39 }
  0x76   : > { %v709_v45 = vsel %vm456_vm5, %v708_v42, %v707_v41  ;;  %1474 = vset.pattern.permute.xlu1 %v1523_v39 }
  0x77   : > { %v711_v49 = vsel %vm459_vm6, %v710_v44, %v709_v45 }
  0x78   : > { %v712_v52 = vpack.c.b16 %v711_v49, %v711_v49 }
  0x79   : > { %v1740_v53 = vld.sshfl [vmem:[#allocation1] sm:$0xff pattern:$0x73625140] }
  0x7a   : > { %v717_v5 = vsel %vm350_vm7, %v712_v52, 0  ;;  %v1743_v7 = vld.sshfl [vmem:[#allocation1 + $0x20] sm:$0xff pattern:$0x73625140]  ;;  %774 = vst [vmem:[#allocation1] ss:$4 sm:$0xff] %v1680_v43 }
  0x7b   : > { %726 = vmatpush.bf16.xpose.msra.mxu2 %v717_v5  ;;  %777 = vst [vmem:[#allocation1 + $0x20] ss:$4 sm:$0xff] %v1684_v46  ;;  %v355_v52 = vld [vmem:[%s328_s5] sm:$0x1] }
  0x7c   : > { %vm356_vm8 = vcmp.gt.f32.partialorder %v355_v52, 0.5 }
  0x7d   : > { %v357_v10 = vsel %vm356_vm8, 1, %v1523_v39 }
  0x7e   : > { %v358_v11 = vperm.slane %v357_v10, 0 }
  0x80   : > { %vm1815_vm9 = vcmp.eq.s32.totalorder %v358_v11, 1 }
  0x81   : > { %v1756_v19 = vld.sshfl [vmem:[#allocation1] sm:$0xff pattern:$0x73625140] }
  0x82   : > { %v1760_v25 = vld.sshfl [vmem:[#allocation1 + $0x20] sm:$0xff pattern:$0x73625140]  ;;  %780 = vst [vmem:[#allocation1] ss:$4 sm:$0xff] %v1695_v55  ;;  %1431 = vmatmul.msk.bf16.vlgmr.msra.gmra.mxu2 %vm350_vm7, %v664_v32 }
  0x83   : > { %783 = vst [vmem:[#allocation1 + $0x20] ss:$4 sm:$0xff] %v1698_v56 }
  0x89   : > { %v1769_v33 = vld.sshfl [vmem:[#allocation1] sm:$0xff pattern:$0x73625140] }
  0x8a   : > { %v1771_v35 = vld.sshfl [vmem:[#allocation1 + $0x20] sm:$0xff pattern:$0x73625140]  ;;  %786 = vst [vmem:[#allocation1] ss:$4 sm:$0xff] %v1708_v61 }
  0x8b   : > { %789 = vst [vmem:[#allocation1 + $0x20] ss:$4 sm:$0xff] %v1711_v62 }
  0x91   : > { %v1775_v36 = vld.sshfl [vmem:[#allocation1] sm:$0xff pattern:$0x73625140] }
  0x92   : > { %v1777_v37 = vld.sshfl [vmem:[#allocation1 + $0x20] sm:$0xff pattern:$0x73625140]  ;;  %852 = vst [vmem:[#allocation1] ss:$4 sm:$0xff] %v1584_v0 }
  0x93   : > { %856 = vst [vmem:[#allocation1 + $0x20] ss:$4 sm:$0xff] %v1587_v1 }
  0x99   : > { %v1781_v40 = vld.sshfl [vmem:[#allocation1] sm:$0xff pattern:$0x73625140] }
  0x9a   : > { %v1783_v41 = vld.sshfl [vmem:[#allocation1 + $0x20] sm:$0xff pattern:$0x73625140]  ;;  %859 = vst [vmem:[#allocation1] ss:$4 sm:$0xff] %v1602_v9 }
  0x9b   : > { %862 = vst [vmem:[#allocation1 + $0x20] ss:$4 sm:$0xff] %v1606_v13 }
  0xa1   : > { %v1787_v42 = vld.sshfl [vmem:[#allocation1] sm:$0xff pattern:$0x73625140] }
  0xa2   : > { %v1789_v44 = vld.sshfl [vmem:[#allocation1 + $0x20] sm:$0xff pattern:$0x73625140]  ;;  %865 = vst [vmem:[#allocation1] ss:$4 sm:$0xff] %v1613_v28 }
  0xa3   : > { %868 = vst [vmem:[#allocation1 + $0x20] ss:$4 sm:$0xff] %v1616_v31 }
  0xa9   : > { %v1793_v45 = vld.sshfl [vmem:[#allocation1] sm:$0xff pattern:$0x73625140] }
  0xaa   : > { %v1795_v49 = vld.sshfl [vmem:[#allocation1 + $0x20] sm:$0xff pattern:$0x73625140]  ;;  %871 = vst [vmem:[#allocation1] ss:$4 sm:$0xff] %v1629_v54 }
  0xab   : > { %874 = vst [vmem:[#allocation1 + $0x20] ss:$4 sm:$0xff] %v1635_v58 }
  0xb1   : > { %v1803_v5 = vld.sshfl [vmem:[#allocation1] sm:$0xff pattern:$0x73625140] }
  0xb2   : > { %v1805_v8 = vld.sshfl [vmem:[#allocation1 + $0x20] sm:$0xff pattern:$0x73625140]  ;;  %954 = vst [vmem:[#allocation1] ss:$4 sm:$0xff] %v1659_v21 }
  0xb3   : > { %958 = vst [vmem:[#allocation1 + $0x20] ss:$4 sm:$0xff] %v1665_v24 }
  0xb9   : > { %v1809_v12 = vld.sshfl [vmem:[#allocation1] sm:$0xff pattern:$0x73625140] }
  0xba   : > { %v1811_v14 = vld.sshfl [vmem:[#allocation1 + $0x20] sm:$0xff pattern:$0x73625140]  ;;  %961 = vst [vmem:[#allocation1] ss:$4 sm:$0xff] %v1680_v43 }
  0xbb   : > { %964 = vst [vmem:[#allocation1 + $0x20] ss:$4 sm:$0xff] %v1684_v46 }
  0xbf   : > { %v534_v17 = vpop.f32.mrf.mxu0 }
  0xc0   : > { %v1821_v18 = vsel %vm1815_vm9, -1e+30, %v534_v17 }
  0xc1   : > { %v540_v20 = vsel %vm350_vm7, %v1821_v18, -inf  ;;  %v1825_v22 = vld.sshfl [vmem:[#allocation1] sm:$0xff pattern:$0x73625140] }
  0xc2   : > { %2094 = vst [vmem:[#allocation5_spill] sm:$0xff] %v1825_v22  ;;  %541 = vmax.xlane.f32.xlu0 %v540_v20  ;;  %v1827_v26 = vld.sshfl [vmem:[#allocation1 + $0x20] sm:$0xff pattern:$0x73625140] }
  0xc3   : > { %2095 = vst [vmem:[#allocation6_spill] sm:$0xff] %v1827_v26 }
  0xc4   : > { %967 = vst [vmem:[#allocation1] ss:$4 sm:$0xff] %v1695_v55 }
  0xc5   : > { %970 = vst [vmem:[#allocation1 + $0x20] ss:$4 sm:$0xff] %v1698_v56 }
  0xc7   : > { %v536_v27 = vpop.f32.mrf.mxu0 }
  0xcb   : > { %v1831_v29 = vld.sshfl [vmem:[#allocation1] sm:$0xff pattern:$0x73625140] }
  0xcc   : > { %2096 = vst [vmem:[#allocation7_spill] sm:$0xff] %v1831_v29  ;;  %v1833_v30 = vld.sshfl [vmem:[#allocation1 + $0x20] sm:$0xff pattern:$0x73625140] }
  0xcd   : > { %2097 = vst [vmem:[#allocation8_spill] sm:$0xff] %v1833_v30 }
  0xce   : > { %973 = vst [vmem:[#allocation1] ss:$4 sm:$0xff] %v1708_v61 }
  0xcf   : > { %976 = vst [vmem:[#allocation1 + $0x20] ss:$4 sm:$0xff] %v1711_v62 }
  0xd5   : > { %v1837_v32 = vld.sshfl [vmem:[#allocation1] sm:$0xff pattern:$0x73625140] }
  0xd6   : > { %2098 = vst [vmem:[#allocation9_spill] sm:$0xff] %v1837_v32  ;;  %v1839_v39 = vld.sshfl [vmem:[#allocation1 + $0x20] sm:$0xff pattern:$0x73625140] }
  0xd7   : > { %2099 = vst [vmem:[#allocation10_spill] sm:$0xff] %v1839_v39 }
  0xd8   : > { %1039 = vst [vmem:[#allocation1] ss:$4 sm:$0xff] %v1584_v0  ;;  %v1024_v0 = vrot.slane %v1625_v50, 3 }
  0xd9   : > { %1043 = vst [vmem:[#allocation1 + $0x20] ss:$4 sm:$0xff] %v1587_v1  ;;  %v1025_v1 = vrot.slane %v1619_v38, 2 }
  0xdb   : > { %v1026_v22 = vsel %vm441_vm0, %v1025_v1, %v1024_v0 }
  0xdf   : > { %v1040_v52 = vld.sshfl [vmem:[#allocation1] sm:$0xff pattern:$0x73625140] }
  0xe0   : > { %v1044_v10 = vld.sshfl [vmem:[#allocation1 + $0x20] sm:$0xff pattern:$0x73625140]  ;;  %1046 = vst [vmem:[#allocation1] ss:$4 sm:$0xff] %v1602_v9  ;;  %v1064_v11 = vunpack.c.l.b16 %v1040_v52 }
  0xe1   : > { %1049 = vst [vmem:[#allocation1 + $0x20] ss:$4 sm:$0xff] %v1606_v13  ;;  %v1065_v17 = vunpack.c.l.b16 %v1044_v10  ;;  %v1027_v13 = vrot.slane %v1623_v47, 1 }
  0xe2   : > { %v1072_v39 = vrot.slane %v1064_v11, 3 }
  0xe3   : > { %v1073_v32 = vrot.slane %v1065_v17, 2 }
  0xe5   : > { %v1074_v9 = vsel %vm441_vm0, %v1073_v32, %v1072_v39  ;;  %v1030_v39 = vrot.slane %v1642_v6, 7 }
  0xe7   : > { %v1047_v20 = vld.sshfl [vmem:[#allocation1] sm:$0xff pattern:$0x73625140] }
  0xe8   : > { %v1050_v27 = vld.sshfl [vmem:[#allocation1 + $0x20] sm:$0xff pattern:$0x73625140]  ;;  %1052 = vst [vmem:[#allocation1] ss:$4 sm:$0xff] %v1613_v28  ;;  %v1066_v30 = vunpack.c.l.b16 %v1047_v20 }
  0xe9   : > { %1055 = vst [vmem:[#allocation1 + $0x20] ss:$4 sm:$0xff] %v1616_v31  ;;  %v1067_v10 = vunpack.c.l.b16 %v1050_v27  ;;  %v1524_v20 = vmov -1e+30  }
  0xea   : > { %v1075_v29 = vrot.slane %v1066_v30, 1  ;;  %v1028_v30 = vsel %vm444_vm1, %v1027_v13, %v1026_v22  ;;  %342 = vst.msk [vmem:[#allocation2] sm:$0xff] %vm341_vm10, %v1524_v20  ;;  %v1032_v22 = vrot.slane %v1654_v16, 6 }
  0xeb   : > { %343 = vst.msk [vmem:[#allocation2 + $0x8] sm:$0xff] %vm341_vm10, %v1524_v20 }
  0xec   : > { %v1076_v31 = vsel %vm444_vm1, %v1075_v29, %v1074_v9  ;;  %344 = vst.msk [vmem:[#allocation2 + $0x10] sm:$0xff] %vm341_vm10, %v1524_v20 }
  0xed   : > { %v1077_v32 = vsel %vm447_vm2, %v1067_v10, %v1076_v31  ;;  %345 = vst.msk [vmem:[#allocation2 + $0x18] sm:$0xff] %vm341_vm10, %v1524_v20  ;;  %v1034_v10 = vrot.slane %v1662_v23, 5 }
  0xef   : > { %v1053_v52 = vld.sshfl [vmem:[#allocation1] sm:$0xff pattern:$0x73625140] }
  0xf0   : > { %v1056_v26 = vld.sshfl [vmem:[#allocation1 + $0x20] sm:$0xff pattern:$0x73625140]  ;;  %1058 = vst [vmem:[#allocation1] ss:$4 sm:$0xff] %v1629_v54  ;;  %v1068_v28 = vunpack.c.l.b16 %v1053_v52  ;;  %v1029_v54 = vsel %vm447_vm2, %v1632_v57, %v1028_v30  ;;  %v1036_v30 = vrot.slane %v1671_v34, 4 }
  0xf1   : > { %1061 = vst [vmem:[#allocation1 + $0x20] ss:$4 sm:$0xff] %v1635_v58  ;;  %v1069_v11 = vunpack.c.l.b16 %v1056_v26  ;;  %v1031_v1 = vsel %vm450_vm3, %v1030_v39, %v1029_v54 }
  0xf2   : > { %v1078_v17 = vrot.slane %v1068_v28, 7  ;;  %v1033_v31 = vsel %vm453_vm4, %v1032_v22, %v1031_v1  ;;  %v1525_v22 = vmov 0.0  }
  0xf3   : > { %v1080_v27 = vrot.slane %v1069_v11, 6  ;;  %347 = vst.msk [vmem:[#allocation3 + $0x8] sm:$0xff] %vm341_vm10, %v1525_v22 }
  0xf4   : > { %v1079_v58 = vsel %vm450_vm3, %v1078_v17, %v1077_v32  ;;  %v1035_v32 = vsel %vm456_vm5, %v1034_v10, %v1033_v31  ;;  %346 = vst.msk [vmem:[#allocation3] sm:$0xff] %vm341_vm10, %v1525_v22 }
  0xf5   : > { %v1081_v13 = vsel %vm453_vm4, %v1080_v27, %v1079_v58  ;;  %348 = vst.msk [vmem:[#allocation3 + $0x10] sm:$0xff] %vm341_vm10, %v1525_v22 }
  0xf6   : > { %349 = vst.msk [vmem:[#allocation3 + $0x18] sm:$0xff] %vm341_vm10, %v1525_v22 }
  0xf7   : > { %v1059_v26 = vld.sshfl [vmem:[#allocation1] sm:$0xff pattern:$0x73625140]  ;;  %351 = vst.msk [vmem:[#allocation4] sm:$0xff] %vm350_vm7, %v1525_v22 }
  0xf8   : > { %v1062_v29 = vld.sshfl [vmem:[#allocation1 + $0x20] sm:$0xff pattern:$0x73625140]  ;;  %v1070_v0 = vunpack.c.l.b16 %v1059_v26  ;;  %1141 = vst [vmem:[#allocation1] ss:$4 sm:$0xff] %v1659_v21 }
  0xf9   : > { %v1071_v9 = vunpack.c.l.b16 %v1062_v29  ;;  %1145 = vst [vmem:[#allocation1 + $0x20] ss:$4 sm:$0xff] %v1665_v24  ;;  %v1037_v24 = vsel %vm459_vm6, %v1036_v30, %v1035_v32  ;;  %v1893_v29 = vld [vmem:[#allocation2] sm:$0xff]  ;;  %v605_v30 = vunpack.c.l.b16 %v1689_v51  ;;  %v606_v32 = vunpack.c.l.b16 %v1700_v59 }
  0xfa   : > { %v1082_v52 = vrot.slane %v1070_v0, 5  ;;  %v1038_v20 = vpack.c.b16 %v1037_v24, %v1037_v24  ;;  %352 = vst.msk [vmem:[#allocation4 + $0x8] sm:$0xff] %vm350_vm7, %v1525_v22  ;;  %v607_v24 = vunpack.c.l.b16 %v1703_v60  ;;  %v611_v59 = vunpack.c.l.b16 %v1721_v4 }
  0xfb   : > { %v1084_v28 = vrot.slane %v1071_v9, 4  ;;  %353 = vst.msk [vmem:[#allocation4 + $0x10] sm:$0xff] %vm350_vm7, %v1525_v22 }
  0xfc   : > { %v1083_v11 = vsel %vm456_vm5, %v1082_v52, %v1081_v13  ;;  %354 = vst.msk [vmem:[#allocation4 + $0x18] sm:$0xff] %vm350_vm7, %v1525_v22  ;;  %v1903_v13 = vld [vmem:[#allocation2 + $0x8] sm:$0xff] }
  0xfd   : > { %v1085_v17 = vsel %vm459_vm6, %v1084_v28, %v1083_v11 }
  0xfe   : > { %v1086_v21 = vpack.c.b16 %v1085_v17, %v1085_v17 }
 0x100   : > { %v1091_v39 = vsel %vm350_vm7, %v1086_v21, 0 }
 0x101   : > { %1100 = vmatpush.bf16.xpose.msrb.mxu0 %v1091_v39  ;;  %v604_v39 = vunpack.c.l.b16 %v1686_v48 }
 0x105   : > { %v728_v27 = vpop.f32.mrf.mxu2 }
 0x106   : > { %v1881_v54 = vsel %vm1815_vm9, -1e+30, %v728_v27  ;;  %v608_v27 = vunpack.c.l.b16 %v1713_v63 }
 0x107   : > { %v735_v58 = vsel %vm350_vm7, %v1881_v54, -inf }
 0x108   : > { %1435 = vmatmul.msk.bf16.vlgmr.msrb.gmra.mxu0 %vm350_vm7, %v1038_v20  ;;  %736 = vmax.xlane.f32.xlu1 %v735_v58  ;;  %v612_v20 = vrot.slane %v605_v30, 7  ;;  %v614_v58 = vrot.slane %v606_v32, 6 }
 0x10a   : > { %v613_v22 = vsel %vm441_vm0, %v612_v20, %v604_v39  ;;  %v877_v39 = vunpack.c.l.b16 %v1781_v40  ;;  %v880_v20 = vunpack.c.l.b16 %v1789_v44  ;;  %v883_v40 = vunpack.c.l.b16 %v1803_v5 }
 0x10b   : > { %v615_v51 = vsel %vm444_vm1, %v614_v58, %v613_v22  ;;  %v881_v22 = vunpack.c.l.b16 %v1793_v45 }
 0x10c   : > { %v895_v45 = vrot.slane %v883_v40, 4 }
 0x10d   : > { %v730_v26 = vpop.f32.mrf.mxu2 }
 0x10e   : > { %v609_v26 = vunpack.c.l.b16 %v1715_v2 }
 0x135   : > { %v542_v0 = vpop.xlane.xlu0 %541 }
 0x136   : > { %v1896_v1 = vmax.f32 %v1893_v29, %v542_v0  ;;  %v616_v0 = vrot.slane %v607_v24, 5  ;;  %v878_v24 = vunpack.c.l.b16 %v1783_v41  ;;  %v884_v41 = vunpack.c.l.b16 %v1805_v8 }
 0x138   : > { %v544_v9 = vsub.f32 %v1893_v29, %v1896_v1  ;;  %649 = vst.msk [vmem:[#allocation2] sm:$0xff] %vm341_vm10, %v1896_v1  ;;  %549 = vperm.xlu0 %1472, %v1896_v1   ;;  %v617_v48 = vsel %vm447_vm2, %v616_v0, %v615_v51  ;;  %v886_v58 = vrot.slane %v878_v24, 1  ;;  %v882_v0 = vunpack.c.l.b16 %v1795_v49 }
 0x139   : > { %v889_v51 = vrot.slane %v880_v20, 7  ;;  %v841_v24 = vrot.slane %v1632_v57, 7  ;;  %v843_v20 = vrot.slane %v1642_v6, 6  ;;  %v849_v57 = vrot.slane %v1671_v34, 3 }
 0x17b   : > { %v737_v28 = vpop.xlane.xlu1 %736 }
 0x17c   : > { %v1912_v11 = vmax.f32 %v1903_v13, %v737_v28  ;;  %v618_v28 = vrot.slane %v608_v27, 4  ;;  %v885_v27 = vrot.slane %v877_v39, 2 }
 0x17e   : > { %v739_v17 = vsub.f32 %v1903_v13, %v1912_v11  ;;  %836 = vst.msk [vmem:[#allocation2 + $0x8] sm:$0xff] %vm341_vm10, %v1912_v11  ;;  %v619_v60 = vsel %vm450_vm3, %v618_v28, %v617_v48  ;;  %v893_v48 = vrot.slane %v882_v0, 5 }
 0x180   : > { %v740_v15 = vmul.f32 1.442695, %v739_v17 }
 0x185   : > { %v1102_v52 = vpop.f32.mrf.mxu0 }
 0x186   : > { %v1907_v10 = vsel %vm1815_vm9, -1e+30, %v1102_v52  ;;  %v610_v52 = vunpack.c.l.b16 %v1719_v3 }
 0x187   : > { %v1109_v31 = vsel %vm350_vm7, %v1907_v10, -inf }
 0x188   : > { %1110 = vmax.xlane.f32.xlu2 %v1109_v31  ;;  %v620_v31 = vrot.slane %v609_v26, 3  ;;  %v622_v30 = vrot.slane %v610_v52, 2  ;;  %v879_v26 = vunpack.c.l.b16 %v1787_v42  ;;  %v887_v52 = vsel %vm441_vm0, %v886_v58, %v885_v27 }
 0x18a   : > { %v621_v63 = vsel %vm453_vm4, %v620_v31, %v619_v60  ;;  %v888_v28 = vsel %vm444_vm1, %v879_v26, %v887_v52  ;;  %v897_v31 = vrot.slane %v884_v41, 3  ;;  %v1969_v52 = vld [vmem:[#allocation2 + $0x18] sm:$0xff] }
 0x18b   : > { %v623_v2 = vsel %vm456_vm5, %v622_v30, %v621_v63  ;;  %v890_v44 = vsel %vm447_vm2, %v889_v51, %v888_v28 }
 0x18d   : > { %v1104_v21 = vpop.f32.mrf.mxu0 }
 0x18e   : > { %v624_v21 = vrot.slane %v611_v59, 1  ;;  %v891_v59 = vrot.slane %v881_v22, 6 }
 0x190   : > { %v625_v32 = vsel %vm459_vm6, %v624_v21, %v623_v2  ;;  %v892_v42 = vsel %vm450_vm3, %v891_v59, %v890_v44  ;;  %v837_v2 = vrot.slane %v1625_v50, 2  ;;  %v847_v50 = vrot.slane %v1662_v23, 4 }
 0x191   : > { %v626_v3 = vpack.c.b16 %v625_v32, %v625_v32  ;;  %v894_v49 = vsel %vm453_vm4, %v893_v48, %v892_v42  ;;  %v838_v32 = vrot.slane %v1619_v38, 1  ;;  %v792_v44 = vunpack.c.l.b16 %v1740_v53 }
 0x192   : > { %v896_v60 = vsel %vm456_vm5, %v895_v45, %v894_v49  ;;  %v794_v48 = vunpack.c.l.b16 %v1756_v19  ;;  %v793_v42 = vunpack.c.l.b16 %v1743_v7  ;;  %v795_v45 = vunpack.c.l.b16 %v1760_v25 }
 0x193   : > { %v632_v4 = vsel %vm630_vm11, %v626_v3, 0  ;;  %v898_v5 = vsel %vm459_vm6, %v897_v31, %v896_v60  ;;  %v839_v39 = vsel %vm441_vm0, %v838_v32, %v837_v2  ;;  %v800_v31 = vrot.slane %v792_v44, 1 }
 0x194   : > { %641 = vmatpush.bf16.msra.mxu1 %v632_v4  ;;  %v899_v30 = vpack.c.b16 %v898_v5, %v898_v5  ;;  %v840_v4 = vsel %vm444_vm1, %v1623_v47, %v839_v39  ;;  %v796_v49 = vunpack.c.l.b16 %v1769_v33  ;;  %v802_v60 = vrot.slane %v794_v48, 7 }
 0x195   : > { %v842_v58 = vsel %vm447_vm2, %v841_v24, %v840_v4  ;;  %v801_v5 = vsel %vm441_vm0, %v793_v42, %v800_v31  ;;  %v799_v19 = vunpack.c.l.b16 %v1777_v37  ;;  %v1142_v37 = vld.sshfl [vmem:[#allocation1] sm:$0xff pattern:$0x73625140] }
 0x196   : > { %v904_v8 = vsel %vm350_vm7, %v899_v30, 0  ;;  %v844_v38 = vsel %vm450_vm3, %v843_v20, %v842_v58  ;;  %v804_v30 = vrot.slane %v795_v45, 6  ;;  %v806_v53 = vrot.slane %v796_v49, 5  ;;  %v1146_v20 = vld.sshfl [vmem:[#allocation1 + $0x20] sm:$0xff pattern:$0x73625140] }
 0x197   : > { %v812_v32 = vrot.slane %v799_v19, 2  ;;  %1148 = vst [vmem:[#allocation1] ss:$4 sm:$0xff] %v1680_v43 }
 0x198   : > { %913 = vmatpush.bf16.xpose.msrb.mxu1 %v904_v8  ;;  %v798_v8 = vunpack.c.l.b16 %v1775_v36  ;;  %1151 = vst [vmem:[#allocation1 + $0x20] ss:$4 sm:$0xff] %v1684_v46 }
 0x19a   : > { %v810_v2 = vrot.slane %v798_v8, 3 }
 0x19e   : > { %v1149_v58 = vld.sshfl [vmem:[#allocation1] sm:$0xff pattern:$0x73625140] }
 0x19f   : > { %1154 = vst [vmem:[#allocation1] ss:$4 sm:$0xff] %v1695_v55  ;;  %v1168_v43 = vunpack.c.l.b16 %v1149_v58 }
 0x1a0   : > { %744 = vperm.xlu2 %1473, %v1912_v11   ;;  %v555_v11 = vld [vmem:[#allocation3] sm:$0xff] }
 0x1aa   : > { %v550_v63 = vpop.permute.xlu0 %549 }
 0x1ab   : > { %v552_v21 = vsub.f32 %v1821_v18, %v550_v63  ;;  %v845_v18 = vrot.slane %v1654_v16, 5  ;;  %v803_v63 = vsel %vm444_vm1, %v802_v60, %v801_v5 }
 0x1ac   : > { %v805_v7 = vsel %vm447_vm2, %v804_v30, %v803_v63 }
 0x1ad   : > { %v553_v3 = vmul.f32 1.442695, %v552_v21  ;;  %v846_v22 = vsel %vm453_vm4, %v845_v18, %v844_v38  ;;  %v807_v25 = vsel %vm450_vm3, %v806_v53, %v805_v7  ;;  %v1166_v38 = vunpack.c.l.b16 %v1142_v37 }
 0x1ae   : > { %v848_v47 = vsel %vm456_vm5, %v847_v50, %v846_v22  ;;  %v1167_v50 = vunpack.c.l.b16 %v1146_v20 }
 0x1af   : > { %1475 = vpow2.f32 %v553_v3  ;;  %v850_v6 = vsel %vm459_vm6, %v849_v57, %v848_v47  ;;  %v1174_v46 = vrot.slane %v1166_v38, 3 }
 0x1b0   : > { %v851_v0 = vpack.c.b16 %v850_v6, %v850_v6  ;;  %v1175_v57 = vrot.slane %v1167_v50, 2  ;;  %v1177_v6 = vrot.slane %v1168_v43, 1 }
 0x1b5   : > { %v1476_v27 = vpop.eup %1475 }
 0x1b6   : > { %v570_v26 = vpack.c.bf16 %v1476_v27, %v1476_v27  ;;  %v557_v36 = vsel %vm350_vm7, %v1476_v27, 0.0  ;;  %v1155_v27 = vld.sshfl [vmem:[#allocation1] sm:$0xff pattern:$0x73625140] }
 0x1b7   : > { %1160 = vst [vmem:[#allocation1] ss:$4 sm:$0xff] %v1708_v61  ;;  %v1170_v47 = vunpack.c.l.b16 %v1155_v27  ;;  %v921_v27 = vld [vmem:[#allocation2 + $0x10] sm:$0xff] }
 0x1b8   : > { %1430 = vmatmul.msk.bf16.vlgmr.msra.gmra.mxu1 %vm350_vm7, %v570_v26  ;;  %v1152_v26 = vld.sshfl [vmem:[#allocation1 + $0x20] sm:$0xff pattern:$0x73625140] }
 0x1b9   : > { %1157 = vst [vmem:[#allocation1 + $0x20] ss:$4 sm:$0xff] %v1698_v56  ;;  %v1176_v56 = vsel %vm441_vm0, %v1175_v57, %v1174_v46  ;;  %v1125_v57 = vld [vmem:[#allocation3 + $0x18] sm:$0xff] }
 0x1ba   : > { %v1178_v61 = vsel %vm444_vm1, %v1177_v6, %v1176_v56 }
 0x1c0   : > { %v1158_v18 = vld.sshfl [vmem:[#allocation1 + $0x20] sm:$0xff pattern:$0x73625140] }
 0x1c1   : > { %1163 = vst [vmem:[#allocation1 + $0x20] ss:$4 sm:$0xff] %v1711_v62  ;;  %v1171_v55 = vunpack.c.l.b16 %v1158_v18 }
 0x1c8   : > { %1433 = vmatmul.msk.bf16.vlgmr.msrb.gmra.mxu1 %vm350_vm7, %v851_v0  ;;  %v1161_v0 = vld.sshfl [vmem:[#allocation1] sm:$0xff pattern:$0x73625140] }
 0x1fb   : > { %v1111_v16 = vpop.xlane.xlu2 %1110 }
 0x1fc   : > { %v1972_v51 = vmax.f32 %v1969_v52, %v1111_v16  ;;  %v1169_v16 = vunpack.c.l.b16 %v1152_v26 }
 0x1fe   : > { %v1113_v23 = vsub.f32 %v1969_v52, %v1972_v51  ;;  %1210 = vst.msk [vmem:[#allocation2 + $0x18] sm:$0xff] %vm341_vm10, %v1972_v51  ;;  %1118 = vperm.xlu2 %1473, %v1972_v51  }
 0x200   : > { %v1114_v38 = vmul.f32 1.442695, %v1113_v23 }
 0x203   : > { %v745_v34 = vpop.permute.xlu2 %744 }
 0x204   : > { %v747_v40 = vsub.f32 %v1881_v54, %v745_v34  ;;  %v797_v54 = vunpack.c.l.b16 %v1771_v35  ;;  %v1164_v34 = vld.sshfl [vmem:[#allocation1 + $0x20] sm:$0xff pattern:$0x73625140] }
 0x205   : > { %v1173_v62 = vunpack.c.l.b16 %v1164_v34 }
 0x206   : > { %v748_v41 = vmul.f32 1.442695, %v747_v40  ;;  %v808_v21 = vrot.slane %v797_v54, 4  ;;  %v1172_v40 = vunpack.c.l.b16 %v1161_v0 }
 0x207   : > { %v1186_v45 = vrot.slane %v1173_v62, 4 }
 0x208   : > { %1477 = vpow2.f32 %v748_v41  ;;  %v809_v33 = vsel %vm453_vm4, %v808_v21, %v807_v25  ;;  %v1180_v41 = vrot.slane %v1170_v47, 7  ;;  %v1184_v48 = vrot.slane %v1172_v40, 5 }
 0x209   : > { %v811_v35 = vsel %vm456_vm5, %v810_v2, %v809_v33 }
 0x20a   : > { %v813_v3 = vsel %vm459_vm6, %v812_v32, %v811_v35  ;;  %v751_v35 = vld [vmem:[#allocation3 + $0x8] sm:$0xff] }
 0x20b   : > { %v814_v39 = vpack.c.b16 %v813_v3, %v813_v3 }
 0x20d   : > { %v819_v24 = vsel %vm630_vm11, %v814_v39, 0 }
 0x20e   : > { %v1478_v28 = vpop.eup %1477  ;;  %828 = vmatpush.bf16.msra.mxu3 %v819_v24 }
 0x20f   : > { %v753_v59 = vsel %vm350_vm7, %v1478_v28, 0.0  ;;  %v766_v4 = vpack.c.bf16 %v1478_v28, %v1478_v28  ;;  %v1179_v28 = vsel %vm447_vm2, %v1169_v16, %v1178_v61 }
 0x210   : > { %754 = vadd.xlane.f32.xlu0 %v753_v59  ;;  %v1182_v59 = vrot.slane %v1171_v55, 6  ;;  %v1181_v44 = vsel %vm450_vm3, %v1180_v41, %v1179_v28  ;;  %v759_v55 = vld [vmem:[#allocation4 + $0x8] sm:$0xff] }
 0x211   : > { %1432 = vmatmul.msk.bf16.vlgmr.msra.gmra.mxu3 %vm350_vm7, %v766_v4 }
 0x212   : > { %v1183_v42 = vsel %vm453_vm4, %v1182_v59, %v1181_v44 }
 0x213   : > { %v1185_v49 = vsel %vm456_vm5, %v1184_v48, %v1183_v42  ;;  %v979_v42 = vunpack.c.l.b16 %v1809_v12 }
 0x214   : > { %v1187_v60 = vsel %vm459_vm6, %v1186_v45, %v1185_v49  ;;  %v980_v45 = vunpack.c.l.b16 %v1811_v14 }
 0x215   : > { %v1188_v54 = vpack.c.b16 %v1187_v60, %v1187_v60  ;;  %v987_v60 = vrot.slane %v979_v42, 2 }
 0x217   : > { %v1193_v5 = vsel %vm630_vm11, %v1188_v54, 0  ;;  %v988_v54 = vrot.slane %v980_v45, 1 }
 0x218   : > { %1202 = vmatpush.bf16.msrb.mxu2 %v1193_v5  ;;  %v2101_v5 = vld [vmem:[#allocation5_spill] sm:$0xff] }
 0x227   : > { %558 = vadd.xlane.f32.xlu2 %v557_v36  ;;  %v545_v36 = vmul.f32 1.442695, %v544_v9 }
 0x235   : > { %v2005_v22 = vpop.f32.mrf.mxu1 }
 0x23d   : > { %v645_v31 = vpop.f32.mrf.mxu1 }
 0x23e   : > { %v2100_v31 = vld [vmem:[#allocation6_spill] sm:$0xff] }
 0x23f   : > { %v982_v49 = vunpack.c.l.b16 %v2100_v31 }
 0x245   : > { %v915_v30 = vpop.f32.mrf.mxu1 }
 0x246   : > { %v2017_v8 = vsel %vm1815_vm9, -1e+30, %v915_v30  ;;  %v981_v30 = vunpack.c.l.b16 %v2101_v5 }
 0x247   : > { %v922_v63 = vsel %vm350_vm7, %v2017_v8, -inf }
 0x248   : > { %923 = vmax.xlane.f32.xlu1 %v922_v63  ;;  %v2102_v63 = vld [vmem:[#allocation7_spill] sm:$0xff] }
 0x24d   : > { %v917_v53 = vpop.f32.mrf.mxu1 }
 0x24e   : > { %v983_v53 = vunpack.c.l.b16 %v2102_v63 }
 0x250   : > { %v993_v12 = vrot.slane %v983_v53, 6 }
 0x258   : > { %v1119_v19 = vpop.permute.xlu2 %1118 }
 0x259   : > { %v1121_v7 = vsub.f32 %v1907_v10, %v1119_v19  ;;  %v2103_v19 = vld [vmem:[#allocation8_spill] sm:$0xff] }
 0x25b   : > { %v1122_v21 = vmul.f32 1.442695, %v1121_v7  ;;  %v984_v7 = vunpack.c.l.b16 %v2103_v19 }
 0x25d   : > { %1479 = vpow2.f32 %v1122_v21  ;;  %v989_v21 = vsel %vm441_vm0, %v988_v54, %v987_v60 }
 0x25e   : > { %1481 = vpow2.f32 %v740_v15  ;;  %v990_v15 = vsel %vm444_vm1, %v981_v30, %v989_v21 }
 0x263   : > { %v1480_v25 = vpop.eup %1479 }
 0x264   : > { %v1127_v2 = vsel %vm350_vm7, %v1480_v25, 0.0  ;;  %v1140_v33 = vpack.c.bf16 %v1480_v25, %v1480_v25  ;;  %v1482_v32 = vpop.eup %1481  ;;  %v991_v25 = vrot.slane %v982_v49, 7 }
 0x265   : > { %1128 = vadd.xlane.f32.xlu2 %v1127_v2  ;;  %v752_v3 = vmul.f32 %v1482_v32, %v751_v35  ;;  %v2104_v2 = vld [vmem:[#allocation9_spill] sm:$0xff] }
 0x266   : > { %1436 = vmatmul.msk.bf16.vlgmr.msrb.gmra.mxu2 %vm350_vm7, %v1140_v33  ;;  %v985_v33 = vunpack.c.l.b16 %v2104_v2  ;;  %v992_v35 = vsel %vm447_vm2, %v991_v25, %v990_v15 }
 0x27d   : > { %762 = vperm.xlu2 %1473, %v1482_v32   ;;  %v2105_v32 = vld [vmem:[#allocation10_spill] sm:$0xff] }
 0x27e   : > { %v986_v14 = vunpack.c.l.b16 %v2105_v32 }
 0x283   : > { %v755_v39 = vpop.xlane.xlu0 %754 }
 0x284   : > { %v756_v10 = vadd.f32 %v755_v39, %v752_v3  ;;  %v995_v3 = vrot.slane %v984_v7, 5  ;;  %v994_v39 = vsel %vm450_vm3, %v993_v12, %v992_v35 }
 0x286   : > { %757 = vst.msk [vmem:[#allocation3 + $0x8] sm:$0xff] %vm341_vm10, %v756_v10  ;;  %v997_v10 = vrot.slane %v985_v33, 4 }
 0x28d   : > { %v1224_v24 = vld [vmem:[#allocation3 + $0x8] sm:$0xff] }
 0x28e   : > { %1483 = vrcp.f32 %v1224_v24  ;;  %v999_v24 = vrot.slane %v986_v14, 3 }
 0x28f   : > { %1485 = vpow2.f32 %v545_v36  ;;  %v996_v36 = vsel %vm453_vm4, %v995_v3, %v994_v39 }
 0x294   : > { %v1484_v4 = vpop.eup %1483  ;;  %v830_v58 = vpop.f32.mrf.mxu3 }
 0x295   : > { %1229 = vperm.xlu2 %1473, %v1484_v4   ;;  %v2031_v13 = vpop.eup %1485  ;;  %v998_v4 = vsel %vm456_vm5, %v997_v10, %v996_v36 }
 0x296   : > { %v556_v17 = vmul.f32 %v2031_v13, %v555_v11  ;;  %v1000_v11 = vsel %vm459_vm6, %v999_v24, %v998_v4 }
 0x29a   : > { %v559_v37 = vpop.xlane.xlu2 %558 }
 0x29b   : > { %v560_v20 = vadd.f32 %v559_v37, %v556_v17  ;;  %v1001_v17 = vpack.c.b16 %v1000_v11, %v1000_v11 }
 0x29c   : > { %v832_v26 = vpop.f32.mrf.mxu3 }
 0x29d   : > { %562 = vst.msk [vmem:[#allocation3] sm:$0xff] %vm341_vm10, %v560_v20  ;;  %v1006_v37 = vsel %vm630_vm11, %v1001_v17, 0 }
 0x29e   : > { %1015 = vmatpush.bf16.msrb.mxu3 %v1006_v37 }
 0x2a4   : > { %v1214_v50 = vld [vmem:[#allocation3] sm:$0xff] }
 0x2bb   : > { %v924_v18 = vpop.xlane.xlu1 %923 }
 0x2bc   : > { %v925_v29 = vmax.f32 %v921_v27, %v924_v18 }
 0x2be   : > { %v926_v1 = vsub.f32 %v921_v27, %v925_v29  ;;  %1023 = vst.msk [vmem:[#allocation2 + $0x10] sm:$0xff] %vm341_vm10, %v925_v29  ;;  %931 = vperm.xlu1 %1474, %v925_v29  }
 0x2c0   : > { %v927_v9 = vmul.f32 1.442695, %v926_v1  ;;  %v938_v1 = vld [vmem:[#allocation3 + $0x10] sm:$0xff] }
 0x2c2   : > { %1487 = vpow2.f32 %v927_v9 }
 0x2c3   : > { %1489 = vpow2.f32 %v1114_v38 }
 0x2c4   : > { %1491 = vrcp.f32 %v1214_v50 }
 0x2c8   : > { %v2039_v43 = vpop.eup %1487 }
 0x2c9   : > { %949 = vperm.xlu0 %1472, %v2039_v43   ;;  %v1490_v46 = vpop.eup %1489  ;;  %v939_v9 = vmul.f32 %v2039_v43, %v938_v1 }
 0x2ca   : > { %v1126_v47 = vmul.f32 %v1490_v46, %v1125_v57  ;;  %v1492_v6 = vpop.eup %1491  ;;  %v946_v57 = vld [vmem:[#allocation4 + $0x10] sm:$0xff] }
 0x2d1   : > { %1219 = vperm.xlu0 %1472, %v1492_v6  }
 0x2d8   : > { %v1129_v0 = vpop.xlane.xlu2 %1128 }
 0x2d9   : > { %v1130_v16 = vadd.f32 %v1129_v0, %v1126_v47 }
 0x2db   : > { %1131 = vst.msk [vmem:[#allocation3 + $0x18] sm:$0xff] %vm341_vm10, %v1130_v16 }
 0x2e0   : > { %v763_v52 = vpop.permute.xlu2 %762 }
 0x2e1   : > { %v765_v51 = vmul.f32 %v763_v52, %v759_v55 }
 0x2e2   : > { %v1244_v23 = vld [vmem:[#allocation3 + $0x18] sm:$0xff] }
 0x2e3   : > { %v834_v56 = vadd.f32 %v830_v58, %v765_v51  ;;  %1493 = vrcp.f32 %v1244_v23  ;;  %v1133_v23 = vld [vmem:[#allocation4 + $0x18] sm:$0xff] }
 0x2e5   : > { %835 = vst.msk [vmem:[#allocation4 + $0x8] sm:$0xff] %vm350_vm7, %v834_v56 }
 0x2e9   : > { %v1494_v34 = vpop.eup %1493  ;;  %v2044_v40 = vpop.f32.mrf.mxu2 }
 0x2ea   : > { %1249 = vperm.xlu0 %1472, %v1494_v34  }
 0x2ec   : > { %v1226_v61 = vld [vmem:[#allocation4 + $0x8] sm:$0xff] }
 0x2ef   : > { %v1230_v41 = vpop.permute.xlu2 %1229 }
 0x2f0   : > { %v1232_v62 = vmul.f32 %v1230_v41, %v1226_v61 }
 0x2f1   : > { %v1206_v28 = vpop.f32.mrf.mxu2 }
 0x2f2   : > { %v1233_v59 = vpack.c.bf16 %v1232_v62, %v1232_v62 }
 0x2f4   : > { %v1255_v44 = vunpack.c.l.b16 %v1233_v59 }
 0x2f6   : > { %v1256_v48 = vpack.c.b16 %v1255_v44, %v1255_v44 }
 0x2f8   : > { %1257 = vrot.lane.b32.xlu2 %v1256_v48, %s1526_s6 }
 0x330   : > { %v932_v20 = vpop.permute.xlu1 %931 }
 0x331   : > { %v934_v58 = vsub.f32 %v2017_v8, %v932_v20 }
 0x333   : > { %v935_v26 = vmul.f32 1.442695, %v934_v58 }
 0x335   : > { %1495 = vpow2.f32 %v935_v26 }
 0x33b   : > { %v1496_v27 = vpop.eup %1495  ;;  %v950_v47 = vpop.permute.xlu0 %949 }
 0x33c   : > { %v940_v18 = vsel %vm350_vm7, %v1496_v27, 0.0  ;;  %v953_v29 = vpack.c.bf16 %v1496_v27, %v1496_v27  ;;  %v952_v6 = vmul.f32 %v950_v47, %v946_v57 }
 0x33d   : > { %941 = vadd.xlane.f32.xlu1 %v940_v18 }
 0x33e   : > { %1434 = vmatmul.msk.bf16.vlgmr.msrb.gmra.mxu3 %vm350_vm7, %v953_v29 }
 0x343   : > { %v1220_v41 = vpop.permute.xlu0 %1219 }
 0x352   : > { %v1258_v63 = vpop.permute.xlu2 %1257 }
 0x356   : > { %566 = vperm.xlu1 %1474, %v2031_v13   ;;  %v563_v13 = vld [vmem:[#allocation4] sm:$0xff] }
 0x35c   : > { %v1250_v62 = vpop.permute.xlu0 %1249 }
 0x35e   : > { %1136 = vperm.xlu1 %1474, %v1490_v46  }
 0x3b0   : > { %v942_v38 = vpop.xlane.xlu1 %941 }
 0x3b1   : > { %v943_v50 = vadd.f32 %v942_v38, %v939_v9 }
 0x3b3   : > { %944 = vst.msk [vmem:[#allocation3 + $0x10] sm:$0xff] %vm341_vm10, %v943_v50 }
 0x3ba   : > { %v1234_v8 = vld [vmem:[#allocation3 + $0x10] sm:$0xff] }
 0x3bb   : > { %1497 = vrcp.f32 %v1234_v8 }
 0x3c1   : > { %v1498_v0 = vpop.eup %1497  ;;  %v1017_v16 = vpop.f32.mrf.mxu3 }
 0x3c2   : > { %v1021_v55 = vadd.f32 %v1017_v16, %v952_v6  ;;  %1239 = vperm.xlu1 %1474, %v1498_v0  }
 0x3c4   : > { %1022 = vst.msk [vmem:[#allocation4 + $0x10] sm:$0xff] %vm350_vm7, %v1021_v55 }
 0x3c8   : > { %v567_v46 = vpop.permute.xlu1 %566 }
 0x3c9   : > { %v569_v52 = vmul.f32 %v567_v46, %v563_v13  ;;  %v1019_v51 = vpop.f32.mrf.mxu3 }
 0x3cb   : > { %v647_v43 = vadd.f32 %v2005_v22, %v569_v52  ;;  %v1236_v45 = vld [vmem:[#allocation4 + $0x10] sm:$0xff] }
 0x3cd   : > { %648 = vst.msk [vmem:[#allocation4] sm:$0xff] %vm350_vm7, %v647_v43 }
 0x3d0   : > { %v1137_v56 = vpop.permute.xlu1 %1136 }
 0x3d1   : > { %v1139_v34 = vmul.f32 %v1137_v56, %v1133_v23 }
 0x3d3   : > { %v1208_v61 = vadd.f32 %v2044_v40, %v1139_v34 }
 0x3d4   : > { %v1216_v40 = vld [vmem:[#allocation4] sm:$0xff] }
 0x3d5   : > { %1209 = vst.msk [vmem:[#allocation4 + $0x18] sm:$0xff] %vm350_vm7, %v1208_v61  ;;  %v1222_v5 = vmul.f32 %v1220_v41, %v1216_v40 }
 0x3d7   : > { %v1223_v30 = vpack.c.bf16 %v1222_v5, %v1222_v5 }
 0x3d9   : > { %v1271_v19 = vsel %vm350_vm7, %v1223_v30, %v1258_v63 }
 0x3dc   : > { %v1246_v28 = vld [vmem:[#allocation4 + $0x18] sm:$0xff] }
 0x3dd   : > { %v1252_v59 = vmul.f32 %v1250_v62, %v1246_v28 }
 0x3df   : > { %v1253_v44 = vpack.c.bf16 %v1252_v59, %v1252_v59 }
 0x3e1   : > { %v1265_v48 = vunpack.c.l.b16 %v1253_v44 }
 0x3e3   : > { %v1266_v42 = vpack.c.b16 %v1265_v48, %v1265_v48 }
 0x3e5   : > { %1267 = vrot.lane.b32.xlu0 %v1266_v42, %s1527_s7 }
 0x434   : > { %v1240_v22 = vpop.permute.xlu1 %1239 }
 0x435   : > { %v1242_v31 = vmul.f32 %v1240_v22, %v1236_v45 }
 0x437   : > { %v1243_v49 = vpack.c.bf16 %v1242_v31, %v1242_v31 }
 0x439   : > { %v1260_v60 = vunpack.c.l.b16 %v1243_v49 }
 0x43b   : > { %v1261_v54 = vpack.c.b16 %v1260_v60, %v1260_v60 }
 0x43d   : > { %1262 = vrot.lane.b32.xlu1 %v1261_v54, %s1528_s8 }
 0x457   : > { %v1268_v7 = vpop.permute.xlu0 %1267 }
 0x4af   : > { %v1263_v53 = vpop.permute.xlu1 %1262 }
 0x4b0   : > { %v1274_v21 = vsel %vm1272_vm12, %v1271_v19, %v1263_v53 }
 0x4b1   : > { %v1277_v25 = vsel %vm1275_vm13, %v1274_v21, %v1268_v7 }
 0x4b2   : > { %1280 = vst.msk [vmem:[%s335_s12] sm:$0xf] %vm1279_vm14, %v1277_v25 }
 0x4b3 PF: > { %s14_s17 = sadd.s32 1, %s1521_s17   ;;  %s2106_s15 = smov %s1517_s16 }
 0x4b4   : > { %p11_p5 = scmp.ge.s32.totalorder %s14_s17, 4   ;;  %s2107_s16 = smov %s2109_s18 }
 0x4b6   :  { %13 = sbr.rel (!%p11_p5) target bundleno = 2 (0x2), region = 100 }

</bundles_post_ra>
